<compile_context>
chip_gen: v5e
topology: v5e:2x2
jax: 0.10.0
libtpu: 0.0.40
codegen_flags: <defaults>
</compile_context>

<pallas_src>
import numpy as np
import jax
import jax.numpy as jnp
from jax.experimental import pallas as pl
from jax.experimental.pallas import tpu as pltpu


def _round_up(x, m):
    return ((x + m - 1) // m) * m


# ---------------------------------------------------------------------------
# Parameter construction (deterministic, mirrors the PyTorch __init__ seeds)
# ---------------------------------------------------------------------------
def generate_sketch_matrix(rand_h, rand_s, output_dim):
    rand_h = rand_h.astype(np.int64)
    rand_s = rand_s.astype(np.float32)
    input_dim = len(rand_h)
    m = np.zeros((input_dim, output_dim), dtype=np.float32)
    m[np.arange(input_dim), rand_h] = rand_s
    return m


def make_sketch_matrices(input_dim1, input_dim2, output_dim):
    np.random.seed(1)
    rand_h_1 = np.random.randint(output_dim, size=input_dim1)
    np.random.seed(3)
    rand_s_1 = 2 * np.random.randint(2, size=input_dim1) - 1
    np.random.seed(5)
    rand_h_2 = np.random.randint(output_dim, size=input_dim2)
    np.random.seed(7)
    rand_s_2 = 2 * np.random.randint(2, size=input_dim2) - 1
    s1 = generate_sketch_matrix(rand_h_1, rand_s_1, output_dim)
    s2 = generate_sketch_matrix(rand_h_2, rand_s_2, output_dim)
    return s1, s2


# ---------------------------------------------------------------------------
# Pallas kernel
# ---------------------------------------------------------------------------
def _cbp_kernel(x1_ref, x2_ref, fa1_ref, fa2_ref, w_ref, o_ref, ri_ref, acc_ref):
    f = pl.program_id(1)

    @pl.when(f == 0)
    def _():
        acc_ref[...] = jnp.zeros_like(acc_ref)

    tf = ri_ref.shape[-1] // 2  # static F-block width (multiple of 128)

    # Fused forward half-spectrum DFT of the count sketch: one tiny-K matmul
    # per input yields [re | im] for this frequency block (f32 operands).
    ri1 = jnp.dot(x1_ref[...], fa1_ref[...], preferred_element_type=jnp.float32)
    ri2 = jnp.dot(x2_ref[...], fa2_ref[...], preferred_element_type=jnp.float32)
    re1, im1 = ri1[:, :tf], ri1[:, tf:]
    re2, im2 = ri2[:, :tf], ri2[:, tf:]

    # Complex product over the half spectrum (VPU, f32).  Write [rep | imp]
    # into adjacent halves of the (bf16) scratch so the inverse DFT is a
    # single K = 2*tile_f matmul (no post-matmul full-width VPU add).
    ri_ref[:, :tf] = (re1 * re2 - im1 * im2).astype(ri_ref.dtype)
    ri_ref[:, tf:] = (re1 * im2 + im1 * re2).astype(ri_ref.dtype)

    # Fused inverse real DFT for this frequency block; conjugate-symmetry
    # weights and the 1/D scale are folded into w host-side.  f32 accumulate.
    acc_ref[...] += jnp.dot(ri_ref[...], w_ref[...],
                            preferred_element_type=jnp.float32)

    @pl.when(f == pl.num_programs(1) - 1)
    def _():
        cbp = acc_ref[...]
        # Signed sqrt: x * rsqrt(|x|+eps) == sign(x)*sqrt(|x|+eps) up to O(eps);
        # keeps the zero-padded output columns exactly zero (EUP slot).
        cbp = cbp * jax.lax.rsqrt(jnp.abs(cbp) + 1e-10)
        # Row-wise L2 normalization (== F.normalize over channels in NCHW).
        sumsq = jnp.sum(cbp * cbp, axis=-1, keepdims=True)
        cbp = cbp * jax.lax.rsqrt(jnp.maximum(sumsq, 1e-24))
        o_ref[...] = cbp.astype(o_ref.dtype)


# ---------------------------------------------------------------------------
# Wrapper
# ---------------------------------------------------------------------------
def compact_bilinear_pooling(bottom1, bottom2, s1, s2, output_dim,
                             tile_n=512, inv_dtype=jnp.bfloat16,
                             out_dtype=jnp.float32):
    """bottom1: [B, C1, H, W], bottom2: [B, C2, H, W] (NCHW, like PyTorch).

    inv_dtype: dtype of the inverse-DFT basis and of the rep|imp matmul
    operands (the FLOP-dominant path).  bfloat16 gives ~2-4x MXU throughput
    with f32 accumulation; the forward DFT + complex product stay f32.
    """
    B, C1, H, W = bottom1.shape
    C2 = bottom2.shape[1]
    D = int(output_dim)

    s1 = np.asarray(s1, dtype=np.float64)
    s2 = np.asarray(s2, dtype=np.float64)

    F = D // 2 + 1                          # rFFT bins
    Fp = _round_up(max(F, 128), 128)        # lane-dense frequency axis
    Dp = _round_up(max(D, 128), 128)        # lane-dense output axis
    N = B * H * W
    inv_bytes = np.dtype(inv_dtype).itemsize
    out_bytes = np.dtype(out_dtype).itemsize

    # ---- tile selection: keep resident VMEM under a v7x-safe budget -------
    # Keep the grid at >= 2 row blocks so both TensorCores on v7x get work.
    tile_n = max(8, min(int(tile_n), _round_up(-(-N // 2), 8)))

    def vmem_bytes(tn, tf, const_bufs):
        fwd = const_bufs * (C1 + C2) * 2 * tf * 4          # f32 forward basis
        inv = const_bufs * 2 * tf * Dp * inv_bytes         # inverse basis
        io = 2 * tn * (C1 + C2) * 4 + 2 * tn * Dp * out_bytes
        scr = tn * Dp * 4 + tn * 2 * tf * inv_bytes        # acc + rep|imp scratch
        tmp = 10 * tn * 2 * tf * 4                         # re/im/product temps
        return fwd + inv + io + scr + tmp

    VMEM_BUDGET = 46 << 20                                 # v7x-safe (64 MiB phys)
    tile_f = Fp
    while tile_f > 128 and vmem_bytes(tile_n, tile_f, 2) > VMEM_BUDGET:
        tile_f = max(128, _round_up(tile_f // 2, 128))
    while tile_n > 64 and vmem_bytes(tile_n, tile_f, 2) > VMEM_BUDGET:
        tile_n = max(64, _round_up(tile_n // 2, 8))
    # TODO(synk): for very large output_dim also tile Dp and move the L2 norm
    # to a cheap second pass so the accumulator does not scale with D.

    Fp = _round_up(Fp, tile_f)
    n_fb = Fp // tile_f

    # ---- host-side constants: sketch folded into the half-spectrum DFT ----
    k = np.arange(D)[:, None]               # sketch-domain index
    fq = np.arange(F)[None, :]              # frequency index
    ang_fwd = 2.0 * np.pi * k * fq / D      # [D, F]

    def fwd_basis(s, c_in):
        ac = np.zeros((c_in, Fp))
        asn = np.zeros((c_in, Fp))
        ac[:, :F] = s @ np.cos(ang_fwd)
        asn[:, :F] = -(s @ np.sin(ang_fwd))                # forward-DFT minus sign
        fused = np.zeros((c_in, n_fb, 2, tile_f), np.float32)
        fused[:, :, 0, :] = ac.reshape(c_in, n_fb, tile_f)
        fused[:, :, 1, :] = asn.reshape(c_in, n_fb, tile_f)
        return fused.reshape(c_in, n_fb * 2 * tile_f)      # [cos | -sin] per F block

    fa1 = jnp.asarray(fwd_basis(s1, C1), jnp.float32)
    fa2 = jnp.asarray(fwd_basis(s2, C2), jnp.float32)

    n_idx = np.arange(D)[None, :]
    fr = np.arange(F)[:, None]
    ang_inv = 2.0 * np.pi * fr * n_idx / D                 # [F, D]
    wgt = np.full((F, 1), 2.0)                             # conjugate-symmetry weights
    wgt[0, 0] = 1.0
    if D % 2 == 0:
        wgt[-1, 0] = 1.0                                   # Nyquist bin
    wc = np.zeros((Fp, Dp))
    ws = np.zeros((Fp, Dp))
    wc[:F, :D] = (wgt / D) * np.cos(ang_inv)               # 1/D iFFT scale folded in
    ws[:F, :D] = -(wgt / D) * np.sin(ang_inv)
    w_stk = np.zeros((n_fb, 2, tile_f, Dp), np.float32)
    w_stk[:, 0] = wc.reshape(n_fb, tile_f, Dp)
    w_stk[:, 1] = ws.reshape(n_fb, tile_f, Dp)
    w_fused = jnp.asarray(w_stk.reshape(n_fb * 2 * tile_f, Dp), inv_dtype)

    # ---- activations: NCHW -> NHWC -> [N, C], pad rows to a tile multiple ----
    # TODO(synk): the NCHW<->NHWC transposes around the kernel are pure HBM
    # traffic; drop them if the consumer accepts the lane-dense [N, D] layout.
    x1f = jnp.transpose(bottom1, (0, 2, 3, 1)).reshape(-1, C1).astype(jnp.float32)
    x2f = jnp.transpose(bottom2, (0, 2, 3, 1)).reshape(-1, C2).astype(jnp.float32)
    n_pad = _round_up(N, tile_n)
    if n_pad != N:
        x1f = jnp.pad(x1f, ((0, n_pad - N), (0, 0)))
        x2f = jnp.pad(x2f, ((0, n_pad - N), (0, 0)))
    n_rb = n_pad // tile_n

    const_bufs = 1 if n_fb == 1 else 2
    vmem_limit = int(min(max(vmem_bytes(tile_n, tile_f, const_bufs) + (6 << 20),
                             32 << 20), 100 << 20))

    cost = pl.CostEstimate(
        flops=int(2 * n_pad * (C1 + C2) * 2 * Fp             # forward DFT dots
                  + 8 * n_pad * Fp                            # complex product
                  + 2 * n_pad * (2 * Fp) * Dp                 # inverse DFT dot
                  + 6 * n_pad * Dp),                          # epilogue
        transcendentals=int(2 * n_pad * Dp),
        bytes_accessed=int(4 * n_pad * (C1 + C2)
                           + 4 * (fa1.size + fa2.size)
                           + inv_bytes * w_fused.size
                           + out_bytes * n_pad * Dp),
    )

    def build(single_buffer_consts):
        # Grid-constant operands are only DMA'd once; single-buffering them
        # halves their resident VMEM (review item #1).
        def const_spec(shape, imap):
            if single_buffer_consts:
                return pl.BlockSpec(shape, imap, pipeline_mode=pl.Buffered(1))
            return pl.BlockSpec(shape, imap)

        return pl.pallas_call(
            _cbp_kernel,
            out_shape=jax.ShapeDtypeStruct((n_pad, Dp), out_dtype),
            grid_spec=pltpu.PrefetchScalarGridSpec(
                num_scalar_prefetch=0,
                grid=(n_rb, n_fb),                  # rows parallel, F reduction last
                in_specs=[
                    pl.BlockSpec((tile_n, C1), lambda i, f: (i, 0)),
                    pl.BlockSpec((tile_n, C2), lambda i, f: (i, 0)),
                    const_spec((C1, 2 * tile_f), lambda i, f: (0, f)),
                    const_spec((C2, 2 * tile_f), lambda i, f: (0, f)),
                    const_spec((2 * tile_f, Dp), lambda i, f: (f, 0)),
                ],
                out_specs=pl.BlockSpec((tile_n, Dp), lambda i, f: (i, 0)),
                scratch_shapes=[
                    pltpu.VMEM((tile_n, 2 * tile_f), inv_dtype),   # [rep | imp]
                    pltpu.VMEM((tile_n, Dp), jnp.float32),         # accumulator
                ],
            ),
            compiler_params=pltpu.CompilerParams(
                dimension_semantics=("parallel", "arbitrary"),
                vmem_limit_bytes=vmem_limit),
            cost_estimate=cost,
        )

    try:
        out_flat = build(n_fb == 1)(x1f, x2f, fa1, fa2, w_fused)
    except Exception:
        # Fallback if single-buffered pipeline_mode is unsupported on this jax.
        out_flat = build(False)(x1f, x2f, fa1, fa2, w_fused)

    # [N_pad, Dp] -> [N, D] -> [B, H, W, D] -> [B, D, H, W]
    return out_flat[:N, :D].reshape(B, H, W, D).transpose(0, 3, 1, 2)


# ---------------------------------------------------------------------------
# Pure-JAX reference (uses jnp.fft) for a sanity check
# ---------------------------------------------------------------------------
def reference(bottom1, bottom2, s1, s2, output_dim):
    B, C1, H, W = bottom1.shape
    s1 = jnp.asarray(s1, jnp.float32)
    s2 = jnp.asarray(s2, jnp.float32)
    x1f = jnp.transpose(bottom1, (0, 2, 3, 1)).reshape(-1, C1)
    x2f = jnp.transpose(bottom2, (0, 2, 3, 1)).reshape(-1, bottom2.shape[1])
    sk1 = x1f @ s1
    sk2 = x2f @ s2
    f1 = jnp.fft.fft(sk1)
    f2 = jnp.fft.fft(sk2)
    cbp = jnp.real(jnp.fft.ifft(f1 * f2))
    cbp = jnp.sign(cbp) * jnp.sqrt(jnp.abs(cbp) + 1e-10)
    cbp = cbp / jnp.maximum(
        jnp.linalg.norm(cbp, axis=-1, keepdims=True), 1e-12)
    return cbp.reshape(B, H, W, output_dim).transpose(0, 3, 1, 2)


if __name__ == "__main__":
    # Small shapes consistent with the module's forward:
    # bottom1/bottom2: [batch, input_dim, height, width]
    B, C1, C2, H, W = 2, 4, 4, 16, 16
    OUTPUT_DIM = 32

    key = jax.random.PRNGKey(0)
    k1, k2 = jax.random.split(key)
    bottom1 = jax.random.normal(k1, (B, C1, H, W), dtype=jnp.float32)
    bottom2 = jax.random.normal(k2, (B, C2, H, W), dtype=jnp.float32)

    s1, s2 = make_sketch_matrices(C1, C2, OUTPUT_DIM)

    out = compact_bilinear_pooling(bottom1, bottom2, s1, s2, OUTPUT_DIM)
    out = jax.block_until_ready(out)

    ref = jax.block_until_ready(reference(bottom1, bottom2, s1, s2, OUTPUT_DIM))
    # bf16 inverse-DFT basis (f32 accumulation) -> slightly looser tolerance.
    np.testing.assert_allclose(np.asarray(out), np.asarray(ref),
                               rtol=3e-2, atol=3e-2)

    assert out.shape == (B, OUTPUT_DIM, H, W)
    print("KERNEL_OK")
</pallas_src>

<mosaic_0001>
module attributes {stable_mosaic.version = 11 : i64} {
  func.func @_cbp_kernel(%arg0: i32, %arg1: i32, %arg2: memref<256x4xf32, #tpu.memory_space<vmem>>, %arg3: memref<256x4xf32, #tpu.memory_space<vmem>>, %arg4: memref<4x256xf32, #tpu.memory_space<vmem>>, %arg5: memref<4x256xf32, #tpu.memory_space<vmem>>, %arg6: memref<256x128xbf16, #tpu.memory_space<vmem>>, %arg7: memref<256x128xf32, #tpu.memory_space<vmem>>, %arg8: memref<256x256xbf16, #tpu.memory_space<vmem>>, %arg9: memref<256x128xf32, #tpu.memory_space<vmem>>) attributes {dimension_semantics = [#tpu.dimension_semantics<parallel>, #tpu.dimension_semantics<arbitrary>], iteration_bounds = array<i64: 2, 1>, scalar_prefetch = 0 : i64, scratch_operands = 2 : i64, tpu.core_type = #tpu.core_type<tc>, window_params = [{transform_indices = @transform_0, window_bounds = array<i64: 256, 4>}, {transform_indices = @transform_1, window_bounds = array<i64: 256, 4>}, {pipeline_mode = #tpu.pipeline_mode<synchronous>, transform_indices = @transform_2, window_bounds = array<i64: 4, 256>}, {pipeline_mode = #tpu.pipeline_mode<synchronous>, transform_indices = @transform_3, window_bounds = array<i64: 4, 256>}, {pipeline_mode = #tpu.pipeline_mode<synchronous>, transform_indices = @transform_4, window_bounds = array<i64: 256, 128>}, {transform_indices = @transform_5, window_bounds = array<i64: 256, 128>}]} {
    %c0_i32 = arith.constant 0 : i32
    %0 = arith.cmpi eq, %arg1, %c0_i32 : i32
    %1 = arith.extui %0 : i1 to i32
    %c0_i32_0 = arith.constant 0 : i32
    %2 = arith.cmpi ne, %1, %c0_i32_0 : i32
    scf.if %2 {
      %cst_23 = arith.constant 0.000000e+00 : f32
      %32 = vector.broadcast %cst_23 : f32 to vector<256x128xf32>
      %c0_24 = arith.constant 0 : index
      %c0_25 = arith.constant 0 : index
      %33 = vector.load %arg9[%c0_24, %c0_25] : memref<256x128xf32, #tpu.memory_space<vmem>>, vector<256x128xf32>
      tpu.vector_store %arg9[%c0_24, %c0_25], %32 {strides = array<i32>} : memref<256x128xf32, #tpu.memory_space<vmem>>, vector<256x128xf32>,
    } else {
    }
    %c0 = arith.constant 0 : index
    %c0_1 = arith.constant 0 : index
    %3 = vector.load %arg2[%c0, %c0_1] : memref<256x4xf32, #tpu.memory_space<vmem>>, vector<256x4xf32>
    %c0_2 = arith.constant 0 : index
    %c0_3 = arith.constant 0 : index
    %4 = vector.load %arg4[%c0_2, %c0_3] : memref<4x256xf32, #tpu.memory_space<vmem>>, vector<4x256xf32>
    %cst = arith.constant dense<0.000000e+00> : vector<256x256xf32>
    %5 = tpu.matmul %3, %4, %cst {dimension_numbers = #tpu.dot_dimension_numbers<[1], [0], [0], [1], [0, 0, 1, 1], [], []>} : vector<256x4xf32>, vector<4x256xf32>, vector<256x256xf32> -> vector<256x256xf32>
    %c0_4 = arith.constant 0 : index
    %c0_5 = arith.constant 0 : index
    %6 = vector.load %arg3[%c0_4, %c0_5] : memref<256x4xf32, #tpu.memory_space<vmem>>, vector<256x4xf32>
    %c0_6 = arith.constant 0 : index
    %c0_7 = arith.constant 0 : index
    %7 = vector.load %arg5[%c0_6, %c0_7] : memref<4x256xf32, #tpu.memory_space<vmem>>, vector<4x256xf32>
    %cst_8 = arith.constant dense<0.000000e+00> : vector<256x256xf32>
    %8 = tpu.matmul %6, %7, %cst_8 {dimension_numbers = #tpu.dot_dimension_numbers<[1], [0], [0], [1], [0, 0, 1, 1], [], []>} : vector<256x4xf32>, vector<4x256xf32>, vector<256x256xf32> -> vector<256x256xf32>
    %9 = vector.extract_strided_slice %5 {offsets = [0, 0], sizes = [256, 128], strides = [1, 1]} : vector<256x256xf32> to vector<256x128xf32>
    %10 = vector.extract_strided_slice %5 {offsets = [0, 128], sizes = [256, 128], strides = [1, 1]} : vector<256x256xf32> to vector<256x128xf32>
    %11 = vector.extract_strided_slice %8 {offsets = [0, 0], sizes = [256, 128], strides = [1, 1]} : vector<256x256xf32> to vector<256x128xf32>
    %12 = vector.extract_strided_slice %8 {offsets = [0, 128], sizes = [256, 128], strides = [1, 1]} : vector<256x256xf32> to vector<256x128xf32>
    %13 = arith.mulf %9, %11 : vector<256x128xf32>
    %14 = arith.mulf %10, %12 : vector<256x128xf32>
    %15 = arith.subf %13, %14 : vector<256x128xf32>
    %16 = arith.truncf %15 : vector<256x128xf32> to vector<256x128xbf16>
    %c0_9 = arith.constant 0 : index
    %c0_10 = arith.constant 0 : index
    %17 = vector.load %arg8[%c0_9, %c0_10] : memref<256x256xbf16, #tpu.memory_space<vmem>>, vector<256x128xbf16>
    tpu.vector_store %arg8[%c0_9, %c0_10], %16 {strides = array<i32>} : memref<256x256xbf16, #tpu.memory_space<vmem>>, vector<256x128xbf16>,
    %18 = arith.mulf %9, %12 : vector<256x128xf32>
    %19 = arith.mulf %10, %11 : vector<256x128xf32>
    %20 = arith.addf %18, %19 : vector<256x128xf32>
    %21 = arith.truncf %20 : vector<256x128xf32> to vector<256x128xbf16>
    %c0_11 = arith.constant 0 : index
    %c128 = arith.constant 128 : index
    %22 = vector.load %arg8[%c0_11, %c128] : memref<256x256xbf16, #tpu.memory_space<vmem>>, vector<256x128xbf16>
    tpu.vector_store %arg8[%c0_11, %c128], %21 {strides = array<i32>} : memref<256x256xbf16, #tpu.memory_space<vmem>>, vector<256x128xbf16>,
    %c0_12 = arith.constant 0 : index
    %c0_13 = arith.constant 0 : index
    %23 = vector.load %arg9[%c0_12, %c0_13] : memref<256x128xf32, #tpu.memory_space<vmem>>, vector<256x128xf32>
    %c0_14 = arith.constant 0 : index
    %c0_15 = arith.constant 0 : index
    %24 = vector.load %arg8[%c0_14, %c0_15] : memref<256x256xbf16, #tpu.memory_space<vmem>>, vector<256x256xbf16>
    %c0_16 = arith.constant 0 : index
    %c0_17 = arith.constant 0 : index
    %25 = vector.load %arg6[%c0_16, %c0_17] : memref<256x128xbf16, #tpu.memory_space<vmem>>, vector<256x128xbf16>
    %cst_18 = arith.constant dense<0.000000e+00> : vector<256x128xf32>
    %26 = tpu.matmul %24, %25, %cst_18 {dimension_numbers = #tpu.dot_dimension_numbers<[1], [0], [0], [1], [0, 0, 1, 1], [], []>} : vector<256x256xbf16>, vector<256x128xbf16>, vector<256x128xf32> -> vector<256x128xf32>
    %27 = arith.addf %23, %26 : vector<256x128xf32>
    %c0_19 = arith.constant 0 : index
    %c0_20 = arith.constant 0 : index
    %28 = vector.load %arg9[%c0_19, %c0_20] : memref<256x128xf32, #tpu.memory_space<vmem>>, vector<256x128xf32>
    tpu.vector_store %arg9[%c0_19, %c0_20], %27 {strides = array<i32>} : memref<256x128xf32, #tpu.memory_space<vmem>>, vector<256x128xf32>,
    %c0_i32_21 = arith.constant 0 : i32
    %29 = arith.cmpi eq, %arg1, %c0_i32_21 : i32
    %30 = arith.extui %29 : i1 to i32
    %c0_i32_22 = arith.constant 0 : i32
    %31 = arith.cmpi ne, %30, %c0_i32_22 : i32
    scf.if %31 {
      %c0_23 = arith.constant 0 : index
      %c0_24 = arith.constant 0 : index
      %32 = vector.load %arg9[%c0_23, %c0_24] : memref<256x128xf32, #tpu.memory_space<vmem>>, vector<256x128xf32>
      %33 = math.absf %32 : vector<256x128xf32>
      %cst_25 = arith.constant 1.000000e-10 : f32
      %34 = vector.broadcast %cst_25 : f32 to vector<256x128xf32>
      %35 = arith.addf %33, %34 : vector<256x128xf32>
      %36 = math.rsqrt %35 : vector<256x128xf32>
      %37 = arith.mulf %32, %36 : vector<256x128xf32>
      %38 = arith.mulf %37, %37 : vector<256x128xf32>
      %cst_26 = arith.constant dense<0.000000e+00> : vector<256xf32>
      %39 = vector.multi_reduction <add>, %38, %cst_26 [1] : vector<256x128xf32> to vector<256xf32>
      %40 = vector.shape_cast %39 : vector<256xf32> to vector<256x1xf32>
      %cst_27 = arith.constant 1.000000e-24 : f32
      %41 = vector.broadcast %cst_27 : f32 to vector<256x1xf32>
      %42 = arith.maximumf %40, %41 : vector<256x1xf32>
      %43 = math.rsqrt %42 : vector<256x1xf32>
      %44 = vector.broadcast %43 : vector<256x1xf32> to vector<256x128xf32>
      %45 = arith.mulf %37, %44 : vector<256x128xf32>
      %c0_28 = arith.constant 0 : index
      %c0_29 = arith.constant 0 : index
      %46 = vector.load %arg7[%c0_28, %c0_29] : memref<256x128xf32, #tpu.memory_space<vmem>>, vector<256x128xf32>
      tpu.vector_store %arg7[%c0_28, %c0_29], %45 {strides = array<i32>} : memref<256x128xf32, #tpu.memory_space<vmem>>, vector<256x128xf32>,
    } else {
    }
    return
  }
  func.func @transform_0(%arg0: i32, %arg1: i32) -> (i32, i32) {
    %c0_i32 = arith.constant 0 : i32
    %c0_i32_0 = arith.constant 0 : i32
    return %arg0, %c0_i32 : i32, i32
  }
  func.func @transform_1(%arg0: i32, %arg1: i32) -> (i32, i32) {
    %c0_i32 = arith.constant 0 : i32
    %c0_i32_0 = arith.constant 0 : i32
    return %arg0, %c0_i32 : i32, i32
  }
  func.func @transform_2(%arg0: i32, %arg1: i32) -> (i32, i32) {
    %c0_i32 = arith.constant 0 : i32
    %c0_i32_0 = arith.constant 0 : i32
    return %c0_i32, %arg1 : i32, i32
  }
  func.func @transform_3(%arg0: i32, %arg1: i32) -> (i32, i32) {
    %c0_i32 = arith.constant 0 : i32
    %c0_i32_0 = arith.constant 0 : i32
    return %c0_i32, %arg1 : i32, i32
  }
  func.func @transform_4(%arg0: i32, %arg1: i32) -> (i32, i32) {
    %c0_i32 = arith.constant 0 : i32
    %c0_i32_0 = arith.constant 0 : i32
    return %arg1, %c0_i32 : i32, i32
  }
  func.func @transform_5(%arg0: i32, %arg1: i32) -> (i32, i32) {
    %c0_i32 = arith.constant 0 : i32
    %c0_i32_0 = arith.constant 0 : i32
    return %arg0, %c0_i32 : i32, i32
  }
}

module attributes {stable_mosaic.version = 11 : i64} {
  func.func @_cbp_kernel(%arg0: i32, %arg1: i32, %arg2: memref<256x4xf32, #tpu.memory_space<vmem>>, %arg3: memref<256x4xf32, #tpu.memory_space<vmem>>, %arg4: memref<4x256xf32, #tpu.memory_space<vmem>>, %arg5: memref<4x256xf32, #tpu.memory_space<vmem>>, %arg6: memref<256x128xbf16, #tpu.memory_space<vmem>>, %arg7: memref<256x128xf32, #tpu.memory_space<vmem>>, %arg8: memref<256x256xbf16, #tpu.memory_space<vmem>>, %arg9: memref<256x128xf32, #tpu.memory_space<vmem>>) attributes {dimension_semantics = [#tpu.dimension_semantics<parallel>, #tpu.dimension_semantics<arbitrary>], iteration_bounds = array<i64: 2, 1>, scalar_prefetch = 0 : i64, scratch_operands = 2 : i64, tpu.core_type = #tpu.core_type<tc>, window_params = [{transform_indices = @transform_0, window_bounds = array<i64: 256, 4>}, {transform_indices = @transform_1, window_bounds = array<i64: 256, 4>}, {transform_indices = @transform_2, window_bounds = array<i64: 4, 256>}, {transform_indices = @transform_3, window_bounds = array<i64: 4, 256>}, {transform_indices = @transform_4, window_bounds = array<i64: 256, 128>}, {transform_indices = @transform_5, window_bounds = array<i64: 256, 128>}]} {
    %c0_i32 = arith.constant 0 : i32
    %0 = arith.cmpi eq, %arg1, %c0_i32 : i32
    %1 = arith.extui %0 : i1 to i32
    %c0_i32_0 = arith.constant 0 : i32
    %2 = arith.cmpi ne, %1, %c0_i32_0 : i32
    scf.if %2 {
      %cst_23 = arith.constant 0.000000e+00 : f32
      %32 = vector.broadcast %cst_23 : f32 to vector<256x128xf32>
      %c0_24 = arith.constant 0 : index
      %c0_25 = arith.constant 0 : index
      %33 = vector.load %arg9[%c0_24, %c0_25] : memref<256x128xf32, #tpu.memory_space<vmem>>, vector<256x128xf32>
      tpu.vector_store %arg9[%c0_24, %c0_25], %32 {strides = array<i32>} : memref<256x128xf32, #tpu.memory_space<vmem>>, vector<256x128xf32>,
    } else {
    }
    %c0 = arith.constant 0 : index
    %c0_1 = arith.constant 0 : index
    %3 = vector.load %arg2[%c0, %c0_1] : memref<256x4xf32, #tpu.memory_space<vmem>>, vector<256x4xf32>
    %c0_2 = arith.constant 0 : index
    %c0_3 = arith.constant 0 : index
    %4 = vector.load %arg4[%c0_2, %c0_3] : memref<4x256xf32, #tpu.memory_space<vmem>>, vector<4x256xf32>
    %cst = arith.constant dense<0.000000e+00> : vector<256x256xf32>
    %5 = tpu.matmul %3, %4, %cst {dimension_numbers = #tpu.dot_dimension_numbers<[1], [0], [0], [1], [0, 0, 1, 1], [], []>} : vector<256x4xf32>, vector<4x256xf32>, vector<256x256xf32> -> vector<256x256xf32>
    %c0_4 = arith.constant 0 : index
    %c0_5 = arith.constant 0 : index
    %6 = vector.load %arg3[%c0_4, %c0_5] : memref<256x4xf32, #tpu.memory_space<vmem>>, vector<256x4xf32>
    %c0_6 = arith.constant 0 : index
    %c0_7 = arith.constant 0 : index
    %7 = vector.load %arg5[%c0_6, %c0_7] : memref<4x256xf32, #tpu.memory_space<vmem>>, vector<4x256xf32>
    %cst_8 = arith.constant dense<0.000000e+00> : vector<256x256xf32>
    %8 = tpu.matmul %6, %7, %cst_8 {dimension_numbers = #tpu.dot_dimension_numbers<[1], [0], [0], [1], [0, 0, 1, 1], [], []>} : vector<256x4xf32>, vector<4x256xf32>, vector<256x256xf32> -> vector<256x256xf32>
    %9 = vector.extract_strided_slice %5 {offsets = [0, 0], sizes = [256, 128], strides = [1, 1]} : vector<256x256xf32> to vector<256x128xf32>
    %10 = vector.extract_strided_slice %5 {offsets = [0, 128], sizes = [256, 128], strides = [1, 1]} : vector<256x256xf32> to vector<256x128xf32>
    %11 = vector.extract_strided_slice %8 {offsets = [0, 0], sizes = [256, 128], strides = [1, 1]} : vector<256x256xf32> to vector<256x128xf32>
    %12 = vector.extract_strided_slice %8 {offsets = [0, 128], sizes = [256, 128], strides = [1, 1]} : vector<256x256xf32> to vector<256x128xf32>
    %13 = arith.mulf %9, %11 : vector<256x128xf32>
    %14 = arith.mulf %10, %12 : vector<256x128xf32>
    %15 = arith.subf %13, %14 : vector<256x128xf32>
    %16 = arith.truncf %15 : vector<256x128xf32> to vector<256x128xbf16>
    %c0_9 = arith.constant 0 : index
    %c0_10 = arith.constant 0 : index
    %17 = vector.load %arg8[%c0_9, %c0_10] : memref<256x256xbf16, #tpu.memory_space<vmem>>, vector<256x128xbf16>
    tpu.vector_store %arg8[%c0_9, %c0_10], %16 {strides = array<i32>} : memref<256x256xbf16, #tpu.memory_space<vmem>>, vector<256x128xbf16>,
    %18 = arith.mulf %9, %12 : vector<256x128xf32>
    %19 = arith.mulf %10, %11 : vector<256x128xf32>
    %20 = arith.addf %18, %19 : vector<256x128xf32>
    %21 = arith.truncf %20 : vector<256x128xf32> to vector<256x128xbf16>
    %c0_11 = arith.constant 0 : index
    %c128 = arith.constant 128 : index
    %22 = vector.load %arg8[%c0_11, %c128] : memref<256x256xbf16, #tpu.memory_space<vmem>>, vector<256x128xbf16>
    tpu.vector_store %arg8[%c0_11, %c128], %21 {strides = array<i32>} : memref<256x256xbf16, #tpu.memory_space<vmem>>, vector<256x128xbf16>,
    %c0_12 = arith.constant 0 : index
    %c0_13 = arith.constant 0 : index
    %23 = vector.load %arg9[%c0_12, %c0_13] : memref<256x128xf32, #tpu.memory_space<vmem>>, vector<256x128xf32>
    %c0_14 = arith.constant 0 : index
    %c0_15 = arith.constant 0 : index
    %24 = vector.load %arg8[%c0_14, %c0_15] : memref<256x256xbf16, #tpu.memory_space<vmem>>, vector<256x256xbf16>
    %c0_16 = arith.constant 0 : index
    %c0_17 = arith.constant 0 : index
    %25 = vector.load %arg6[%c0_16, %c0_17] : memref<256x128xbf16, #tpu.memory_space<vmem>>, vector<256x128xbf16>
    %cst_18 = arith.constant dense<0.000000e+00> : vector<256x128xf32>
    %26 = tpu.matmul %24, %25, %cst_18 {dimension_numbers = #tpu.dot_dimension_numbers<[1], [0], [0], [1], [0, 0, 1, 1], [], []>} : vector<256x256xbf16>, vector<256x128xbf16>, vector<256x128xf32> -> vector<256x128xf32>
    %27 = arith.addf %23, %26 : vector<256x128xf32>
    %c0_19 = arith.constant 0 : index
    %c0_20 = arith.constant 0 : index
    %28 = vector.load %arg9[%c0_19, %c0_20] : memref<256x128xf32, #tpu.memory_space<vmem>>, vector<256x128xf32>
    tpu.vector_store %arg9[%c0_19, %c0_20], %27 {strides = array<i32>} : memref<256x128xf32, #tpu.memory_space<vmem>>, vector<256x128xf32>,
    %c0_i32_21 = arith.constant 0 : i32
    %29 = arith.cmpi eq, %arg1, %c0_i32_21 : i32
    %30 = arith.extui %29 : i1 to i32
    %c0_i32_22 = arith.constant 0 : i32
    %31 = arith.cmpi ne, %30, %c0_i32_22 : i32
    scf.if %31 {
      %c0_23 = arith.constant 0 : index
      %c0_24 = arith.constant 0 : index
      %32 = vector.load %arg9[%c0_23, %c0_24] : memref<256x128xf32, #tpu.memory_space<vmem>>, vector<256x128xf32>
      %33 = math.absf %32 : vector<256x128xf32>
      %cst_25 = arith.constant 1.000000e-10 : f32
      %34 = vector.broadcast %cst_25 : f32 to vector<256x128xf32>
      %35 = arith.addf %33, %34 : vector<256x128xf32>
      %36 = math.rsqrt %35 : vector<256x128xf32>
      %37 = arith.mulf %32, %36 : vector<256x128xf32>
      %38 = arith.mulf %37, %37 : vector<256x128xf32>
      %cst_26 = arith.constant dense<0.000000e+00> : vector<256xf32>
      %39 = vector.multi_reduction <add>, %38, %cst_26 [1] : vector<256x128xf32> to vector<256xf32>
      %40 = vector.shape_cast %39 : vector<256xf32> to vector<256x1xf32>
      %cst_27 = arith.constant 1.000000e-24 : f32
      %41 = vector.broadcast %cst_27 : f32 to vector<256x1xf32>
      %42 = arith.maximumf %40, %41 : vector<256x1xf32>
      %43 = math.rsqrt %42 : vector<256x1xf32>
      %44 = vector.broadcast %43 : vector<256x1xf32> to vector<256x128xf32>
      %45 = arith.mulf %37, %44 : vector<256x128xf32>
      %c0_28 = arith.constant 0 : index
      %c0_29 = arith.constant 0 : index
      %46 = vector.load %arg7[%c0_28, %c0_29] : memref<256x128xf32, #tpu.memory_space<vmem>>, vector<256x128xf32>
      tpu.vector_store %arg7[%c0_28, %c0_29], %45 {strides = array<i32>} : memref<256x128xf32, #tpu.memory_space<vmem>>, vector<256x128xf32>,
    } else {
    }
    return
  }
  func.func @transform_0(%arg0: i32, %arg1: i32) -> (i32, i32) {
    %c0_i32 = arith.constant 0 : i32
    %c0_i32_0 = arith.constant 0 : i32
    return %arg0, %c0_i32 : i32, i32
  }
  func.func @transform_1(%arg0: i32, %arg1: i32) -> (i32, i32) {
    %c0_i32 = arith.constant 0 : i32
    %c0_i32_0 = arith.constant 0 : i32
    return %arg0, %c0_i32 : i32, i32
  }
  func.func @transform_2(%arg0: i32, %arg1: i32) -> (i32, i32) {
    %c0_i32 = arith.constant 0 : i32
    %c0_i32_0 = arith.constant 0 : i32
    return %c0_i32, %arg1 : i32, i32
  }
  func.func @transform_3(%arg0: i32, %arg1: i32) -> (i32, i32) {
    %c0_i32 = arith.constant 0 : i32
    %c0_i32_0 = arith.constant 0 : i32
    return %c0_i32, %arg1 : i32, i32
  }
  func.func @transform_4(%arg0: i32, %arg1: i32) -> (i32, i32) {
    %c0_i32 = arith.constant 0 : i32
    %c0_i32_0 = arith.constant 0 : i32
    return %arg1, %c0_i32 : i32, i32
  }
  func.func @transform_5(%arg0: i32, %arg1: i32) -> (i32, i32) {
    %c0_i32 = arith.constant 0 : i32
    %c0_i32_0 = arith.constant 0 : i32
    return %arg0, %c0_i32 : i32, i32
  }
}

</mosaic_0001>

<bundles_post_ra>
// kernel: tpu_custom_call.1
= control target key start
LH: loop header
LB: loop body
LE: loop exit
PB: predicated region body
PF: predicated region fallthrough
CT: control target
= control target key end

     0   :  { %10 = vsyncpa [#allocation5], 0  ;;  %s4819_s0 = inlined_call_operand.vmem [shape: f32[512,4], index: 0, kind: input, shape index: {}]   ;;  %s4820_s1 = inlined_call_operand.vmem [shape: f32[512,4], index: 1, kind: input, shape index: {}]   ;;  %s4821_s2 = inlined_call_operand.vmem [shape: f32[4,256], index: 2, kind: input, shape index: {}]   ;;  %s4822_s3 = inlined_call_operand.vmem [shape: f32[4,256], index: 3, kind: input, shape index: {}]   ;;  %s4823_s4 = inlined_call_operand.vmem [shape: bf16[256,128], index: 4, kind: input, shape index: {}]   ;;  %s4824_s5 = inlined_call_operand.hbm [shape: f32[512,128], index: 5, kind: output, shape index: {}]  }
   0x1   :  { %12 = vsyncpa [#allocation5 + $0x1], 0  ;;  %s3800_s18 = smov 0   ;;  %s3802_s19 = smov 0  }
   0x2   :  { %s3804_s20 = smov 0   ;;  %s3806_s21 = smov 0  }
   0x3   :  { %s3808_s22 = smov 0   ;;  %s3810_s23 = smov 0  }
   0x4 LB: > { %s3110_s24 = sadd.s32 4294967295, %s3766_s23   ;;  %s3111_s25 = sadd.s32 4294967294, %s3766_s23   ;;  %s3766_s23 = sphi %s3810_s23, %s18_s23   ;;  %s3762_s22 = sphi %s3808_s22, %s4831_s22   ;;  %s3758_s21 = sphi %s3806_s21, %s4830_s21   ;;  %s3754_s20 = sphi %s3804_s20, %s4829_s20   ;;  %s3750_s19 = sphi %s3802_s19, %s4828_s19   ;;  %s3746_s18 = sphi %s3800_s18, %s4827_s18  }
   0x5   : > { %s30_s26 = sadd.s32 1, %s3762_s22  ;;  %s167_s27 = sadd.s32 1, %s3754_s20 }
   0x6   : > { %p32_p0 = scmp.ge.s32.totalorder %s30_s26, 2  ;;  %p177_p1 = scmp.ne.s32.totalorder %s3754_s20, %s3750_s19 }
   0x7   : > { %p178_p2 = scmp.eq.s32.totalorder %s3110_s24, 1  ;;  %p183_p3 = scmp.ne.s32.totalorder %s3750_s19, %s3746_s18 }
   0x8   : > { %s4833_s26 = smov (%p32_p0, %s30_s26), 0  ;;  %p184_p5 = scmp.eq.s32.totalorder %s3111_s25, 1 }
   0x9   : > { %p3840_p4 = por %p178_p2, %p177_p1  ;;  %s164_s29 = ssub.s32 %s3762_s22, %s4833_s26 }
   0xa   : > { %p3117_p6 = scmp.ge.s32.totalorder %s3766_s23, 1  ;;  %p165_p7 = scmp.eq.s32.totalorder %s164_s29, 0 }
   0xb   : > { %p3847_p8 = por %p184_p5, %p183_p3  ;;  %p247_p9 = scmp.lt.s32.totalorder %s3766_s23, 3 }
   0xc   : > { %s3853_s6 = scalar_select %p165_p7, %s3754_s20, %s167_s27  }
   0xd   : > { %p248_p10 = pnand %p3117_p6, %p247_p9 }
   0xe   : > { %s3119_s9 = sshll.u32 (!%p248_p10), %s3758_s21, 5  ;;  %s3500_s11 = sshll.u32 (!%p248_p10), %s3758_s21, 8 }
   0xf   : > { %251 = sbr.rel (%p248_p10) target bundleno = 859 (0x35b), region = 40  ;;  %p296_p11 = scmp.lt.s32.totalorder (!%p248_p10), %s3119_s9, 63 }
  0x10   : > { %s2979_s14 = scalar_lea.hbm (!%p248_p10), %s4824_s5, %s3500_s11  ;;  %s3708_s7 = scalar_lea.hbm (!%p248_p10), %s4824_s5, 512 }
  0x11   : > { %s2982_s16 = sshll.u32 (!%p248_p10), %s2979_s14, 4  ;;  %s2983_s16 = int_to_ptr.hbm [resolvable:$true] %s2982_s16 }
  0x12   : > { %s3702_s17 = sshra.s32 (!%p248_p10), %s2983_s16, 4  ;;  %s3703_s17 = int_to_ptr.hbm [resolvable:$true] %s3702_s17 }
  0x13   : > { %s3704_s25 = scalar_lea.hbm (!%p248_p10), %s3703_s17, 256  ;;  %p3709_p1 = scmp.lt.s32.totalorder (!%p248_p10), %s3703_s17, %s4824_s5 }
  0x14   : > { %v394_v0 = vld [vmem:[%s4821_s2] sm:$0xff]  ;;  %s4835_s9 = smov (!%p296_p11, %s3119_s9), 63  ;;  %vm496_vm0 = vcmask 1043456   ;;  %vm399_vm1 = vcmask 31744   ;;  %v3491_v29 = vld [vmem:[%s4823_s4 + $0x38] sm:$0xff]  ;;  %v3490_v39 = vld [vmem:[%s4823_s4 + $0x30] sm:$0xff]  ;;  %p3705_p12 = scmp.ne.s32.totalorder %s3703_s17, %s3704_s25 }
  0x15   : > { %396 = vst [vmem:[#allocation1] ss:$2 sm:$0xff] %v394_v0  ;;  %s3120_s10 = sshll.u32 %s4835_s9, 3  ;;  %v759_v1 = vld [vmem:[%s4822_s3] sm:$0xff]  ;;  %v3499_v30 = vld [vmem:[%s4823_s4 + $0x78] sm:$0xff]  ;;  %v3498_v40 = vld [vmem:[%s4823_s4 + $0x70] sm:$0xff]  ;;  %p3710_p2 = scmp.lt.s32.totalorder %s3708_s7, %s3704_s25 }
  0x16   : > { %s3870_s15 = scalar_lea.vmem %s4819_s0, %s3120_s10  ;;  %s3940_s24 = scalar_lea.vmem %s4820_s1, %s3120_s10  ;;  %v3489_v49 = vld [vmem:[%s4823_s4 + $0x28] sm:$0xff]  ;;  %v3488_v59 = vld [vmem:[%s4823_s4 + $0x20] sm:$0xff] }
  0x17   : > { %v378_v2 = vld [vmem:[%s3870_s15 + $0x80] sm:$0xff]  ;;  %v379_v5 = vld [vmem:[%s3870_s15 + $0x88] sm:$0xff]  ;;  %v380_v8 = vld [vmem:[%s3870_s15 + $0x90] sm:$0xff]  ;;  %p3706_p13 = pnand %p3705_p12, %p3840_p4  ;;  %p3711_p3 = por %p3710_p2, %p3709_p1 }
  0x18   : > { %v381_v9 = vld [vmem:[%s3870_s15 + $0x98] sm:$0xff]  ;;  %v382_v10 = vld [vmem:[%s3870_s15 + $0xa0] sm:$0xff]  ;;  %v383_v11 = vld [vmem:[%s3870_s15 + $0xa8] sm:$0xff] }
  0x19   : > { %v384_v12 = vld [vmem:[%s3870_s15 + $0xb0] sm:$0xff]  ;;  %v385_v13 = vld [vmem:[%s3870_s15 + $0xb8] sm:$0xff]  ;;  %v386_v14 = vld [vmem:[%s3870_s15 + $0xc0] sm:$0xff]  ;;  %p3707_p0 = pneg %p3706_p13 }
  0x1a   : > { %v387_v15 = vld [vmem:[%s3870_s15 + $0xc8] sm:$0xff]  ;;  %v388_v16 = vld [vmem:[%s3870_s15 + $0xd0] sm:$0xff]  ;;  %v389_v17 = vld [vmem:[%s3870_s15 + $0xd8] sm:$0xff] }
  0x1b   : > { %v390_v18 = vld [vmem:[%s3870_s15 + $0xe0] sm:$0xff]  ;;  %v391_v20 = vld [vmem:[%s3870_s15 + $0xe8] sm:$0xff]  ;;  %v392_v22 = vld [vmem:[%s3870_s15 + $0xf0] sm:$0xff]  ;;  %p3712_p5 = pnand %p3711_p3, %p3707_p0 }
  0x1c   : > { %v397_v3 = vld.sshfl [vmem:[#allocation1] sm:$0xff pattern:$0x75316420]  ;;  %v398_v4 = vld.sshfl [vmem:[#allocation1 + $0x8] sm:$0xff pattern:$0x75316420] }
  0x1d   : > { %3501 = vmatpush.msk.msra.mxu2 %vm496_vm0, %v397_v3  ;;  %3502 = vmatpush.msk.msra.mxu3 %vm496_vm0, %v398_v4  ;;  %761 = vst [vmem:[#allocation1] ss:$2 sm:$0xff] %v759_v1  ;;  %v362_v19 = vld [vmem:[%s3870_s15] sm:$0xff]  ;;  %v363_v21 = vld [vmem:[%s3870_s15 + $0x8] sm:$0xff]  ;;  %v364_v23 = vld [vmem:[%s3870_s15 + $0x10] sm:$0xff] }
  0x1e   : > { %3140 = vmatmul.msk.f32.vlgmr.msra.gmra.mxu2 %vm399_vm1, %v378_v2  ;;  %3173 = vmatmul.msk.f32.vlgmr.msra.gmra.mxu3 %vm399_vm1, %v378_v2  ;;  %v393_v24 = vld [vmem:[%s3870_s15 + $0xf8] sm:$0xff]  ;;  %v727_v26 = vld [vmem:[%s3940_s24] sm:$0xff]  ;;  %v728_v32 = vld [vmem:[%s3940_s24 + $0x8] sm:$0xff] }
  0x1f   : > { %3123 = vmatpush.msk.msra.mxu0 %vm496_vm0, %v397_v3  ;;  %3156 = vmatpush.msk.msra.mxu1 %vm496_vm0, %v398_v4  ;;  %v365_v25 = vld [vmem:[%s3870_s15 + $0x18] sm:$0xff]  ;;  %v366_v31 = vld [vmem:[%s3870_s15 + $0x20] sm:$0xff]  ;;  %v367_v35 = vld [vmem:[%s3870_s15 + $0x28] sm:$0xff] }
  0x20   : > { %3124 = vmatmul.msk.f32.vlgmr.msra.gmra.mxu0 %vm399_vm1, %v362_v19  ;;  %3157 = vmatmul.msk.f32.vlgmr.msra.gmra.mxu1 %vm399_vm1, %v362_v19  ;;  %v729_v36 = vld [vmem:[%s3940_s24 + $0x10] sm:$0xff]  ;;  %v730_v42 = vld [vmem:[%s3940_s24 + $0x18] sm:$0xff]  ;;  %v731_v46 = vld [vmem:[%s3940_s24 + $0x20] sm:$0xff] }
  0x21   : > { %1762 = vmatpush.bf16.msrb.mxu0 %v3491_v29  ;;  %1851 = vmatpush.bf16.msrb.mxu1 %v3499_v30  ;;  %v368_v41 = vld [vmem:[%s3870_s15 + $0x30] sm:$0xff]  ;;  %v369_v45 = vld [vmem:[%s3870_s15 + $0x38] sm:$0xff]  ;;  %v3497_v50 = vld [vmem:[%s4823_s4 + $0x68] sm:$0xff] }
  0x22   : > { %v370_v51 = vld [vmem:[%s3870_s15 + $0x40] sm:$0xff]  ;;  %v732_v52 = vld [vmem:[%s3940_s24 + $0x28] sm:$0xff]  ;;  %v733_v56 = vld [vmem:[%s3940_s24 + $0x30] sm:$0xff] }
  0x23   : > { %v371_v55 = vld [vmem:[%s3870_s15 + $0x48] sm:$0xff]  ;;  %v3496_v60 = vld [vmem:[%s4823_s4 + $0x60] sm:$0xff]  ;;  %v372_v61 = vld [vmem:[%s3870_s15 + $0x50] sm:$0xff] }
  0x24   : > { %v762_v6 = vld.sshfl [vmem:[#allocation1] sm:$0xff pattern:$0x75316420]  ;;  %v763_v7 = vld.sshfl [vmem:[#allocation1 + $0x8] sm:$0xff pattern:$0x75316420] }
  0x25   : > { %3189 = vmatpush.msk.msrb.mxu2 %vm496_vm0, %v762_v6  ;;  %3222 = vmatpush.msk.msrb.mxu3 %vm496_vm0, %v763_v7  ;;  %v734_v62 = vld [vmem:[%s3940_s24 + $0x38] sm:$0xff]  ;;  %v735_v2 = vld [vmem:[%s3940_s24 + $0x40] sm:$0xff]  ;;  %v740_v29 = vld [vmem:[%s3940_s24 + $0x68] sm:$0xff] }
  0x26   : > { %3141 = vmatmul.msk.f32.gmra.mxu2 %vm399_vm1, %v379_v5  ;;  %3174 = vmatmul.msk.f32.gmra.mxu3 %vm399_vm1, %v379_v5  ;;  %v373_v1 = vld [vmem:[%s3870_s15 + $0x58] sm:$0xff]  ;;  %v374_v7 = vld [vmem:[%s3870_s15 + $0x60] sm:$0xff] }
  0x27   : > { %1763 = vmatpush.bf16.msrb.mxu0 %v3490_v39  ;;  %1852 = vmatpush.bf16.msrb.mxu1 %v3498_v40  ;;  %v3487_v5 = vld [vmem:[%s4823_s4 + $0x18] sm:$0xff]  ;;  %v741_v40 = vld [vmem:[%s3940_s24 + $0x70] sm:$0xff] }
  0x28   : > { %3125 = vmatmul.msk.f32.gmra.mxu0 %vm399_vm1, %v363_v21  ;;  %3158 = vmatmul.msk.f32.gmra.mxu1 %vm399_vm1, %v363_v21  ;;  %v3495_v6 = vld [vmem:[%s4823_s4 + $0x58] sm:$0xff] }
  0x29   : > { %v377_v21 = vld [vmem:[%s3870_s15 + $0x78] sm:$0xff] }
  0x2b   : > { %1764 = vmatpush.bf16.msrb.mxu0 %v3489_v49  ;;  %1853 = vmatpush.bf16.msrb.mxu1 %v3497_v50  ;;  %v3484_v50 = vld [vmem:[%s4823_s4] sm:$0xff] }
  0x2e   : > { %3142 = vmatmul.msk.f32.gmra.mxu2 %vm399_vm1, %v380_v8  ;;  %3175 = vmatmul.msk.f32.gmra.mxu3 %vm399_vm1, %v380_v8  ;;  %v736_v8 = vld [vmem:[%s3940_s24 + $0x48] sm:$0xff] }
  0x2f   : > { %1765 = vmatpush.bf16.msrb.mxu0 %v3488_v59  ;;  %1854 = vmatpush.bf16.msrb.mxu1 %v3496_v60 }
  0x30   : > { %3126 = vmatmul.msk.f32.gmra.mxu0 %vm399_vm1, %v364_v23  ;;  %3159 = vmatmul.msk.f32.gmra.mxu1 %vm399_vm1, %v364_v23 }
  0x33   : > { %1766 = vmatpush.bf16.msrb.mxu0 %v3487_v5  ;;  %1855 = vmatpush.bf16.msrb.mxu1 %v3495_v6 }
  0x36   : > { %3143 = vmatmul.msk.f32.gmra.mxu2 %vm399_vm1, %v381_v9  ;;  %3176 = vmatmul.msk.f32.gmra.mxu3 %vm399_vm1, %v381_v9 }
  0x38   : > { %3127 = vmatmul.msk.f32.gmra.mxu0 %vm399_vm1, %v365_v25  ;;  %3160 = vmatmul.msk.f32.gmra.mxu1 %vm399_vm1, %v365_v25 }
  0x3e   : > { %3144 = vmatmul.msk.f32.gmra.mxu2 %vm399_vm1, %v382_v10  ;;  %3177 = vmatmul.msk.f32.gmra.mxu3 %vm399_vm1, %v382_v10 }
  0x40   : > { %3128 = vmatmul.msk.f32.gmra.mxu0 %vm399_vm1, %v366_v31  ;;  %3161 = vmatmul.msk.f32.gmra.mxu1 %vm399_vm1, %v366_v31 }
  0x46   : > { %3145 = vmatmul.msk.f32.gmra.mxu2 %vm399_vm1, %v383_v11  ;;  %3178 = vmatmul.msk.f32.gmra.mxu3 %vm399_vm1, %v383_v11  ;;  %v375_v11 = vld [vmem:[%s3870_s15 + $0x68] sm:$0xff] }
  0x48   : > { %3129 = vmatmul.msk.f32.gmra.mxu0 %vm399_vm1, %v367_v35  ;;  %3162 = vmatmul.msk.f32.gmra.mxu1 %vm399_vm1, %v367_v35  ;;  %v3493_v35 = vld [vmem:[%s4823_s4 + $0x48] sm:$0xff] }
  0x4e   : > { %3146 = vmatmul.msk.f32.gmra.mxu2 %vm399_vm1, %v384_v12  ;;  %3179 = vmatmul.msk.f32.gmra.mxu3 %vm399_vm1, %v384_v12  ;;  %v737_v12 = vld [vmem:[%s3940_s24 + $0x50] sm:$0xff] }
  0x50   : > { %3130 = vmatmul.msk.f32.gmra.mxu0 %vm399_vm1, %v368_v41  ;;  %3163 = vmatmul.msk.f32.gmra.mxu1 %vm399_vm1, %v368_v41 }
  0x56   : > { %3147 = vmatmul.msk.f32.gmra.mxu2 %vm399_vm1, %v385_v13  ;;  %3180 = vmatmul.msk.f32.gmra.mxu3 %vm399_vm1, %v385_v13 }
  0x58   : > { %3131 = vmatmul.msk.f32.gmra.mxu0 %vm399_vm1, %v369_v45  ;;  %3164 = vmatmul.msk.f32.gmra.mxu1 %vm399_vm1, %v369_v45  ;;  %v742_v45 = vld [vmem:[%s3940_s24 + $0x78] sm:$0xff] }
  0x5e   : > { %3148 = vmatmul.msk.f32.gmra.mxu2 %vm399_vm1, %v386_v14  ;;  %3181 = vmatmul.msk.f32.gmra.mxu3 %vm399_vm1, %v386_v14 }
  0x60   : > { %3132 = vmatmul.msk.f32.gmra.mxu0 %vm399_vm1, %v370_v51  ;;  %3165 = vmatmul.msk.f32.gmra.mxu1 %vm399_vm1, %v370_v51  ;;  %v3492_v51 = vld [vmem:[%s4823_s4 + $0x40] sm:$0xff] }
  0x66   : > { %3149 = vmatmul.msk.f32.gmra.mxu2 %vm399_vm1, %v387_v15  ;;  %3182 = vmatmul.msk.f32.gmra.mxu3 %vm399_vm1, %v387_v15  ;;  %v3486_v15 = vld [vmem:[%s4823_s4 + $0x10] sm:$0xff] }
  0x67   : > { %1767 = vmatpush.bf16.msrb.mxu0 %v3486_v15 }
  0x68   : > { %3133 = vmatmul.msk.f32.gmra.mxu0 %vm399_vm1, %v371_v55  ;;  %3166 = vmatmul.msk.f32.gmra.mxu1 %vm399_vm1, %v371_v55 }
  0x6e   : > { %3150 = vmatmul.msk.f32.gmra.mxu2 %vm399_vm1, %v388_v16  ;;  %3183 = vmatmul.msk.f32.gmra.mxu3 %vm399_vm1, %v388_v16  ;;  %v3494_v16 = vld [vmem:[%s4823_s4 + $0x50] sm:$0xff] }
  0x6f   : > { %1856 = vmatpush.bf16.msrb.mxu1 %v3494_v16 }
  0x70   : > { %3134 = vmatmul.msk.f32.gmra.mxu0 %vm399_vm1, %v372_v61  ;;  %3167 = vmatmul.msk.f32.gmra.mxu1 %vm399_vm1, %v372_v61 }
  0x73   : > { %1857 = vmatpush.bf16.msrb.mxu1 %v3493_v35 }
  0x76   : > { %3151 = vmatmul.msk.f32.gmra.mxu2 %vm399_vm1, %v389_v17  ;;  %3184 = vmatmul.msk.f32.gmra.mxu3 %vm399_vm1, %v389_v17  ;;  %v376_v17 = vld [vmem:[%s3870_s15 + $0x70] sm:$0xff] }
  0x77   : > { %1858 = vmatpush.bf16.msrb.mxu1 %v3492_v51 }
  0x78   : > { %3135 = vmatmul.msk.f32.gmra.mxu0 %vm399_vm1, %v373_v1  ;;  %3168 = vmatmul.msk.f32.gmra.mxu1 %vm399_vm1, %v373_v1 }
  0x7e   : > { %3152 = vmatmul.msk.f32.gmra.mxu2 %vm399_vm1, %v390_v18  ;;  %3185 = vmatmul.msk.f32.gmra.mxu3 %vm399_vm1, %v390_v18  ;;  %v738_v18 = vld [vmem:[%s3940_s24 + $0x58] sm:$0xff] }
  0x80   : > { %3136 = vmatmul.msk.f32.gmra.mxu0 %vm399_vm1, %v374_v7  ;;  %3169 = vmatmul.msk.f32.gmra.mxu1 %vm399_vm1, %v374_v7  ;;  %v744_v7 = vld [vmem:[%s3940_s24 + $0x88] sm:$0xff] }
  0x86   : > { %3153 = vmatmul.msk.f32.gmra.mxu2 %vm399_vm1, %v391_v20  ;;  %3186 = vmatmul.msk.f32.gmra.mxu3 %vm399_vm1, %v391_v20 }
  0x88   : > { %3137 = vmatmul.msk.f32.gmra.mxu0 %vm399_vm1, %v375_v11  ;;  %3170 = vmatmul.msk.f32.gmra.mxu1 %vm399_vm1, %v375_v11 }
  0x8e   : > { %3154 = vmatmul.msk.f32.gmra.mxu2 %vm399_vm1, %v392_v22  ;;  %3187 = vmatmul.msk.f32.gmra.mxu3 %vm399_vm1, %v392_v22  ;;  %v739_v22 = vld [vmem:[%s3940_s24 + $0x60] sm:$0xff] }
  0x90   : > { %3138 = vmatmul.msk.f32.gmra.mxu0 %vm399_vm1, %v376_v17  ;;  %3171 = vmatmul.msk.f32.gmra.mxu1 %vm399_vm1, %v376_v17 }
  0x96   : > { %3155 = vmatmul.msk.f32.gmra.mxu2 %vm399_vm1, %v393_v24  ;;  %3188 = vmatmul.msk.f32.gmra.mxu3 %vm399_vm1, %v393_v24 }
  0x98   : > { %3139 = vmatmul.msk.f32.gmra.mxu0 %vm399_vm1, %v377_v21  ;;  %3172 = vmatmul.msk.f32.gmra.mxu1 %vm399_vm1, %v377_v21 }
  0x9d   : > { %v518_v23 = vpop.f32.mrf.mxu0  ;;  %v631_v24 = vpop.f32.mrf.mxu1 }
  0x9e   : > { %3190 = vmatmul.msk.f32.vlgmr.msrb.gmra.mxu2 %vm399_vm1, %v727_v26  ;;  %3223 = vmatmul.msk.f32.vlgmr.msrb.gmra.mxu3 %vm399_vm1, %v727_v26 }
  0xa1   : > { %v3948_v27 = vpop.f32.mrf.mxu2  ;;  %v3950_v28 = vpop.f32.mrf.mxu3 }
  0xa5   : > { %v634_v39 = vpop.f32.mrf.mxu1 }
  0xa6   : > { %3191 = vmatmul.msk.f32.gmra.mxu2 %vm399_vm1, %v728_v32  ;;  %3224 = vmatmul.msk.f32.gmra.mxu3 %vm399_vm1, %v728_v32  ;;  %v3485_v32 = vld [vmem:[%s4823_s4 + $0x8] sm:$0xff] }
  0xa7   : > { %1768 = vmatpush.bf16.msrb.mxu0 %v3485_v32  ;;  %v745_v32 = vld [vmem:[%s3940_s24 + $0x90] sm:$0xff] }
  0xa9   : > { %v3964_v33 = vpop.f32.mrf.mxu2  ;;  %v3966_v34 = vpop.f32.mrf.mxu3 }
  0xab   : > { %1769 = vmatpush.bf16.msrb.mxu0 %v3484_v50 }
  0xad   : > { %v637_v49 = vpop.f32.mrf.mxu1 }
  0xae   : > { %3192 = vmatmul.msk.f32.gmra.mxu2 %vm399_vm1, %v729_v36  ;;  %3225 = vmatmul.msk.f32.gmra.mxu3 %vm399_vm1, %v729_v36  ;;  %v521_v36 = vpop.f32.mrf.mxu0 }
  0xb1   : > { %v3974_v37 = vpop.f32.mrf.mxu2  ;;  %v3976_v38 = vpop.f32.mrf.mxu3 }
  0xb5   : > { %v640_v60 = vpop.f32.mrf.mxu1 }
  0xb6   : > { %3193 = vmatmul.msk.f32.gmra.mxu2 %vm399_vm1, %v730_v42  ;;  %3226 = vmatmul.msk.f32.gmra.mxu3 %vm399_vm1, %v730_v42 }
  0xb9   : > { %v3990_v43 = vpop.f32.mrf.mxu2  ;;  %v3992_v44 = vpop.f32.mrf.mxu3 }
  0xbd   : > { %v4149_v17 = vpop.f32.mrf.mxu1 }
  0xbe   : > { %3194 = vmatmul.msk.f32.gmra.mxu2 %vm399_vm1, %v731_v46  ;;  %3227 = vmatmul.msk.f32.gmra.mxu3 %vm399_vm1, %v731_v46  ;;  %v524_v46 = vpop.f32.mrf.mxu0 }
  0xc1   : > { %v4000_v47 = vpop.f32.mrf.mxu2  ;;  %v4002_v48 = vpop.f32.mrf.mxu3 }
  0xc6   : > { %3195 = vmatmul.msk.f32.gmra.mxu2 %vm399_vm1, %v732_v52  ;;  %3228 = vmatmul.msk.f32.gmra.mxu3 %vm399_vm1, %v732_v52  ;;  %v527_v59 = vpop.f32.mrf.mxu0 }
  0xc9   : > { %v4016_v53 = vpop.f32.mrf.mxu2  ;;  %v4018_v54 = vpop.f32.mrf.mxu3 }
  0xce   : > { %3196 = vmatmul.msk.f32.gmra.mxu2 %vm399_vm1, %v733_v56  ;;  %3229 = vmatmul.msk.f32.gmra.mxu3 %vm399_vm1, %v733_v56  ;;  %v743_v56 = vld [vmem:[%s3940_s24 + $0x80] sm:$0xff]  ;;  %v4147_v16 = vpop.f32.mrf.mxu0 }
  0xd1   : > { %v4026_v57 = vpop.f32.mrf.mxu2  ;;  %v4028_v58 = vpop.f32.mrf.mxu3 }
  0xd6   : > { %3197 = vmatmul.msk.f32.gmra.mxu2 %vm399_vm1, %v734_v62  ;;  %3230 = vmatmul.msk.f32.gmra.mxu3 %vm399_vm1, %v734_v62 }
  0xd9   : > { %v4042_v63 = vpop.f32.mrf.mxu2  ;;  %v4044_v0 = vpop.f32.mrf.mxu3 }
  0xde   : > { %3198 = vmatmul.msk.f32.gmra.mxu2 %vm399_vm1, %v735_v2  ;;  %3231 = vmatmul.msk.f32.gmra.mxu3 %vm399_vm1, %v735_v2 }
  0xe1   : > { %v4052_v3 = vpop.f32.mrf.mxu2  ;;  %v4054_v4 = vpop.f32.mrf.mxu3 }
  0xe6   : > { %3199 = vmatmul.msk.f32.gmra.mxu2 %vm399_vm1, %v736_v8  ;;  %3232 = vmatmul.msk.f32.gmra.mxu3 %vm399_vm1, %v736_v8 }
  0xe9   : > { %v4068_v9 = vpop.f32.mrf.mxu2  ;;  %v4070_v10 = vpop.f32.mrf.mxu3 }
  0xee   : > { %3200 = vmatmul.msk.f32.gmra.mxu2 %vm399_vm1, %v737_v12  ;;  %3233 = vmatmul.msk.f32.gmra.mxu3 %vm399_vm1, %v737_v12 }
  0xf1   : > { %v4078_v13 = vpop.f32.mrf.mxu2  ;;  %v4080_v14 = vpop.f32.mrf.mxu3 }
  0xf6   : > { %3201 = vmatmul.msk.f32.gmra.mxu2 %vm399_vm1, %v738_v18  ;;  %3234 = vmatmul.msk.f32.gmra.mxu3 %vm399_vm1, %v738_v18 }
  0xf9   : > { %v4094_v19 = vpop.f32.mrf.mxu2  ;;  %v4096_v20 = vpop.f32.mrf.mxu3 }
  0xfe   : > { %3202 = vmatmul.msk.f32.gmra.mxu2 %vm399_vm1, %v739_v22  ;;  %3235 = vmatmul.msk.f32.gmra.mxu3 %vm399_vm1, %v739_v22 }
 0x101   : > { %v4104_v25 = vpop.f32.mrf.mxu2  ;;  %v4106_v26 = vpop.f32.mrf.mxu3 }
 0x106   : > { %3203 = vmatmul.msk.f32.gmra.mxu2 %vm399_vm1, %v740_v29  ;;  %3236 = vmatmul.msk.f32.gmra.mxu3 %vm399_vm1, %v740_v29 }
 0x109   : > { %v4111_v30 = vpop.f32.mrf.mxu2  ;;  %v4113_v31 = vpop.f32.mrf.mxu3 }
 0x10e   : > { %3204 = vmatmul.msk.f32.gmra.mxu2 %vm399_vm1, %v741_v40  ;;  %3237 = vmatmul.msk.f32.gmra.mxu3 %vm399_vm1, %v741_v40 }
 0x111   : > { %v4124_v41 = vpop.f32.mrf.mxu2  ;;  %v4126_v42 = vpop.f32.mrf.mxu3 }
 0x116   : > { %3205 = vmatmul.msk.f32.gmra.mxu2 %vm399_vm1, %v742_v45  ;;  %3238 = vmatmul.msk.f32.gmra.mxu3 %vm399_vm1, %v742_v45 }
 0x119   : > { %v4137_v52 = vpop.f32.mrf.mxu2  ;;  %v4139_v55 = vpop.f32.mrf.mxu3 }
 0x11e   : > { %3206 = vmatmul.msk.f32.gmra.mxu2 %vm399_vm1, %v743_v56  ;;  %3239 = vmatmul.msk.f32.gmra.mxu3 %vm399_vm1, %v743_v56 }
 0x121   : > { %v881_v61 = vpop.f32.mrf.mxu2  ;;  %v994_v62 = vpop.f32.mrf.mxu3 }
 0x122   : > { %v1090_v1 = vmul.f32 %v881_v61, %v518_v23  ;;  %v1282_v2 = vmul.f32 %v881_v61, %v631_v24  ;;  %v1122_v5 = vmul.f32 %v994_v62, %v631_v24  ;;  %v1250_v6 = vmul.f32 %v994_v62, %v518_v23 }
 0x124   : > { %v1154_v8 = vsub.f32 %v1090_v1, %v1122_v5  ;;  %v1314_v11 = vadd.f32 %v1282_v2, %v1250_v6  ;;  %v746_v5 = vld [vmem:[%s3940_s24 + $0x98] sm:$0xff] }
 0x126   : > { %v1186_v12 = vpack.c.bf16 %v1154_v8, %v1154_v8  ;;  %v1346_v15 = vpack.c.bf16 %v1314_v11, %v1314_v11  ;;  %3207 = vmatmul.msk.f32.gmra.mxu2 %vm399_vm1, %v744_v7  ;;  %3240 = vmatmul.msk.f32.gmra.mxu3 %vm399_vm1, %v744_v7 }
 0x128   : > { %1218 = vst [vmem:[#allocation2] sm:$0xf] %v1186_v12 }
 0x129   : > { %1378 = vst [vmem:[#allocation2 + $0x4] sm:$0xf] %v1346_v15  ;;  %v884_v18 = vpop.f32.mrf.mxu2  ;;  %v997_v21 = vpop.f32.mrf.mxu3 }
 0x12a   : > { %v1091_v22 = vmul.f32 %v884_v18, %v521_v36  ;;  %v1283_v23 = vmul.f32 %v884_v18, %v634_v39  ;;  %v1123_v24 = vmul.f32 %v997_v21, %v634_v39  ;;  %v1251_v29 = vmul.f32 %v997_v21, %v521_v36  ;;  %v4154_v39 = vpop.f32.mrf.mxu0  ;;  %v646_v36 = vpop.f32.mrf.mxu1 }
 0x12c   : > { %v1155_v35 = vsub.f32 %v1091_v22, %v1123_v24  ;;  %v1315_v40 = vadd.f32 %v1283_v23, %v1251_v29 }
 0x12e   : > { %v1187_v45 = vpack.c.bf16 %v1155_v35, %v1155_v35  ;;  %v1347_v50 = vpack.c.bf16 %v1315_v40, %v1315_v40  ;;  %3208 = vmatmul.msk.f32.gmra.mxu2 %vm399_vm1, %v745_v32  ;;  %3241 = vmatmul.msk.f32.gmra.mxu3 %vm399_vm1, %v745_v32  ;;  %v747_v40 = vld [vmem:[%s3940_s24 + $0xa0] sm:$0xff] }
 0x12f   : > { %v3257_v12 = vld [vmem:[#allocation2] sm:$0xf] }
 0x130   : > { %1219 = vst [vmem:[#allocation2 + $0x8] sm:$0xf] %v1187_v45  ;;  %v3452_v21 = vld [vmem:[#allocation2 + $0x4] sm:$0xf] }
 0x131   : > { %1379 = vst [vmem:[#allocation2 + $0xc] sm:$0xf] %v1347_v50  ;;  %v887_v51 = vpop.f32.mrf.mxu2  ;;  %v1000_v56 = vpop.f32.mrf.mxu3 }
 0x132   : > { %v1092_v61 = vmul.f32 %v887_v51, %v524_v46  ;;  %v1284_v62 = vmul.f32 %v887_v51, %v637_v49  ;;  %v1124_v1 = vmul.f32 %v1000_v56, %v637_v49  ;;  %v1252_v2 = vmul.f32 %v1000_v56, %v524_v46  ;;  %v536_v51 = vpop.f32.mrf.mxu0  ;;  %v649_v56 = vpop.f32.mrf.mxu1 }
 0x134   : > { %v1156_v6 = vsub.f32 %v1092_v61, %v1124_v1  ;;  %v1316_v7 = vadd.f32 %v1284_v62, %v1252_v2 }
 0x136   : > { %v1188_v8 = vpack.c.bf16 %v1156_v6, %v1156_v6  ;;  %v1348_v11 = vpack.c.bf16 %v1316_v7, %v1316_v7  ;;  %3209 = vmatmul.msk.f32.gmra.mxu2 %vm399_vm1, %v746_v5  ;;  %3242 = vmatmul.msk.f32.gmra.mxu3 %vm399_vm1, %v746_v5  ;;  %v748_v7 = vld [vmem:[%s3940_s24 + $0xa8] sm:$0xff] }
 0x137   : > { %v3453_v15 = vld [vmem:[#allocation2 + $0x4] sm:$0xf0] }
 0x138   : > { %1220 = vst [vmem:[#allocation2 + $0x10] sm:$0xf] %v1188_v8  ;;  %v3258_v18 = vor.u32 %v3453_v15, %v3257_v12  ;;  %v3259_v49 = vld [vmem:[#allocation2 + $0x8] sm:$0xf0] }
 0x139   : > { %1380 = vst [vmem:[#allocation2 + $0x14] sm:$0xf] %v1348_v11  ;;  %v890_v46 = vpop.f32.mrf.mxu2  ;;  %v1003_v22 = vpop.f32.mrf.mxu3  ;;  %v3262_v23 = vor.u32 %v3452_v21, %v3259_v49 }
 0x13a   : > { %v1093_v24 = vmul.f32 %v890_v46, %v527_v59  ;;  %v1285_v29 = vmul.f32 %v890_v46, %v640_v60  ;;  %v1125_v32 = vmul.f32 %v1003_v22, %v640_v60  ;;  %v1253_v35 = vmul.f32 %v1003_v22, %v527_v59  ;;  %1770 = vmatmul.bf16.vlgmr.msrb.gmra.mxu0 %v3258_v18  ;;  %v539_v18 = vpop.f32.mrf.mxu0  ;;  %v652_v21 = vpop.f32.mrf.mxu1 }
 0x13b   : > { %1859 = vmatmul.bf16.vlgmr.msrb.gmra.mxu1 %v3262_v23 }
 0x13c   : > { %v1157_v45 = vsub.f32 %v1093_v24, %v1125_v32  ;;  %v1317_v50 = vadd.f32 %v1285_v29, %v1253_v35 }
 0x13e   : > { %v1189_v61 = vpack.c.bf16 %v1157_v45, %v1157_v45  ;;  %v1349_v62 = vpack.c.bf16 %v1317_v50, %v1317_v50  ;;  %3210 = vmatmul.msk.f32.gmra.mxu2 %vm399_vm1, %v747_v40  ;;  %3243 = vmatmul.msk.f32.gmra.mxu3 %vm399_vm1, %v747_v40  ;;  %v749_v50 = vld [vmem:[%s3940_s24 + $0xb0] sm:$0xff] }
 0x13f   : > { %v3265_v49 = vld [vmem:[#allocation2 + $0x10] sm:$0xf] }
 0x140   : > { %1221 = vst [vmem:[#allocation2 + $0x18] sm:$0xf] %v1189_v61  ;;  %v3454_v23 = vld [vmem:[#allocation2 + $0x14] sm:$0xf] }
 0x141   : > { %1381 = vst [vmem:[#allocation2 + $0x1c] sm:$0xf] %v1349_v62  ;;  %v893_v1 = vpop.f32.mrf.mxu2  ;;  %v1006_v2 = vpop.f32.mrf.mxu3 }
 0x142   : > { %v1094_v59 = vmul.f32 %v893_v1, %v4147_v16  ;;  %v1286_v60 = vmul.f32 %v893_v1, %v4149_v17  ;;  %v1126_v5 = vmul.f32 %v1006_v2, %v4149_v17  ;;  %v1254_v6 = vmul.f32 %v1006_v2, %v4147_v16 }
 0x144   : > { %v1158_v8 = vsub.f32 %v1094_v59, %v1126_v5  ;;  %v1318_v11 = vadd.f32 %v1286_v60, %v1254_v6  ;;  %v542_v59 = vpop.f32.mrf.mxu0  ;;  %v655_v60 = vpop.f32.mrf.mxu1 }
 0x146   : > { %v1190_v12 = vpack.c.bf16 %v1158_v8, %v1158_v8  ;;  %v1350_v15 = vpack.c.bf16 %v1318_v11, %v1318_v11  ;;  %3211 = vmatmul.msk.f32.gmra.mxu2 %vm399_vm1, %v748_v7  ;;  %3244 = vmatmul.msk.f32.gmra.mxu3 %vm399_vm1, %v748_v7  ;;  %v750_v11 = vld [vmem:[%s3940_s24 + $0xb8] sm:$0xff] }
 0x147   : > { %v3455_v46 = vld [vmem:[#allocation2 + $0x14] sm:$0xf0] }
 0x148   : > { %1222 = vst [vmem:[#allocation2 + $0x20] sm:$0xf] %v1190_v12  ;;  %v3266_v22 = vor.u32 %v3455_v46, %v3265_v49  ;;  %v3267_v17 = vld [vmem:[#allocation2 + $0x18] sm:$0xf0] }
 0x149   : > { %1382 = vst [vmem:[#allocation2 + $0x24] sm:$0xf] %v1350_v15  ;;  %v896_v16 = vpop.f32.mrf.mxu2  ;;  %v1009_v24 = vpop.f32.mrf.mxu3  ;;  %v3270_v29 = vor.u32 %v3454_v23, %v3267_v17 }
 0x14a   : > { %v1095_v32 = vmul.f32 %v896_v16, %v4154_v39  ;;  %v1287_v35 = vmul.f32 %v896_v16, %v646_v36  ;;  %v1127_v40 = vmul.f32 %v1009_v24, %v646_v36  ;;  %v1255_v45 = vmul.f32 %v1009_v24, %v4154_v39  ;;  %1775 = vmatmul.bf16.gmra.mxu0 %v3266_v22 }
 0x14b   : > { %1864 = vmatmul.bf16.gmra.mxu1 %v3270_v29 }
 0x14c   : > { %v1159_v61 = vsub.f32 %v1095_v32, %v1127_v40  ;;  %v1319_v62 = vadd.f32 %v1287_v35, %v1255_v45 }
 0x14e   : > { %v1191_v1 = vpack.c.bf16 %v1159_v61, %v1159_v61  ;;  %v1351_v2 = vpack.c.bf16 %v1319_v62, %v1319_v62  ;;  %3212 = vmatmul.msk.f32.gmra.mxu2 %vm399_vm1, %v749_v50  ;;  %3245 = vmatmul.msk.f32.gmra.mxu3 %vm399_vm1, %v749_v50  ;;  %v545_v50 = vpop.f32.mrf.mxu0  ;;  %v658_v61 = vpop.f32.mrf.mxu1  ;;  %v751_v62 = vld [vmem:[%s3940_s24 + $0xc0] sm:$0xff] }
 0x14f   : > { %v3273_v22 = vld [vmem:[#allocation2 + $0x20] sm:$0xf] }
 0x150   : > { %1223 = vst [vmem:[#allocation2 + $0x28] sm:$0xf] %v1191_v1  ;;  %v3456_v16 = vld [vmem:[#allocation2 + $0x24] sm:$0xf] }
 0x151   : > { %1383 = vst [vmem:[#allocation2 + $0x2c] sm:$0xf] %v1351_v2  ;;  %v899_v5 = vpop.f32.mrf.mxu2  ;;  %v1012_v36 = vpop.f32.mrf.mxu3 }
 0x152   : > { %v1096_v6 = vmul.f32 %v899_v5, %v536_v51  ;;  %v1288_v39 = vmul.f32 %v899_v5, %v649_v56  ;;  %v1128_v7 = vmul.f32 %v1012_v36, %v649_v56  ;;  %v1256_v8 = vmul.f32 %v1012_v36, %v536_v51 }
 0x154   : > { %v1160_v12 = vsub.f32 %v1096_v6, %v1128_v7  ;;  %v1320_v15 = vadd.f32 %v1288_v39, %v1256_v8 }
 0x156   : > { %v1192_v49 = vpack.c.bf16 %v1160_v12, %v1160_v12  ;;  %v1352_v46 = vpack.c.bf16 %v1320_v15, %v1320_v15  ;;  %3213 = vmatmul.msk.f32.gmra.mxu2 %vm399_vm1, %v750_v11  ;;  %3246 = vmatmul.msk.f32.gmra.mxu3 %vm399_vm1, %v750_v11  ;;  %v752_v11 = vld [vmem:[%s3940_s24 + $0xc8] sm:$0xff] }
 0x157   : > { %v3457_v23 = vld [vmem:[#allocation2 + $0x24] sm:$0xf0] }
 0x158   : > { %1224 = vst [vmem:[#allocation2 + $0x30] sm:$0xf] %v1192_v49  ;;  %v3274_v17 = vor.u32 %v3457_v23, %v3273_v22  ;;  %v3275_v24 = vld [vmem:[#allocation2 + $0x28] sm:$0xf0]  ;;  %v548_v49 = vpop.f32.mrf.mxu0 }
 0x159   : > { %1384 = vst [vmem:[#allocation2 + $0x34] sm:$0xf] %v1352_v46  ;;  %v902_v29 = vpop.f32.mrf.mxu2  ;;  %v1015_v56 = vpop.f32.mrf.mxu3  ;;  %v3278_v51 = vor.u32 %v3456_v16, %v3275_v24 }
 0x15a   : > { %v1097_v32 = vmul.f32 %v902_v29, %v539_v18  ;;  %v1289_v35 = vmul.f32 %v902_v29, %v652_v21  ;;  %v1129_v40 = vmul.f32 %v1015_v56, %v652_v21  ;;  %v1257_v45 = vmul.f32 %v1015_v56, %v539_v18  ;;  %1780 = vmatmul.bf16.gmra.mxu0 %v3274_v17  ;;  %v661_v46 = vpop.f32.mrf.mxu1 }
 0x15b   : > { %1869 = vmatmul.bf16.gmra.mxu1 %v3278_v51 }
 0x15c   : > { %v1161_v1 = vsub.f32 %v1097_v32, %v1129_v40  ;;  %v1321_v2 = vadd.f32 %v1289_v35, %v1257_v45 }
 0x15e   : > { %v1193_v5 = vpack.c.bf16 %v1161_v1, %v1161_v1  ;;  %v1353_v36 = vpack.c.bf16 %v1321_v2, %v1321_v2  ;;  %3214 = vmatmul.msk.f32.gmra.mxu2 %vm399_vm1, %v751_v62  ;;  %3247 = vmatmul.msk.f32.gmra.mxu3 %vm399_vm1, %v751_v62  ;;  %v753_v62 = vld [vmem:[%s3940_s24 + $0xd0] sm:$0xff] }
 0x15f   : > { %v3281_v17 = vld [vmem:[#allocation2 + $0x30] sm:$0xf] }
 0x160   : > { %1225 = vst [vmem:[#allocation2 + $0x38] sm:$0xf] %v1193_v5  ;;  %v3458_v29 = vld [vmem:[#allocation2 + $0x34] sm:$0xf] }
 0x161   : > { %1385 = vst [vmem:[#allocation2 + $0x3c] sm:$0xf] %v1353_v36  ;;  %v905_v6 = vpop.f32.mrf.mxu2  ;;  %v1018_v39 = vpop.f32.mrf.mxu3 }
 0x162   : > { %v1098_v21 = vmul.f32 %v905_v6, %v542_v59  ;;  %v1290_v18 = vmul.f32 %v905_v6, %v655_v60  ;;  %v1130_v7 = vmul.f32 %v1018_v39, %v655_v60  ;;  %v1258_v8 = vmul.f32 %v1018_v39, %v542_v59  ;;  %v551_v6 = vpop.f32.mrf.mxu0  ;;  %v664_v39 = vpop.f32.mrf.mxu1 }
 0x164   : > { %v1162_v12 = vsub.f32 %v1098_v21, %v1130_v7  ;;  %v1322_v15 = vadd.f32 %v1290_v18, %v1258_v8 }
 0x166   : > { %v1194_v22 = vpack.c.bf16 %v1162_v12, %v1162_v12  ;;  %v1354_v23 = vpack.c.bf16 %v1322_v15, %v1322_v15  ;;  %3215 = vmatmul.msk.f32.gmra.mxu2 %vm399_vm1, %v752_v11  ;;  %3248 = vmatmul.msk.f32.gmra.mxu3 %vm399_vm1, %v752_v11  ;;  %v754_v11 = vld [vmem:[%s3940_s24 + $0xd8] sm:$0xff] }
 0x167   : > { %v3459_v16 = vld [vmem:[#allocation2 + $0x34] sm:$0xf0] }
 0x168   : > { %1226 = vst [vmem:[#allocation2 + $0x40] sm:$0xf] %v1194_v22  ;;  %v3282_v24 = vor.u32 %v3459_v16, %v3281_v17  ;;  %v3283_v56 = vld [vmem:[#allocation2 + $0x38] sm:$0xf0] }
 0x169   : > { %1386 = vst [vmem:[#allocation2 + $0x44] sm:$0xf] %v1354_v23  ;;  %v908_v59 = vpop.f32.mrf.mxu2  ;;  %v1021_v60 = vpop.f32.mrf.mxu3  ;;  %v3286_v51 = vor.u32 %v3458_v29, %v3283_v56 }
 0x16a   : > { %v1099_v32 = vmul.f32 %v908_v59, %v545_v50  ;;  %v1291_v35 = vmul.f32 %v908_v59, %v658_v61  ;;  %v1131_v40 = vmul.f32 %v1021_v60, %v658_v61  ;;  %v1259_v45 = vmul.f32 %v1021_v60, %v545_v50  ;;  %1785 = vmatmul.bf16.gmra.mxu0 %v3282_v24  ;;  %v554_v59 = vpop.f32.mrf.mxu0  ;;  %v667_v60 = vpop.f32.mrf.mxu1 }
 0x16b   : > { %1874 = vmatmul.bf16.gmra.mxu1 %v3286_v51 }
 0x16c   : > { %v1163_v1 = vsub.f32 %v1099_v32, %v1131_v40  ;;  %v1323_v2 = vadd.f32 %v1291_v35, %v1259_v45 }
 0x16e   : > { %v1195_v5 = vpack.c.bf16 %v1163_v1, %v1163_v1  ;;  %v1355_v36 = vpack.c.bf16 %v1323_v2, %v1323_v2  ;;  %3216 = vmatmul.msk.f32.gmra.mxu2 %vm399_vm1, %v753_v62  ;;  %3249 = vmatmul.msk.f32.gmra.mxu3 %vm399_vm1, %v753_v62  ;;  %v755_v62 = vld [vmem:[%s3940_s24 + $0xe0] sm:$0xff] }
 0x16f   : > { %v3289_v17 = vld [vmem:[#allocation2 + $0x40] sm:$0xf] }
 0x170   : > { %1227 = vst [vmem:[#allocation2 + $0x48] sm:$0xf] %v1195_v5  ;;  %v3460_v29 = vld [vmem:[#allocation2 + $0x44] sm:$0xf] }
 0x171   : > { %1387 = vst [vmem:[#allocation2 + $0x4c] sm:$0xf] %v1355_v36  ;;  %v911_v21 = vpop.f32.mrf.mxu2  ;;  %v1024_v18 = vpop.f32.mrf.mxu3 }
 0x172   : > { %v1100_v61 = vmul.f32 %v911_v21, %v548_v49  ;;  %v1292_v50 = vmul.f32 %v911_v21, %v661_v46  ;;  %v1132_v7 = vmul.f32 %v1024_v18, %v661_v46  ;;  %v1260_v8 = vmul.f32 %v1024_v18, %v548_v49 }
 0x174   : > { %v1164_v12 = vsub.f32 %v1100_v61, %v1132_v7  ;;  %v1324_v15 = vadd.f32 %v1292_v50, %v1260_v8  ;;  %v756_v7 = vld [vmem:[%s3940_s24 + $0xe8] sm:$0xff]  ;;  %v557_v8 = vpop.f32.mrf.mxu0 }
 0x176   : > { %v1196_v22 = vpack.c.bf16 %v1164_v12, %v1164_v12  ;;  %v1356_v23 = vpack.c.bf16 %v1324_v15, %v1324_v15  ;;  %3217 = vmatmul.msk.f32.gmra.mxu2 %vm399_vm1, %v754_v11  ;;  %3250 = vmatmul.msk.f32.gmra.mxu3 %vm399_vm1, %v754_v11  ;;  %v670_v11 = vpop.f32.mrf.mxu1 }
 0x177   : > { %v3461_v16 = vld [vmem:[#allocation2 + $0x44] sm:$0xf0] }
 0x178   : > { %1228 = vst [vmem:[#allocation2 + $0x50] sm:$0xf] %v1196_v22  ;;  %v3290_v24 = vor.u32 %v3461_v16, %v3289_v17  ;;  %v3291_v56 = vld [vmem:[#allocation2 + $0x48] sm:$0xf0] }
 0x179   : > { %1388 = vst [vmem:[#allocation2 + $0x54] sm:$0xf] %v1356_v23  ;;  %v914_v49 = vpop.f32.mrf.mxu2  ;;  %v1027_v46 = vpop.f32.mrf.mxu3  ;;  %v3294_v51 = vor.u32 %v3460_v29, %v3291_v56 }
 0x17a   : > { %v1101_v32 = vmul.f32 %v914_v49, %v551_v6  ;;  %v1293_v35 = vmul.f32 %v914_v49, %v664_v39  ;;  %v1133_v40 = vmul.f32 %v1027_v46, %v664_v39  ;;  %v1261_v45 = vmul.f32 %v1027_v46, %v551_v6  ;;  %1790 = vmatmul.bf16.gmra.mxu0 %v3290_v24 }
 0x17b   : > { %1879 = vmatmul.bf16.gmra.mxu1 %v3294_v51 }
 0x17c   : > { %v1165_v1 = vsub.f32 %v1101_v32, %v1133_v40  ;;  %v1325_v2 = vadd.f32 %v1293_v35, %v1261_v45  ;;  %v757_v40 = vld [vmem:[%s3940_s24 + $0xf0] sm:$0xff] }
 0x17e   : > { %v1197_v5 = vpack.c.bf16 %v1165_v1, %v1165_v1  ;;  %v1357_v36 = vpack.c.bf16 %v1325_v2, %v1325_v2  ;;  %3218 = vmatmul.msk.f32.gmra.mxu2 %vm399_vm1, %v755_v62  ;;  %3251 = vmatmul.msk.f32.gmra.mxu3 %vm399_vm1, %v755_v62  ;;  %v560_v1 = vpop.f32.mrf.mxu0  ;;  %v673_v2 = vpop.f32.mrf.mxu1 }
 0x17f   : > { %v3297_v17 = vld [vmem:[#allocation2 + $0x50] sm:$0xf] }
 0x180   : > { %1229 = vst [vmem:[#allocation2 + $0x58] sm:$0xf] %v1197_v5  ;;  %v3462_v29 = vld [vmem:[#allocation2 + $0x54] sm:$0xf] }
 0x181   : > { %1389 = vst [vmem:[#allocation2 + $0x5c] sm:$0xf] %v1357_v36  ;;  %v917_v21 = vpop.f32.mrf.mxu2  ;;  %v1030_v18 = vpop.f32.mrf.mxu3 }
 0x182   : > { %v1102_v61 = vmul.f32 %v917_v21, %v554_v59  ;;  %v1294_v50 = vmul.f32 %v917_v21, %v667_v60  ;;  %v1134_v39 = vmul.f32 %v1030_v18, %v667_v60  ;;  %v1262_v6 = vmul.f32 %v1030_v18, %v554_v59 }
 0x184   : > { %v1166_v12 = vsub.f32 %v1102_v61, %v1134_v39  ;;  %v1326_v15 = vadd.f32 %v1294_v50, %v1262_v6 }
 0x186   : > { %v1198_v22 = vpack.c.bf16 %v1166_v12, %v1166_v12  ;;  %v1358_v23 = vpack.c.bf16 %v1326_v15, %v1326_v15  ;;  %3219 = vmatmul.msk.f32.gmra.mxu2 %vm399_vm1, %v756_v7  ;;  %3252 = vmatmul.msk.f32.gmra.mxu3 %vm399_vm1, %v756_v7  ;;  %v758_v7 = vld [vmem:[%s3940_s24 + $0xf8] sm:$0xff]  ;;  %s292_s24 = sand.u32 1, %s3750_s19  }
 0x187   : > { %v3463_v16 = vld [vmem:[#allocation2 + $0x54] sm:$0xf0]  ;;  %s3118_s9 = sshll.u32 %s292_s24, 8  ;;  %s2968_s21 = scalar_lea.sflag [#allocation5], %s292_s24 }
 0x188   : > { %1230 = vst [vmem:[#allocation2 + $0x60] sm:$0xf] %v1198_v22  ;;  %v3298_v24 = vor.u32 %v3463_v16, %v3297_v17  ;;  %v3299_v56 = vld [vmem:[#allocation2 + $0x58] sm:$0xf0]  ;;  %v563_v22 = vpop.f32.mrf.mxu0  ;;  %s4501_s10 = scalar_lea.vmem [#allocation4], %s3118_s9 }
 0x189   : > { %1390 = vst [vmem:[#allocation2 + $0x64] sm:$0xf] %v1358_v23  ;;  %v920_v59 = vpop.f32.mrf.mxu2  ;;  %v1033_v60 = vpop.f32.mrf.mxu3  ;;  %v3302_v49 = vor.u32 %v3462_v29, %v3299_v56  ;;  %s2980_s15 = sshll.u32 %s4501_s10, 4  ;;  %s2981_s15 = int_to_ptr.vmem [resolvable:$true] %s2980_s15 }
 0x18a   : > { %v1103_v46 = vmul.f32 %v920_v59, %v557_v8  ;;  %v1295_v51 = vmul.f32 %v920_v59, %v670_v11  ;;  %v1135_v32 = vmul.f32 %v1033_v60, %v670_v11  ;;  %v1263_v35 = vmul.f32 %v1033_v60, %v557_v8  ;;  %1795 = vmatmul.bf16.gmra.mxu0 %v3298_v24  ;;  %v676_v23 = vpop.f32.mrf.mxu1 }
 0x18b   : > { %1884 = vmatmul.bf16.gmra.mxu1 %v3302_v49 }
 0x18c   : > { %v1167_v45 = vsub.f32 %v1103_v46, %v1135_v32  ;;  %v1327_v62 = vadd.f32 %v1295_v51, %v1263_v35 }
 0x18e   : > { %v1199_v5 = vpack.c.bf16 %v1167_v45, %v1167_v45  ;;  %v1359_v36 = vpack.c.bf16 %v1327_v62, %v1327_v62  ;;  %3220 = vmatmul.msk.f32.gmra.mxu2 %vm399_vm1, %v757_v40  ;;  %3253 = vmatmul.msk.f32.gmra.mxu3 %vm399_vm1, %v757_v40 }
 0x18f   : > { %v3305_v17 = vld [vmem:[#allocation2 + $0x60] sm:$0xf] }
 0x190   : > { %1231 = vst [vmem:[#allocation2 + $0x68] sm:$0xf] %v1199_v5  ;;  %v3464_v29 = vld [vmem:[#allocation2 + $0x64] sm:$0xf] }
 0x191   : > { %1391 = vst [vmem:[#allocation2 + $0x6c] sm:$0xf] %v1359_v36  ;;  %v923_v21 = vpop.f32.mrf.mxu2  ;;  %v1036_v18 = vpop.f32.mrf.mxu3 }
 0x192   : > { %v1104_v61 = vmul.f32 %v923_v21, %v560_v1  ;;  %v1296_v50 = vmul.f32 %v923_v21, %v673_v2  ;;  %v1136_v39 = vmul.f32 %v1036_v18, %v673_v2  ;;  %v1264_v6 = vmul.f32 %v1036_v18, %v560_v1 }
 0x194   : > { %v1168_v8 = vsub.f32 %v1104_v61, %v1136_v39  ;;  %v1328_v11 = vadd.f32 %v1296_v50, %v1264_v6 }
 0x196   : > { %v1200_v12 = vpack.c.bf16 %v1168_v8, %v1168_v8  ;;  %v1360_v15 = vpack.c.bf16 %v1328_v11, %v1328_v11  ;;  %3221 = vmatmul.msk.f32.gmra.mxu2 %vm399_vm1, %v758_v7  ;;  %3254 = vmatmul.msk.f32.gmra.mxu3 %vm399_vm1, %v758_v7 }
 0x197   : > { %v3465_v16 = vld [vmem:[#allocation2 + $0x64] sm:$0xf0] }
 0x198   : > { %1232 = vst [vmem:[#allocation2 + $0x70] sm:$0xf] %v1200_v12  ;;  %v3306_v24 = vor.u32 %v3465_v16, %v3305_v17  ;;  %v3307_v56 = vld [vmem:[#allocation2 + $0x68] sm:$0xf0] }
 0x199   : > { %1392 = vst [vmem:[#allocation2 + $0x74] sm:$0xf] %v1360_v15  ;;  %v926_v59 = vpop.f32.mrf.mxu2  ;;  %v1039_v60 = vpop.f32.mrf.mxu3  ;;  %v3310_v49 = vor.u32 %v3464_v29, %v3307_v56 }
 0x19a   : > { %v1105_v46 = vmul.f32 %v926_v59, %v563_v22  ;;  %v1297_v51 = vmul.f32 %v926_v59, %v676_v23  ;;  %v1137_v32 = vmul.f32 %v1039_v60, %v676_v23  ;;  %v1265_v35 = vmul.f32 %v1039_v60, %v563_v22  ;;  %1800 = vmatmul.bf16.gmra.mxu0 %v3306_v24 }
 0x19b   : > { %1889 = vmatmul.bf16.gmra.mxu1 %v3310_v49 }
 0x19c   : > { %v1169_v40 = vsub.f32 %v1105_v46, %v1137_v32  ;;  %v1329_v45 = vadd.f32 %v1297_v51, %v1265_v35 }
 0x19e   : > { %v1201_v62 = vpack.c.bf16 %v1169_v40, %v1169_v40  ;;  %v1361_v1 = vpack.c.bf16 %v1329_v45, %v1329_v45 }
 0x19f   : > { %v3313_v8 = vld [vmem:[#allocation2 + $0x70] sm:$0xf] }
 0x1a0   : > { %1233 = vst [vmem:[#allocation2 + $0x78] sm:$0xf] %v1201_v62  ;;  %v3466_v15 = vld [vmem:[#allocation2 + $0x74] sm:$0xf] }
 0x1a1   : > { %1393 = vst [vmem:[#allocation2 + $0x7c] sm:$0xf] %v1361_v1  ;;  %v929_v2 = vpop.f32.mrf.mxu2  ;;  %v1042_v5 = vpop.f32.mrf.mxu3 }
 0x1a2   : > { %v1106_v36 = vmul.f32 %v929_v2, %v3948_v27  ;;  %v1298_v21 = vmul.f32 %v929_v2, %v3950_v28  ;;  %v1138_v18 = vmul.f32 %v1042_v5, %v3950_v28  ;;  %v1266_v61 = vmul.f32 %v1042_v5, %v3948_v27 }
 0x1a4   : > { %v1170_v50 = vsub.f32 %v1106_v36, %v1138_v18  ;;  %v1330_v39 = vadd.f32 %v1298_v21, %v1266_v61 }
 0x1a6   : > { %v1202_v6 = vpack.c.bf16 %v1170_v50, %v1170_v50  ;;  %v1362_v7 = vpack.c.bf16 %v1330_v39, %v1330_v39 }
 0x1a7   : > { %v3467_v11 = vld [vmem:[#allocation2 + $0x74] sm:$0xf0] }
 0x1a8   : > { %1234 = vst [vmem:[#allocation2 + $0x80] sm:$0xf] %v1202_v6  ;;  %v3314_v12 = vor.u32 %v3467_v11, %v3313_v8  ;;  %v3315_v22 = vld [vmem:[#allocation2 + $0x78] sm:$0xf0] }
 0x1a9   : > { %1394 = vst [vmem:[#allocation2 + $0x84] sm:$0xf] %v1362_v7  ;;  %v932_v23 = vpop.f32.mrf.mxu2  ;;  %v1045_v17 = vpop.f32.mrf.mxu3  ;;  %v3318_v16 = vor.u32 %v3466_v15, %v3315_v22 }
 0x1aa   : > { %v1107_v24 = vmul.f32 %v932_v23, %v3964_v33  ;;  %v1299_v28 = vmul.f32 %v932_v23, %v3966_v34  ;;  %v1139_v27 = vmul.f32 %v1045_v17, %v3966_v34  ;;  %v1267_v29 = vmul.f32 %v1045_v17, %v3964_v33  ;;  %1805 = vmatmul.bf16.gmra.mxu0 %v3314_v12 }
 0x1ab   : > { %1894 = vmatmul.bf16.gmra.mxu1 %v3318_v16 }
 0x1ac   : > { %v1171_v56 = vsub.f32 %v1107_v24, %v1139_v27  ;;  %v1331_v59 = vadd.f32 %v1299_v28, %v1267_v29 }
 0x1ae   : > { %v1203_v60 = vpack.c.bf16 %v1171_v56, %v1171_v56  ;;  %v1363_v49 = vpack.c.bf16 %v1331_v59, %v1331_v59 }
 0x1af   : > { %v3321_v5 = vld [vmem:[#allocation2 + $0x80] sm:$0xf] }
 0x1b0   : > { %1235 = vst [vmem:[#allocation2 + $0x88] sm:$0xf] %v1203_v60  ;;  %v3468_v61 = vld [vmem:[#allocation2 + $0x84] sm:$0xf] }
 0x1b1   : > { %1395 = vst [vmem:[#allocation2 + $0x8c] sm:$0xf] %v1363_v49  ;;  %v935_v46 = vpop.f32.mrf.mxu2  ;;  %v1048_v51 = vpop.f32.mrf.mxu3 }
 0x1b2   : > { %v1108_v32 = vmul.f32 %v935_v46, %v3974_v37  ;;  %v1300_v35 = vmul.f32 %v935_v46, %v3976_v38  ;;  %v1140_v40 = vmul.f32 %v1048_v51, %v3976_v38  ;;  %v1268_v34 = vmul.f32 %v1048_v51, %v3974_v37 }
 0x1b4   : > { %v1172_v45 = vsub.f32 %v1108_v32, %v1140_v40  ;;  %v1332_v33 = vadd.f32 %v1300_v35, %v1268_v34 }
 0x1b6   : > { %v1204_v62 = vpack.c.bf16 %v1172_v45, %v1172_v45  ;;  %v1364_v1 = vpack.c.bf16 %v1332_v33, %v1332_v33 }
 0x1b7   : > { %v1771_v2 = vpop.f32.mrf.mxu0  ;;  %v3469_v36 = vld [vmem:[#allocation2 + $0x84] sm:$0xf0] }
 0x1b8   : > { %1236 = vst [vmem:[#allocation2 + $0x90] sm:$0xf] %v1204_v62  ;;  %v1860_v21 = vpop.f32.mrf.mxu1  ;;  %v3322_v18 = vor.u32 %v3469_v36, %v3321_v5  ;;  %v3323_v50 = vld [vmem:[#allocation2 + $0x88] sm:$0xf0] }
 0x1b9   : > { %1396 = vst [vmem:[#allocation2 + $0x94] sm:$0xf] %v1364_v1  ;;  %v4213_v39 = vadd.f32 %v1860_v21, %v1771_v2  ;;  %v938_v6 = vpop.f32.mrf.mxu2  ;;  %v1051_v7 = vpop.f32.mrf.mxu3  ;;  %v3326_v38 = vor.u32 %v3468_v61, %v3323_v50 }
 0x1ba   : > { %v1109_v37 = vmul.f32 %v938_v6, %v3990_v43  ;;  %v1301_v8 = vmul.f32 %v938_v6, %v3992_v44  ;;  %v1141_v11 = vmul.f32 %v1051_v7, %v3992_v44  ;;  %v1269_v12 = vmul.f32 %v1051_v7, %v3990_v43  ;;  %1810 = vmatmul.bf16.gmra.mxu0 %v3322_v18 }
 0x1bb   : > { %v2039_v15 = vand.u32 2147483647, %v4213_v39  ;;  %1899 = vmatmul.bf16.gmra.mxu1 %v3326_v38 }
 0x1bc   : > { %v1173_v22 = vsub.f32 %v1109_v37, %v1141_v11  ;;  %v1333_v23 = vadd.f32 %v1301_v8, %v1269_v12 }
 0x1bd   : > { %v2071_v17 = vadd.f32 1e-10, %v2039_v15 }
 0x1be   : > { %v1205_v16 = vpack.c.bf16 %v1173_v22, %v1173_v22  ;;  %v1365_v24 = vpack.c.bf16 %v1333_v23, %v1333_v23 }
 0x1bf   : > { %3560 = vrsqrt.f32 %v2071_v17  ;;  %v1773_v28 = vpop.f32.mrf.mxu0  ;;  %v3329_v1 = vld [vmem:[#allocation2 + $0x90] sm:$0xf]  ;;  %vm2109_vm3 = vweird.f32 %v2071_v17 }
 0x1c0   : > { %1237 = vst [vmem:[#allocation2 + $0x98] sm:$0xf] %v1205_v16  ;;  %v1862_v27 = vpop.f32.mrf.mxu1 }
 0x1c1   : > { %1397 = vst [vmem:[#allocation2 + $0x9c] sm:$0xf] %v1365_v24  ;;  %v4220_v29 = vadd.f32 %v1862_v27, %v1773_v28  ;;  %v941_v56 = vpop.f32.mrf.mxu2  ;;  %v1054_v44 = vpop.f32.mrf.mxu3 }
 0x1c2   : > { %v1110_v43 = vmul.f32 %v941_v56, %v4000_v47  ;;  %v1302_v59 = vmul.f32 %v941_v56, %v4002_v48  ;;  %v1142_v60 = vmul.f32 %v1054_v44, %v4002_v48  ;;  %v1270_v49 = vmul.f32 %v1054_v44, %v4000_v47  ;;  %v3470_v47 = vld [vmem:[#allocation2 + $0x94] sm:$0xf] }
 0x1c3   : > { %v2040_v46 = vand.u32 2147483647, %v4220_v29 }
 0x1c4   : > { %v1174_v51 = vsub.f32 %v1110_v43, %v1142_v60  ;;  %v1334_v32 = vadd.f32 %v1302_v59, %v1270_v49 }
 0x1c5   : > { %v3561_v35 = vpop.eup %3560  ;;  %v4227_v40 = vadd.f32 1e-10, %v2040_v46 }
 0x1c6   : > { %v2104_v34 = vmul.f32 %v3561_v35, %v2071_v17  ;;  %v1206_v45 = vpack.c.bf16 %v1174_v51, %v1174_v51  ;;  %v1366_v33 = vpack.c.bf16 %v1334_v32, %v1334_v32  ;;  %vm2110_vm2 = vweird.f32 %v3561_v35 }
 0x1c7   : > { %3562 = vrsqrt.f32 %v4227_v40  ;;  %v1776_v62 = vpop.f32.mrf.mxu0  ;;  %v3471_v2 = vld [vmem:[#allocation2 + $0x94] sm:$0xf0]  ;;  %vm2111_vm4 = vmor %vm2109_vm3, %vm2110_vm2  ;;  %vm2119_vm6 = vweird.f32 %v4227_v40 }
 0x1c8   : > { %v2105_v5 = vmul.f32 %v3561_v35, %v2104_v34  ;;  %1238 = vst [vmem:[#allocation2 + $0xa0] sm:$0xf] %v1206_v45  ;;  %v1865_v48 = vpop.f32.mrf.mxu1  ;;  %v3330_v36 = vor.u32 %v3471_v2, %v3329_v1  ;;  %v3331_v21 = vld [vmem:[#allocation2 + $0x98] sm:$0xf0] }
 0x1c9   : > { %1398 = vst [vmem:[#allocation2 + $0xa4] sm:$0xf] %v1366_v33  ;;  %v4230_v18 = vadd.f32 %v1865_v48, %v1776_v62  ;;  %v944_v61 = vpop.f32.mrf.mxu2  ;;  %v1057_v50 = vpop.f32.mrf.mxu3  ;;  %v3334_v6 = vor.u32 %v3470_v47, %v3331_v21 }
 0x1ca   : > { %v1111_v7 = vmul.f32 %v944_v61, %v4016_v53  ;;  %v1303_v38 = vmul.f32 %v944_v61, %v4018_v54  ;;  %v1143_v37 = vmul.f32 %v1057_v50, %v4018_v54  ;;  %v1271_v8 = vmul.f32 %v1057_v50, %v4016_v53  ;;  %1815 = vmatmul.bf16.gmra.mxu0 %v3330_v36 }
 0x1cb   : > { %v2041_v11 = vand.u32 2147483647, %v4230_v18  ;;  %1904 = vmatmul.bf16.gmra.mxu1 %v3334_v6  ;;  %v2106_v12 = vmul.f32 0.5, %v2105_v5 }
 0x1cc   : > { %v1175_v15 = vsub.f32 %v1111_v7, %v1143_v37  ;;  %v1335_v22 = vadd.f32 %v1303_v38, %v1271_v8 }
 0x1cd   : > { %v3563_v23 = vpop.eup %3562  ;;  %v4237_v16 = vadd.f32 1e-10, %v2041_v11  ;;  %v2107_v24 = vsub.f32 1.5, %v2106_v12 }
 0x1ce   : > { %v2114_v28 = vmul.f32 %v3563_v23, %v4227_v40  ;;  %v1207_v27 = vpack.c.bf16 %v1175_v15, %v1175_v15  ;;  %v1367_v56 = vpack.c.bf16 %v1335_v22, %v1335_v22  ;;  %vm2120_vm5 = vweird.f32 %v3563_v23 }
 0x1cf   : > { %3564 = vrsqrt.f32 %v4237_v16  ;;  %v1778_v54 = vpop.f32.mrf.mxu0  ;;  %v2108_v53 = vmul.f32 %v3561_v35, %v2107_v24  ;;  %v3337_v61 = vld [vmem:[#allocation2 + $0xa0] sm:$0xf]  ;;  %vm2121_vm7 = vmor %vm2119_vm6, %vm2120_vm5  ;;  %vm2129_vm9 = vweird.f32 %v4237_v16 }
 0x1d0   : > { %v2115_v44 = vmul.f32 %v3563_v23, %v2114_v28  ;;  %1239 = vst [vmem:[#allocation2 + $0xa8] sm:$0xf] %v1207_v27  ;;  %v1867_v43 = vpop.f32.mrf.mxu1  ;;  %v3472_v37 = vld [vmem:[#allocation2 + $0xa4] sm:$0xf] }
 0x1d1   : > { %1399 = vst [vmem:[#allocation2 + $0xac] sm:$0xf] %v1367_v56  ;;  %v4241_v59 = vadd.f32 %v1867_v43, %v1778_v54  ;;  %v947_v60 = vpop.f32.mrf.mxu2  ;;  %v1060_v49 = vpop.f32.mrf.mxu3  ;;  %v2112_v46 = vsel %vm2111_vm4, %v3561_v35, %v2108_v53 }
 0x1d2   : > { %v2116_v51 = vmul.f32 0.5, %v2115_v44  ;;  %v1112_v32 = vmul.f32 %v947_v60, %v4026_v57  ;;  %v1304_v34 = vmul.f32 %v947_v60, %v4028_v58  ;;  %v1144_v45 = vmul.f32 %v1060_v49, %v4028_v58 }
 0x1d3   : > { %v2042_v33 = vand.u32 2147483647, %v4241_v59  ;;  %v1272_v17 = vmul.f32 %v1060_v49, %v4026_v57  ;;  %v4249_v62 = vmul.f32 %v2112_v46, %v4213_v39 }
 0x1d4   : > { %v1176_v1 = vsub.f32 %v1112_v32, %v1144_v45  ;;  %v2117_v2 = vsub.f32 1.5, %v2116_v51 }
 0x1d5   : > { %v4251_v5 = vpop.eup %3564  ;;  %v4253_v35 = vadd.f32 1e-10, %v2042_v33  ;;  %v1336_v48 = vadd.f32 %v1304_v34, %v1272_v17  ;;  %v2455_v36 = vmul.f32 %v4249_v62, %v4249_v62 }
 0x1d6   : > { %v2124_v58 = vmul.f32 %v4251_v5, %v4237_v16  ;;  %v1208_v47 = vpack.c.bf16 %v1176_v1, %v1176_v1  ;;  %v2118_v21 = vmul.f32 %v3563_v23, %v2117_v2  ;;  %vm2130_vm8 = vweird.f32 %v4251_v5 }
 0x1d7   : > { %3566 = vrsqrt.f32 %v4253_v35  ;;  %v1368_v57 = vpack.c.bf16 %v1336_v48, %v1336_v48  ;;  %2487 = vadd.xlane.f32.xlu0 %v2455_v36  ;;  %v1781_v39 = vpop.f32.mrf.mxu0  ;;  %v3473_v50 = vld [vmem:[#allocation2 + $0xa4] sm:$0xf0]  ;;  %vm2131_vm10 = vmor %vm2129_vm9, %vm2130_vm8  ;;  %vm2139_vm12 = vweird.f32 %v4253_v35 }
 0x1d8   : > { %v2125_v6 = vmul.f32 %v4251_v5, %v2124_v58  ;;  %1240 = vst [vmem:[#allocation2 + $0xb0] sm:$0xf] %v1208_v47  ;;  %v1870_v7 = vpop.f32.mrf.mxu1  ;;  %v3338_v38 = vor.u32 %v3473_v50, %v3337_v61  ;;  %v3339_v8 = vld [vmem:[#allocation2 + $0xa8] sm:$0xf0]  ;;  %v2122_v11 = vsel %vm2121_vm7, %v3563_v23, %v2118_v21 }
 0x1d9   : > { %1400 = vst [vmem:[#allocation2 + $0xb4] sm:$0xf] %v1368_v57  ;;  %v4263_v12 = vadd.f32 %v1870_v7, %v1781_v39  ;;  %v950_v40 = vpop.f32.mrf.mxu2  ;;  %v1063_v15 = vpop.f32.mrf.mxu3  ;;  %v3342_v22 = vor.u32 %v3472_v37, %v3339_v8  ;;  %v4266_v24 = vmul.f32 %v2122_v11, %v4220_v29 }
 0x1da   : > { %v1113_v28 = vmul.f32 %v950_v40, %v4042_v63  ;;  %v1305_v27 = vmul.f32 %v950_v40, %v4044_v0  ;;  %v1145_v56 = vmul.f32 %v1063_v15, %v4044_v0  ;;  %v1273_v54 = vmul.f32 %v1063_v15, %v4042_v63  ;;  %1820 = vmatmul.bf16.gmra.mxu0 %v3338_v38 }
 0x1db   : > { %v2043_v23 = vand.u32 2147483647, %v4263_v12  ;;  %1909 = vmatmul.bf16.gmra.mxu1 %v3342_v22  ;;  %v2456_v53 = vmul.f32 %v4266_v24, %v4266_v24  ;;  %v2126_v44 = vmul.f32 0.5, %v2125_v6 }
 0x1dc   : > { %v1177_v43 = vsub.f32 %v1113_v28, %v1145_v56  ;;  %v1337_v60 = vadd.f32 %v1305_v27, %v1273_v54 }
 0x1dd   : > { %v3567_v29 = vpop.eup %3566  ;;  %v4275_v49 = vadd.f32 1e-10, %v2043_v23  ;;  %v2127_v46 = vsub.f32 1.5, %v2126_v44 }
 0x1de   : > { %v2134_v0 = vmul.f32 %v3567_v29, %v4253_v35  ;;  %v1209_v51 = vpack.c.bf16 %v1177_v43, %v1177_v43  ;;  %v1369_v63 = vpack.c.bf16 %v1337_v60, %v1337_v60  ;;  %vm2140_vm11 = vweird.f32 %v3567_v29 }
 0x1df   : > { %3568 = vrsqrt.f32 %v4275_v49  ;;  %2489 = vadd.xlane.f32.xlu0 %v2456_v53  ;;  %v1783_v32 = vpop.f32.mrf.mxu0  ;;  %v2128_v34 = vmul.f32 %v4251_v5, %v2127_v46  ;;  %v3345_v11 = vld [vmem:[#allocation2 + $0xb0] sm:$0xf]  ;;  %vm2141_vm13 = vmor %vm2139_vm12, %vm2140_vm11  ;;  %vm2149_vm15 = vweird.f32 %v4275_v49 }
 0x1e0   : > { %v2135_v45 = vmul.f32 %v3567_v29, %v2134_v0  ;;  %1241 = vst [vmem:[#allocation2 + $0xb8] sm:$0xf] %v1209_v51  ;;  %v1872_v33 = vpop.f32.mrf.mxu1  ;;  %v3474_v27 = vld [vmem:[#allocation2 + $0xb4] sm:$0xf] }
 0x1e1   : > { %1401 = vst [vmem:[#allocation2 + $0xbc] sm:$0xf] %v1369_v63  ;;  %v4282_v17 = vadd.f32 %v1872_v33, %v1783_v32  ;;  %v953_v1 = vpop.f32.mrf.mxu2  ;;  %v1066_v2 = vpop.f32.mrf.mxu3  ;;  %v2132_v48 = vsel %vm2131_vm10, %v4251_v5, %v2128_v34 }
 0x1e2   : > { %v2136_v36 = vmul.f32 0.5, %v2135_v45  ;;  %v1114_v58 = vmul.f32 %v953_v1, %v4052_v3  ;;  %v1306_v47 = vmul.f32 %v953_v1, %v4054_v4  ;;  %v1146_v21 = vmul.f32 %v1066_v2, %v4054_v4 }
 0x1e3   : > { %v2044_v16 = vand.u32 2147483647, %v4282_v17  ;;  %v1274_v57 = vmul.f32 %v1066_v2, %v4052_v3  ;;  %v4291_v39 = vmul.f32 %v2132_v48, %v4230_v18 }
 0x1e4   : > { %v1178_v61 = vsub.f32 %v1114_v58, %v1146_v21  ;;  %v2137_v50 = vsub.f32 1.5, %v2136_v36 }
 0x1e5   : > { %v4293_v6 = vpop.eup %3568  ;;  %v4295_v5 = vadd.f32 1e-10, %v2044_v16  ;;  %v1338_v7 = vadd.f32 %v1306_v47, %v1274_v57  ;;  %v2457_v38 = vmul.f32 %v4291_v39, %v4291_v39 }
 0x1e6   : > { %v2144_v4 = vmul.f32 %v4293_v6, %v4275_v49  ;;  %v1210_v37 = vpack.c.bf16 %v1178_v61, %v1178_v61  ;;  %v2138_v8 = vmul.f32 %v3567_v29, %v2137_v50  ;;  %vm2150_vm14 = vweird.f32 %v4293_v6 }
 0x1e7   : > { %3570 = vrsqrt.f32 %v4295_v5  ;;  %v1370_v3 = vpack.c.bf16 %v1338_v7, %v1338_v7  ;;  %2491 = vadd.xlane.f32.xlu1 %v2457_v38  ;;  %v1786_v18 = vpop.f32.mrf.mxu0  ;;  %v3475_v40 = vld [vmem:[#allocation2 + $0xb4] sm:$0xf0]  ;;  %vm2151_vm0 = vmor %vm2149_vm15, %vm2150_vm14  ;;  %vm2159_vm2 = vweird.f32 %v4295_v5 }
 0x1e8   : > { %v2145_v15 = vmul.f32 %v4293_v6, %v2144_v4  ;;  %1242 = vst [vmem:[#allocation2 + $0xc0] sm:$0xf] %v1210_v37  ;;  %v1875_v22 = vpop.f32.mrf.mxu1  ;;  %v3346_v28 = vor.u32 %v3475_v40, %v3345_v11  ;;  %v3347_v56 = vld [vmem:[#allocation2 + $0xb8] sm:$0xf0]  ;;  %v2142_v54 = vsel %vm2141_vm13, %v3567_v29, %v2138_v8 }
 0x1e9   : > { %1402 = vst [vmem:[#allocation2 + $0xc4] sm:$0xf] %v1370_v3  ;;  %v4305_v23 = vadd.f32 %v1875_v22, %v1786_v18  ;;  %v956_v35 = vpop.f32.mrf.mxu2  ;;  %v1069_v53 = vpop.f32.mrf.mxu3  ;;  %v3350_v44 = vor.u32 %v3474_v27, %v3347_v56  ;;  %v4308_v43 = vmul.f32 %v2142_v54, %v4241_v59 }
 0x1ea   : > { %v1115_v60 = vmul.f32 %v956_v35, %v4068_v9  ;;  %v1307_v46 = vmul.f32 %v956_v35, %v4070_v10  ;;  %v1147_v0 = vmul.f32 %v1069_v53, %v4070_v10  ;;  %v1275_v51 = vmul.f32 %v1069_v53, %v4068_v9  ;;  %1825 = vmatmul.bf16.gmra.mxu0 %v3346_v28 }
 0x1eb   : > { %v2045_v29 = vand.u32 2147483647, %v4305_v23  ;;  %1914 = vmatmul.bf16.gmra.mxu1 %v3350_v44  ;;  %v2458_v63 = vmul.f32 %v4308_v43, %v4308_v43  ;;  %v2146_v32 = vmul.f32 0.5, %v2145_v15 }
 0x1ec   : > { %v1179_v34 = vsub.f32 %v1115_v60, %v1147_v0  ;;  %v1339_v45 = vadd.f32 %v1307_v46, %v1275_v51 }
 0x1ed   : > { %v3571_v59 = vpop.eup %3570  ;;  %v4317_v33 = vadd.f32 1e-10, %v2045_v29  ;;  %v2147_v1 = vsub.f32 1.5, %v2146_v32 }
 0x1ee   : > { %v2154_v10 = vmul.f32 %v3571_v59, %v4295_v5  ;;  %v1211_v2 = vpack.c.bf16 %v1179_v34, %v1179_v34  ;;  %v1371_v9 = vpack.c.bf16 %v1339_v45, %v1339_v45  ;;  %vm2160_vm1 = vweird.f32 %v3571_v59 }
 0x1ef   : > { %3572 = vrsqrt.f32 %v4317_v33  ;;  %2493 = vadd.xlane.f32.xlu1 %v2458_v63  ;;  %v1788_v48 = vpop.f32.mrf.mxu0  ;;  %v2148_v36 = vmul.f32 %v4293_v6, %v2147_v1  ;;  %v3353_v27 = vld [vmem:[#allocation2 + $0xc0] sm:$0xf]  ;;  %vm2161_vm3 = vmor %vm2159_vm2, %vm2160_vm1  ;;  %vm2169_vm5 = vweird.f32 %v4317_v33 }
 0x1f0   : > { %v2155_v58 = vmul.f32 %v3571_v59, %v2154_v10  ;;  %1243 = vst [vmem:[#allocation2 + $0xc8] sm:$0xf] %v1211_v2  ;;  %v1877_v47 = vpop.f32.mrf.mxu1  ;;  %v3476_v44 = vld [vmem:[#allocation2 + $0xc4] sm:$0xf] }
 0x1f1   : > { %1403 = vst [vmem:[#allocation2 + $0xcc] sm:$0xf] %v1371_v9  ;;  %v4324_v21 = vadd.f32 %v1877_v47, %v1788_v48  ;;  %v959_v16 = vpop.f32.mrf.mxu2  ;;  %v1072_v57 = vpop.f32.mrf.mxu3  ;;  %v2152_v61 = vsel %vm2151_vm0, %v4293_v6, %v2148_v36 }
 0x1f2   : > { %v2156_v50 = vmul.f32 0.5, %v2155_v58  ;;  %v1116_v7 = vmul.f32 %v959_v16, %v4078_v13  ;;  %v1308_v38 = vmul.f32 %v959_v16, %v4080_v14  ;;  %v1148_v4 = vmul.f32 %v1072_v57, %v4080_v14 }
 0x1f3   : > { %v2046_v49 = vand.u32 2147483647, %v4324_v21  ;;  %v1276_v37 = vmul.f32 %v1072_v57, %v4078_v13  ;;  %v4333_v8 = vmul.f32 %v2152_v61, %v4263_v12 }
 0x1f4   : > { %v1180_v3 = vsub.f32 %v1116_v7, %v1148_v4  ;;  %v2157_v18 = vsub.f32 1.5, %v2156_v50 }
 0x1f5   : > { %v3573_v11 = vpop.eup %3572  ;;  %v4335_v40 = vadd.f32 1e-10, %v2046_v49  ;;  %v1340_v6 = vadd.f32 %v1308_v38, %v1276_v37  ;;  %v2459_v15 = vmul.f32 %v4333_v8, %v4333_v8 }
 0x1f6   : > { %v2164_v22 = vmul.f32 %v3573_v11, %v4317_v33  ;;  %v1212_v14 = vpack.c.bf16 %v1180_v3, %v1180_v3  ;;  %v2158_v28 = vmul.f32 %v3571_v59, %v2157_v18  ;;  %vm2170_vm4 = vweird.f32 %v3573_v11 }
 0x1f7   : > { %3574 = vrsqrt.f32 %v4335_v40  ;;  %v1372_v13 = vpack.c.bf16 %v1340_v6, %v1340_v6  ;;  %2495 = vadd.xlane.f32.xlu2 %v2459_v15  ;;  %v1791_v12 = vpop.f32.mrf.mxu0  ;;  %v3477_v56 = vld [vmem:[#allocation2 + $0xc4] sm:$0xf0]  ;;  %vm2171_vm6 = vmor %vm2169_vm5, %vm2170_vm4  ;;  %vm2179_vm8 = vweird.f32 %v4335_v40 }
 0x1f8   : > { %v2165_v54 = vmul.f32 %v3573_v11, %v2164_v22  ;;  %1244 = vst [vmem:[#allocation2 + $0xd0] sm:$0xf] %v1212_v14  ;;  %v1880_v35 = vpop.f32.mrf.mxu1  ;;  %v3354_v53 = vor.u32 %v3477_v56, %v3353_v27  ;;  %v3355_v60 = vld [vmem:[#allocation2 + $0xc8] sm:$0xf0]  ;;  %v2162_v46 = vsel %vm2161_vm3, %v3571_v59, %v2158_v28 }
 0x1f9   : > { %1404 = vst [vmem:[#allocation2 + $0xd4] sm:$0xf] %v1372_v13  ;;  %v4343_v0 = vadd.f32 %v1880_v35, %v1791_v12  ;;  %v962_v5 = vpop.f32.mrf.mxu2  ;;  %v1075_v51 = vpop.f32.mrf.mxu3  ;;  %v3358_v29 = vor.u32 %v3476_v44, %v3355_v60  ;;  %v4346_v63 = vmul.f32 %v2162_v46, %v4282_v17 }
 0x1fa   : > { %v2166_v32 = vmul.f32 0.5, %v2165_v54  ;;  %v1117_v34 = vmul.f32 %v962_v5, %v4094_v19  ;;  %v1309_v45 = vmul.f32 %v962_v5, %v4096_v20  ;;  %v1149_v1 = vmul.f32 %v1075_v51, %v4096_v20  ;;  %1830 = vmatmul.bf16.gmra.mxu0 %v3354_v53 }
 0x1fb   : > { %v2047_v10 = vand.u32 2147483647, %v4343_v0  ;;  %v1277_v59 = vmul.f32 %v1075_v51, %v4094_v19  ;;  %1919 = vmatmul.bf16.gmra.mxu1 %v3358_v29  ;;  %v2460_v2 = vmul.f32 %v4346_v63, %v4346_v63 }
 0x1fc   : > { %v2167_v9 = vsub.f32 1.5, %v2166_v32  ;;  %v1181_v17 = vsub.f32 %v1117_v34, %v1149_v1 }
 0x1fd   : > { %v3575_v48 = vpop.eup %3574  ;;  %v4355_v36 = vadd.f32 1e-10, %v2047_v10  ;;  %v1341_v58 = vadd.f32 %v1309_v45, %v1277_v59 }
 0x1fe   : > { %v2168_v47 = vmul.f32 %v3573_v11, %v2167_v9  ;;  %v2174_v20 = vmul.f32 %v3575_v48, %v4335_v40  ;;  %v1213_v16 = vpack.c.bf16 %v1181_v17, %v1181_v17  ;;  %vm2180_vm7 = vweird.f32 %v3575_v48 }
 0x1ff   : > { %3576 = vrsqrt.f32 %v4355_v36  ;;  %v1373_v19 = vpack.c.bf16 %v1341_v58, %v1341_v58  ;;  %2497 = vadd.xlane.f32.xlu2 %v2460_v2  ;;  %v1793_v57 = vpop.f32.mrf.mxu0  ;;  %v3361_v35 = vld [vmem:[#allocation2 + $0xd0] sm:$0xf]  ;;  %vm2181_vm9 = vmor %vm2179_vm8, %vm2180_vm7  ;;  %vm2189_vm11 = vweird.f32 %v4355_v36 }
 0x200   : > { %v2172_v61 = vsel %vm2171_vm6, %v3573_v11, %v2168_v47  ;;  %v2175_v50 = vmul.f32 %v3575_v48, %v2174_v20  ;;  %1245 = vst [vmem:[#allocation2 + $0xd8] sm:$0xf] %v1213_v16  ;;  %v1882_v7 = vpop.f32.mrf.mxu1  ;;  %v3478_v5 = vld [vmem:[#allocation2 + $0xd4] sm:$0xf] }
 0x201   : > { %v4361_v38 = vmul.f32 %v2172_v61, %v4305_v23  ;;  %1405 = vst [vmem:[#allocation2 + $0xdc] sm:$0xf] %v1373_v19  ;;  %v4363_v4 = vadd.f32 %v1882_v7, %v1793_v57  ;;  %v965_v33 = vpop.f32.mrf.mxu2  ;;  %v1078_v49 = vpop.f32.mrf.mxu3 }
 0x202   : > { %v2176_v37 = vmul.f32 0.5, %v2175_v50  ;;  %v1118_v3 = vmul.f32 %v965_v33, %v4104_v25  ;;  %v1310_v18 = vmul.f32 %v965_v33, %v4106_v26  ;;  %v1150_v6 = vmul.f32 %v1078_v49, %v4106_v26 }
 0x203   : > { %v2048_v11 = vand.u32 2147483647, %v4363_v4  ;;  %v1278_v15 = vmul.f32 %v1078_v49, %v4104_v25  ;;  %v2461_v23 = vmul.f32 %v4361_v38, %v4361_v38 }
 0x204   : > { %v1182_v22 = vsub.f32 %v1118_v3, %v1150_v6  ;;  %v2177_v14 = vsub.f32 1.5, %v2176_v37 }
 0x205   : > { %v3577_v28 = vpop.eup %3576  ;;  %v4372_v13 = vadd.f32 1e-10, %v2048_v11  ;;  %v1342_v12 = vadd.f32 %v1310_v18, %v1278_v15  ;;  %2499 = vadd.xlane.f32.xlu0 %v2461_v23 }
 0x206   : > { %v2184_v27 = vmul.f32 %v3577_v28, %v4355_v36  ;;  %v1214_v56 = vpack.c.bf16 %v1182_v22, %v1182_v22  ;;  %v2178_v54 = vmul.f32 %v3575_v48, %v2177_v14  ;;  %vm2190_vm10 = vweird.f32 %v3577_v28 }
 0x207   : > { %3578 = vrsqrt.f32 %v4372_v13  ;;  %v1374_v25 = vpack.c.bf16 %v1342_v12, %v1342_v12  ;;  %v1796_v26 = vpop.f32.mrf.mxu0  ;;  %v3479_v53 = vld [vmem:[#allocation2 + $0xd4] sm:$0xf0]  ;;  %vm2191_vm12 = vmor %vm2189_vm11, %vm2190_vm10  ;;  %vm2199_vm14 = vweird.f32 %v4372_v13 }
 0x208   : > { %v2185_v44 = vmul.f32 %v3577_v28, %v2184_v27  ;;  %1246 = vst [vmem:[#allocation2 + $0xe0] sm:$0xf] %v1214_v56  ;;  %v1885_v60 = vpop.f32.mrf.mxu1  ;;  %v3362_v46 = vor.u32 %v3479_v53, %v3361_v35  ;;  %v3363_v51 = vld [vmem:[#allocation2 + $0xd8] sm:$0xf0]  ;;  %v2182_v29 = vsel %vm2181_vm9, %v3575_v48, %v2178_v54 }
 0x209   : > { %1406 = vst [vmem:[#allocation2 + $0xe4] sm:$0xf] %v1374_v25  ;;  %v4377_v32 = vadd.f32 %v1885_v60, %v1796_v26  ;;  %v968_v34 = vpop.f32.mrf.mxu2  ;;  %v1081_v45 = vpop.f32.mrf.mxu3  ;;  %v3366_v40 = vor.u32 %v3478_v5, %v3363_v51  ;;  %v4380_v1 = vmul.f32 %v2182_v29, %v4324_v21 }
 0x20a   : > { %v2186_v10 = vmul.f32 0.5, %v2185_v44  ;;  %v1119_v59 = vmul.f32 %v968_v34, %v4111_v30  ;;  %v1311_v2 = vmul.f32 %v968_v34, %v4113_v31  ;;  %v1151_v9 = vmul.f32 %v1081_v45, %v4113_v31  ;;  %1835 = vmatmul.bf16.gmra.mxu0 %v3362_v46 }
 0x20b   : > { %v2049_v17 = vand.u32 2147483647, %v4377_v32  ;;  %v1279_v48 = vmul.f32 %v1081_v45, %v4111_v30  ;;  %1924 = vmatmul.bf16.gmra.mxu1 %v3366_v40  ;;  %v2462_v58 = vmul.f32 %v4380_v1, %v4380_v1 }
 0x20c   : > { %v2187_v47 = vsub.f32 1.5, %v2186_v10  ;;  %v1183_v21 = vsub.f32 %v1119_v59, %v1151_v9 }
 0x20d   : > { %v3579_v20 = vpop.eup %3578  ;;  %v4389_v16 = vadd.f32 1e-10, %v2049_v17  ;;  %v1343_v19 = vadd.f32 %v1311_v2, %v1279_v48  ;;  %2501 = vadd.xlane.f32.xlu1 %v2462_v58 }
 0x20e   : > { %v2188_v57 = vmul.f32 %v3577_v28, %v2187_v47  ;;  %v2194_v31 = vmul.f32 %v3579_v20, %v4372_v13  ;;  %v1215_v61 = vpack.c.bf16 %v1183_v21, %v1183_v21  ;;  %vm2200_vm13 = vweird.f32 %v3579_v20 }
 0x20f   : > { %3580 = vrsqrt.f32 %v4389_v16  ;;  %v1375_v30 = vpack.c.bf16 %v1343_v19, %v1343_v19  ;;  %v1798_v50 = vpop.f32.mrf.mxu0  ;;  %vm2201_vm15 = vmor %vm2199_vm14, %vm2200_vm13  ;;  %v3369_v53 = vld [vmem:[#allocation2 + $0xe0] sm:$0xf]  ;;  %vm2209_vm1 = vweird.f32 %v4389_v16 }
 0x210   : > { %v2192_v7 = vsel %vm2191_vm12, %v3577_v28, %v2188_v57  ;;  %v2195_v33 = vmul.f32 %v3579_v20, %v2194_v31  ;;  %1247 = vst [vmem:[#allocation2 + $0xe8] sm:$0xf] %v1215_v61  ;;  %v1887_v49 = vpop.f32.mrf.mxu1  ;;  %v3480_v29 = vld [vmem:[#allocation2 + $0xe4] sm:$0xf] }
 0x211   : > { %v4395_v37 = vmul.f32 %v2192_v7, %v4343_v0  ;;  %1407 = vst [vmem:[#allocation2 + $0xec] sm:$0xf] %v1375_v30  ;;  %v4397_v3 = vadd.f32 %v1887_v49, %v1798_v50  ;;  %v971_v18 = vpop.f32.mrf.mxu2  ;;  %v1084_v36 = vpop.f32.mrf.mxu3 }
 0x212   : > { %v2196_v6 = vmul.f32 0.5, %v2195_v33  ;;  %v1120_v11 = vmul.f32 %v971_v18, %v4124_v41  ;;  %v1312_v15 = vmul.f32 %v971_v18, %v4126_v42  ;;  %v1152_v23 = vmul.f32 %v1084_v36, %v4126_v42 }
 0x213   : > { %v2050_v22 = vand.u32 2147483647, %v4397_v3  ;;  %v1280_v14 = vmul.f32 %v1084_v36, %v4124_v41  ;;  %v2463_v0 = vmul.f32 %v4395_v37, %v4395_v37 }
 0x214   : > { %v2197_v28 = vsub.f32 1.5, %v2196_v6  ;;  %v1184_v12 = vsub.f32 %v1120_v11, %v1152_v23 }
 0x215   : > { %v3581_v27 = vpop.eup %3580  ;;  %v4406_v56 = vadd.f32 1e-10, %v2050_v22  ;;  %v1344_v54 = vadd.f32 %v1312_v15, %v1280_v14  ;;  %2503 = vadd.xlane.f32.xlu2 %v2463_v0 }
 0x216   : > { %v2198_v25 = vmul.f32 %v3579_v20, %v2197_v28  ;;  %v2204_v42 = vmul.f32 %v3581_v27, %v4389_v16  ;;  %v1216_v26 = vpack.c.bf16 %v1184_v12, %v1184_v12  ;;  %vm2210_vm0 = vweird.f32 %v3581_v27 }
 0x217   : > { %3582 = vrsqrt.f32 %v4406_v56  ;;  %v1376_v41 = vpack.c.bf16 %v1344_v54, %v1344_v54  ;;  %v1801_v35 = vpop.f32.mrf.mxu0  ;;  %v3481_v44 = vld [vmem:[#allocation2 + $0xe4] sm:$0xf0]  ;;  %vm2211_vm2 = vmor %vm2209_vm1, %vm2210_vm0  ;;  %vm2219_vm4 = vweird.f32 %v4406_v56 }
 0x218   : > { %v2202_v60 = vsel %vm2201_vm15, %v3579_v20, %v2198_v25  ;;  %v2205_v46 = vmul.f32 %v3581_v27, %v2204_v42  ;;  %1248 = vst [vmem:[#allocation2 + $0xf0] sm:$0xf] %v1216_v26  ;;  %v1890_v5 = vpop.f32.mrf.mxu1  ;;  %v3370_v51 = vor.u32 %v3481_v44, %v3369_v53  ;;  %v3371_v34 = vld [vmem:[#allocation2 + $0xe8] sm:$0xf0] }
 0x219   : > { %v4412_v45 = vmul.f32 %v2202_v60, %v4363_v4  ;;  %1408 = vst [vmem:[#allocation2 + $0xf4] sm:$0xf] %v1376_v41  ;;  %v4414_v13 = vadd.f32 %v1890_v5, %v1801_v35  ;;  %v974_v40 = vpop.f32.mrf.mxu2  ;;  %v1087_v10 = vpop.f32.mrf.mxu3  ;;  %v3374_v59 = vor.u32 %v3480_v29, %v3371_v34 }
 0x21a   : > { %v2206_v2 = vmul.f32 0.5, %v2205_v46  ;;  %v1121_v9 = vmul.f32 %v974_v40, %v4137_v52  ;;  %v1313_v17 = vmul.f32 %v974_v40, %v4139_v55  ;;  %v1153_v48 = vmul.f32 %v1087_v10, %v4139_v55  ;;  %1840 = vmatmul.bf16.gmra.mxu0 %v3370_v51 }
 0x21b   : > { %v2051_v58 = vand.u32 2147483647, %v4414_v13  ;;  %v1281_v47 = vmul.f32 %v1087_v10, %v4137_v52  ;;  %1929 = vmatmul.bf16.gmra.mxu1 %v3374_v59  ;;  %v2464_v4 = vmul.f32 %v4412_v45, %v4412_v45 }
 0x21c   : > { %v2207_v21 = vsub.f32 1.5, %v2206_v2  ;;  %v1185_v20 = vsub.f32 %v1121_v9, %v1153_v48 }
 0x21d   : > { %v3583_v19 = vpop.eup %3582  ;;  %v2083_v57 = vadd.f32 1e-10, %v2051_v58  ;;  %v1345_v31 = vadd.f32 %v1313_v17, %v1281_v47  ;;  %2505 = vadd.xlane.f32.xlu0 %v2464_v4 }
 0x21e   : > { %v2208_v61 = vmul.f32 %v3581_v27, %v2207_v21  ;;  %v2214_v55 = vmul.f32 %v3583_v19, %v4406_v56  ;;  %v1217_v30 = vpack.c.bf16 %v1185_v20, %v1185_v20  ;;  %vm2220_vm3 = vweird.f32 %v3583_v19 }
 0x21f   : > { %3584 = vrsqrt.f32 %v2083_v57  ;;  %v1377_v52 = vpack.c.bf16 %v1345_v31, %v1345_v31  ;;  %v1803_v50 = vpop.f32.mrf.mxu0  ;;  %vm2221_vm5 = vmor %vm2219_vm4, %vm2220_vm3  ;;  %v3377_v28 = vld [vmem:[#allocation2 + $0xf0] sm:$0xf]  ;;  %vm2229_vm7 = vweird.f32 %v2083_v57 }
 0x220   : > { %v2212_v7 = vsel %vm2211_vm2, %v3581_v27, %v2208_v61  ;;  %v2215_v33 = vmul.f32 %v3583_v19, %v2214_v55  ;;  %1249 = vst [vmem:[#allocation2 + $0xf8] sm:$0xf] %v1217_v30  ;;  %v1892_v49 = vpop.f32.mrf.mxu1  ;;  %v3482_v26 = vld [vmem:[#allocation2 + $0xf4] sm:$0xf] }
 0x221   : > { %v4426_v18 = vmul.f32 %v2212_v7, %v4377_v32  ;;  %1409 = vst [vmem:[#allocation2 + $0xfc] sm:$0xf] %v1377_v52  ;;  %v4428_v36 = vadd.f32 %v1892_v49, %v1803_v50 }
 0x222   : > { %v2216_v6 = vmul.f32 0.5, %v2215_v33 }
 0x223   : > { %v2052_v16 = vand.u32 2147483647, %v4428_v36  ;;  %v2465_v11 = vmul.f32 %v4426_v18, %v4426_v18 }
 0x224   : > { %v2217_v15 = vsub.f32 1.5, %v2216_v6 }
 0x225   : > { %v3585_v23 = vpop.eup %3584  ;;  %v2084_v22 = vadd.f32 1e-10, %v2052_v16  ;;  %2507 = vadd.xlane.f32.xlu1 %v2465_v11 }
 0x226   : > { %v2218_v14 = vmul.f32 %v3583_v19, %v2217_v15  ;;  %v2224_v0 = vmul.f32 %v3585_v23, %v2083_v57  ;;  %vm2230_vm6 = vweird.f32 %v3585_v23 }
 0x227   : > { %3586 = vrsqrt.f32 %v2084_v22  ;;  %v1806_v32 = vpop.f32.mrf.mxu0  ;;  %v3483_v12 = vld [vmem:[#allocation2 + $0xf4] sm:$0xf0]  ;;  %vm2231_vm8 = vmor %vm2229_vm7, %vm2230_vm6  ;;  %vm2239_vm10 = vweird.f32 %v2084_v22 }
 0x228   : > { %v2222_v27 = vsel %vm2221_vm5, %v3583_v19, %v2218_v14  ;;  %v2225_v54 = vmul.f32 %v3585_v23, %v2224_v0  ;;  %v1895_v25 = vpop.f32.mrf.mxu1  ;;  %v3378_v42 = vor.u32 %v3483_v12, %v3377_v28  ;;  %v3379_v41 = vld [vmem:[#allocation2 + $0xf8] sm:$0xf0] }
 0x229   : > { %v4435_v35 = vmul.f32 %v2222_v27, %v4397_v3  ;;  %v1896_v53 = vadd.f32 %v1895_v25, %v1806_v32  ;;  %v3382_v44 = vor.u32 %v3482_v26, %v3379_v41 }
 0x22a   : > { %v2226_v60 = vmul.f32 0.5, %v2225_v54  ;;  %1845 = vmatmul.bf16.gmra.mxu0 %v3378_v42 }
 0x22b   : > { %v2053_v56 = vand.u32 2147483647, %v1896_v53  ;;  %1934 = vmatmul.bf16.gmra.mxu1 %v3382_v44  ;;  %v2466_v46 = vmul.f32 %v4435_v35, %v4435_v35 }
 0x22c   : > { %v2227_v5 = vsub.f32 1.5, %v2226_v60 }
 0x22d   : > { %v3587_v51 = vpop.eup %3586  ;;  %v2085_v29 = vadd.f32 1e-10, %v2053_v56  ;;  %2509 = vadd.xlane.f32.xlu2 %v2466_v46 }
 0x22e   : > { %v2228_v34 = vmul.f32 %v3585_v23, %v2227_v5  ;;  %v2234_v40 = vmul.f32 %v3587_v51, %v2084_v22  ;;  %vm2240_vm9 = vweird.f32 %v3587_v51 }
 0x22f   : > { %3588 = vrsqrt.f32 %v2085_v29  ;;  %v1808_v3 = vpop.f32.mrf.mxu0  ;;  %vm2241_vm11 = vmor %vm2239_vm10, %vm2240_vm9  ;;  %vm2249_vm13 = vweird.f32 %v2085_v29 }
 0x230   : > { %v2232_v10 = vsel %vm2231_vm8, %v3585_v23, %v2228_v34  ;;  %v2235_v59 = vmul.f32 %v3587_v51, %v2234_v40  ;;  %v1897_v2 = vpop.f32.mrf.mxu1 }
 0x231   : > { %v4440_v9 = vmul.f32 %v2232_v10, %v4414_v13  ;;  %v1898_v17 = vadd.f32 %v1897_v2, %v1808_v3 }
 0x232   : > { %v2236_v48 = vmul.f32 0.5, %v2235_v59 }
 0x233   : > { %v2054_v58 = vand.u32 2147483647, %v1898_v17  ;;  %v2467_v47 = vmul.f32 %v4440_v9, %v4440_v9 }
 0x234   : > { %v2237_v4 = vsub.f32 1.5, %v2236_v48 }
 0x235   : > { %v3589_v21 = vpop.eup %3588  ;;  %v2086_v20 = vadd.f32 1e-10, %v2054_v58  ;;  %2511 = vadd.xlane.f32.xlu0 %v2467_v47 }
 0x236   : > { %v2238_v19 = vmul.f32 %v3587_v51, %v2237_v4  ;;  %v2244_v57 = vmul.f32 %v3589_v21, %v2085_v29  ;;  %vm2250_vm12 = vweird.f32 %v3589_v21 }
 0x237   : > { %3590 = vrsqrt.f32 %v2086_v20  ;;  %v1811_v31 = vpop.f32.mrf.mxu0  ;;  %vm2251_vm14 = vmor %vm2249_vm13, %vm2250_vm12  ;;  %vm2259_vm0 = vweird.f32 %v2086_v20 }
 0x238   : > { %v2242_v61 = vsel %vm2241_vm11, %v3587_v51, %v2238_v19  ;;  %v2245_v13 = vmul.f32 %v3589_v21, %v2244_v57  ;;  %v1900_v55 = vpop.f32.mrf.mxu1 }
 0x239   : > { %v4445_v30 = vmul.f32 %v2242_v61, %v4428_v36  ;;  %v1901_v52 = vadd.f32 %v1900_v55, %v1811_v31 }
 0x23a   : > { %v2246_v50 = vmul.f32 0.5, %v2245_v13 }
 0x23b   : > { %v2055_v7 = vand.u32 2147483647, %v1901_v52  ;;  %v2468_v33 = vmul.f32 %v4445_v30, %v4445_v30 }
 0x23c   : > { %v2247_v49 = vsub.f32 1.5, %v2246_v50 }
 0x23d   : > { %v3591_v6 = vpop.eup %3590  ;;  %v2087_v16 = vadd.f32 1e-10, %v2055_v7  ;;  %2513 = vadd.xlane.f32.xlu1 %v2468_v33 }
 0x23e   : > { %v2248_v11 = vmul.f32 %v3589_v21, %v2247_v49  ;;  %v2254_v15 = vmul.f32 %v3591_v6, %v2086_v20  ;;  %vm2260_vm15 = vweird.f32 %v3591_v6 }
 0x23f   : > { %3592 = vrsqrt.f32 %v2087_v16  ;;  %v1813_v23 = vpop.f32.mrf.mxu0  ;;  %vm2261_vm1 = vmor %vm2259_vm0, %vm2260_vm15  ;;  %vm2269_vm3 = vweird.f32 %v2087_v16 }
 0x240   : > { %v2252_v22 = vsel %vm2251_vm14, %v3589_v21, %v2248_v11  ;;  %v2255_v36 = vmul.f32 %v3591_v6, %v2254_v15  ;;  %v1902_v14 = vpop.f32.mrf.mxu1 }
 0x241   : > { %v4449_v0 = vmul.f32 %v2252_v22, %v1896_v53  ;;  %v4451_v32 = vadd.f32 %v1902_v14, %v1813_v23 }
 0x242   : > { %v2256_v28 = vmul.f32 0.5, %v2255_v36 }
 0x243   : > { %v2056_v12 = vand.u32 2147483647, %v4451_v32  ;;  %v2469_v27 = vmul.f32 %v4449_v0, %v4449_v0 }
 0x244   : > { %v2257_v54 = vsub.f32 1.5, %v2256_v28 }
 0x245   : > { %v3593_v25 = vpop.eup %3592  ;;  %v2088_v42 = vadd.f32 1e-10, %v2056_v12  ;;  %2515 = vadd.xlane.f32.xlu2 %v2469_v27 }
 0x246   : > { %v2258_v26 = vmul.f32 %v3591_v6, %v2257_v54  ;;  %v2264_v41 = vmul.f32 %v3593_v25, %v2087_v16  ;;  %vm2270_vm2 = vweird.f32 %v3593_v25 }
 0x247   : > { %3594 = vrsqrt.f32 %v2088_v42  ;;  %v1816_v53 = vpop.f32.mrf.mxu0  ;;  %vm2271_vm4 = vmor %vm2269_vm3, %vm2270_vm2  ;;  %vm2279_vm6 = vweird.f32 %v2088_v42 }
 0x248   : > { %v2262_v44 = vsel %vm2261_vm1, %v3591_v6, %v2258_v26  ;;  %v2265_v60 = vmul.f32 %v3593_v25, %v2264_v41  ;;  %v1905_v56 = vpop.f32.mrf.mxu1 }
 0x249   : > { %v4456_v46 = vmul.f32 %v2262_v44, %v1898_v17  ;;  %v4458_v5 = vadd.f32 %v1905_v56, %v1816_v53 }
 0x24a   : > { %v2266_v51 = vmul.f32 0.5, %v2265_v60  ;;  %v2488_v29 = vpop.xlane.xlu0 %2487 }
 0x24b   : > { %v2551_v34 = vmax.f32 %v2488_v29, 1e-24  ;;  %v2057_v40 = vand.u32 2147483647, %v4458_v5  ;;  %v2470_v3 = vmul.f32 %v4456_v46, %v4456_v46 }
 0x24c   : > { %v2267_v10 = vsub.f32 1.5, %v2266_v51 }
 0x24d   : > { %v3595_v59 = vpop.eup %3594  ;;  %3596 = vrsqrt.f32 %v2551_v34  ;;  %v4463_v2 = vadd.f32 1e-10, %v2057_v40  ;;  %2517 = vadd.xlane.f32.xlu0 %v2470_v3  ;;  %vm2589_vm9 = vweird.f32 %v2551_v34 }
 0x24e   : > { %v2268_v48 = vmul.f32 %v3593_v25, %v2267_v10  ;;  %v2274_v17 = vmul.f32 %v3595_v59, %v2088_v42  ;;  %vm2280_vm5 = vweird.f32 %v3595_v59 }
 0x24f   : > { %3598 = vrsqrt.f32 %v4463_v2  ;;  %v1818_v58 = vpop.f32.mrf.mxu0  ;;  %vm2281_vm7 = vmor %vm2279_vm6, %vm2280_vm5  ;;  %vm2289_vm12 = vweird.f32 %v4463_v2 }
 0x250   : > { %v2272_v47 = vsel %vm2271_vm4, %v3593_v25, %v2268_v48  ;;  %v2275_v4 = vmul.f32 %v3595_v59, %v2274_v17  ;;  %v1907_v21 = vpop.f32.mrf.mxu1 }
 0x251   : > { %v4466_v20 = vmul.f32 %v2272_v47, %v1901_v52  ;;  %v4468_v19 = vadd.f32 %v1907_v21, %v1818_v58 }
 0x252   : > { %v2276_v57 = vmul.f32 0.5, %v2275_v4  ;;  %v2490_v31 = vpop.xlane.xlu0 %2489 }
 0x253   : > { %v3597_v61 = vpop.eup %3596  ;;  %v4470_v13 = vmax.f32 %v2490_v31, 1e-24  ;;  %v2058_v55 = vand.u32 2147483647, %v4468_v19  ;;  %v2471_v50 = vmul.f32 %v4466_v20, %v4466_v20 }
 0x254   : > { %v2277_v7 = vsub.f32 1.5, %v2276_v57  ;;  %v2584_v33 = vmul.f32 %v3597_v61, %v2551_v34  ;;  %vm2590_vm8 = vweird.f32 %v3597_v61 }
 0x255   : > { %v3599_v49 = vpop.eup %3598  ;;  %3600 = vrsqrt.f32 %v4470_v13  ;;  %v4476_v52 = vadd.f32 1e-10, %v2058_v55  ;;  %2519 = vadd.xlane.f32.xlu1 %v2471_v50  ;;  %vm2591_vm11 = vmor %vm2589_vm9, %vm2590_vm8  ;;  %vm2599_vm15 = vweird.f32 %v4470_v13 }
 0x256   : > { %v2278_v6 = vmul.f32 %v3595_v59, %v2277_v7  ;;  %v2585_v16 = vmul.f32 %v3597_v61, %v2584_v33  ;;  %v2284_v11 = vmul.f32 %v3599_v49, %v4463_v2  ;;  %vm2290_vm10 = vweird.f32 %v3599_v49 }
 0x257   : > { %3602 = vrsqrt.f32 %v4476_v52  ;;  %v1821_v15 = vpop.f32.mrf.mxu0  ;;  %vm2291_vm13 = vmor %vm2289_vm12, %vm2290_vm10  ;;  %vm2299_vm2 = vweird.f32 %v4476_v52 }
 0x258   : > { %v2282_v23 = vsel %vm2281_vm7, %v3595_v59, %v2278_v6  ;;  %v2586_v22 = vmul.f32 0.5, %v2585_v16  ;;  %v2285_v36 = vmul.f32 %v3599_v49, %v2284_v11  ;;  %v1910_v14 = vpop.f32.mrf.mxu1 }
 0x259   : > { %v4482_v28 = vmul.f32 %v2282_v23, %v4451_v32  ;;  %v4484_v12 = vadd.f32 %v1910_v14, %v1821_v15 }
 0x25a   : > { %v2587_v27 = vsub.f32 1.5, %v2586_v22  ;;  %v2286_v54 = vmul.f32 0.5, %v2285_v36  ;;  %v2492_v25 = vpop.xlane.xlu1 %2491 }
 0x25b   : > { %v3601_v42 = vpop.eup %3600  ;;  %v4488_v26 = vmax.f32 %v2492_v25, 1e-24  ;;  %v2059_v41 = vand.u32 2147483647, %v4484_v12  ;;  %v2472_v53 = vmul.f32 %v4482_v28, %v4482_v28 }
 0x25c   : > { %v2588_v44 = vmul.f32 %v3597_v61, %v2587_v27  ;;  %v2287_v32 = vsub.f32 1.5, %v2286_v54  ;;  %v2594_v60 = vmul.f32 %v3601_v42, %v4470_v13  ;;  %vm2600_vm14 = vweird.f32 %v3601_v42 }
 0x25d   : > { %v3603_v56 = vpop.eup %3602  ;;  %3604 = vrsqrt.f32 %v4488_v26  ;;  %v4496_v51 = vadd.f32 1e-10, %v2059_v41  ;;  %2521 = vadd.xlane.f32.xlu2 %v2472_v53  ;;  %vm2601_vm1 = vmor %vm2599_vm15, %vm2600_vm14  ;;  %vm2609_vm5 = vweird.f32 %v4488_v26 }
 0x25e   : > { %v2592_v29 = vsel %vm2591_vm11, %v3597_v61, %v2588_v44  ;;  %v2288_v34 = vmul.f32 %v3599_v49, %v2287_v32  ;;  %v2595_v40 = vmul.f32 %v3601_v42, %v2594_v60  ;;  %v2294_v3 = vmul.f32 %v3603_v56, %v4476_v52 }
 0x25f   : > { %v2903_v10 = vmul.f32 %v2592_v29, %v4249_v62  ;;  %3606 = vrsqrt.f32 %v4496_v51  ;;  %v1823_v59 = vpop.f32.mrf.mxu0  ;;  %vm2300_vm0 = vweird.f32 %v3603_v56  ;;  %vm2309_vm8 = vweird.f32 %v4496_v51 }
 0x260   : > { %v2292_v48 = vsel %vm2291_vm13, %v3599_v49, %v2288_v34  ;;  %v2596_v17 = vmul.f32 0.5, %v2595_v40  ;;  %v2295_v58 = vmul.f32 %v3603_v56, %v2294_v3  ;;  %v1912_v2 = vpop.f32.mrf.mxu1  ;;  %vm2301_vm3 = vmor %vm2299_vm2, %vm2300_vm0 }
 0x261   : > { %2935 = vst [vmem:[%s4501_s10] sm:$0xff] %v2903_v10  ;;  %v4505_v47 = vmul.f32 %v2292_v48, %v4458_v5  ;;  %v4507_v4 = vadd.f32 %v1912_v2, %v1823_v59 }
 0x262   : > { %v2597_v21 = vsub.f32 1.5, %v2596_v17  ;;  %v2296_v62 = vmul.f32 0.5, %v2295_v58  ;;  %v2494_v57 = vpop.xlane.xlu1 %2493 }
 0x263   : > { %v3605_v31 = vpop.eup %3604  ;;  %v4510_v61 = vmax.f32 %v2494_v57, 1e-24  ;;  %v2060_v55 = vand.u32 2147483647, %v4507_v4  ;;  %v2473_v50 = vmul.f32 %v4505_v47, %v4505_v47 }
 0x264   : > { %v2598_v7 = vmul.f32 %v3601_v42, %v2597_v21  ;;  %v2297_v33 = vsub.f32 1.5, %v2296_v62  ;;  %v2604_v5 = vmul.f32 %v3605_v31, %v4488_v26  ;;  %vm2610_vm4 = vweird.f32 %v3605_v31 }
 0x265   : > { %v3607_v49 = vpop.eup %3606  ;;  %3608 = vrsqrt.f32 %v4510_v61  ;;  %v4518_v13 = vadd.f32 1e-10, %v2060_v55  ;;  %2523 = vadd.xlane.f32.xlu0 %v2473_v50  ;;  %vm2611_vm7 = vmor %vm2609_vm5, %vm2610_vm4  ;;  %vm2619_vm11 = vweird.f32 %v4510_v61 }
 0x266   : > { %v2602_v6 = vsel %vm2601_vm1, %v3601_v42, %v2598_v7  ;;  %v2298_v16 = vmul.f32 %v3603_v56, %v2297_v33  ;;  %v2605_v11 = vmul.f32 %v3605_v31, %v2604_v5  ;;  %v2304_v15 = vmul.f32 %v3607_v49, %v4496_v51 }
 0x267   : > { %v2904_v23 = vmul.f32 %v2602_v6, %v4266_v24  ;;  %3610 = vrsqrt.f32 %v4518_v13  ;;  %v1826_v22 = vpop.f32.mrf.mxu0  ;;  %vm2310_vm6 = vweird.f32 %v3607_v49  ;;  %vm2319_vm14 = vweird.f32 %v4518_v13 }
 0x268   : > { %v2302_v36 = vsel %vm2301_vm3, %v3603_v56, %v2298_v16  ;;  %v2606_v14 = vmul.f32 0.5, %v2605_v11  ;;  %v2305_v52 = vmul.f32 %v3607_v49, %v2304_v15  ;;  %v1915_v27 = vpop.f32.mrf.mxu1  ;;  %vm2311_vm9 = vmor %vm2309_vm8, %vm2310_vm6 }
 0x269   : > { %2936 = vst [vmem:[%s4501_s10 + $0x8] sm:$0xff] %v2904_v23  ;;  %v4525_v54 = vmul.f32 %v2302_v36, %v4468_v19  ;;  %v4527_v25 = vadd.f32 %v1915_v27, %v1826_v22 }
 0x26a   : > { %v2607_v42 = vsub.f32 1.5, %v2606_v14  ;;  %v2306_v41 = vmul.f32 0.5, %v2305_v52  ;;  %v2496_v53 = vpop.xlane.xlu2 %2495 }
 0x26b   : > { %v3609_v44 = vpop.eup %3608  ;;  %v4530_v24 = vmax.f32 %v2496_v53, 1e-24  ;;  %v2061_v32 = vand.u32 2147483647, %v4527_v25  ;;  %v2474_v60 = vmul.f32 %v4525_v54, %v4525_v54 }
 0x26c   : > { %v2608_v56 = vmul.f32 %v3605_v31, %v2607_v42  ;;  %v2307_v29 = vsub.f32 1.5, %v2306_v41  ;;  %v2614_v19 = vmul.f32 %v3609_v44, %v4510_v61  ;;  %vm2620_vm10 = vweird.f32 %v3609_v44 }
 0x26d   : > { %v3611_v34 = vpop.eup %3610  ;;  %3612 = vrsqrt.f32 %v4530_v24  ;;  %v4538_v26 = vadd.f32 1e-10, %v2061_v32  ;;  %2525 = vadd.xlane.f32.xlu1 %v2474_v60  ;;  %vm2621_vm13 = vmor %vm2619_vm11, %vm2620_vm10  ;;  %vm2629_vm1 = vweird.f32 %v4530_v24 }
 0x26e   : > { %v2612_v40 = vsel %vm2611_vm7, %v3605_v31, %v2608_v56  ;;  %v2308_v3 = vmul.f32 %v3607_v49, %v2307_v29  ;;  %v2615_v10 = vmul.f32 %v3609_v44, %v2614_v19  ;;  %v2314_v59 = vmul.f32 %v3611_v34, %v4518_v13 }
 0x26f   : > { %v2905_v48 = vmul.f32 %v2612_v40, %v4291_v39  ;;  %3614 = vrsqrt.f32 %v4538_v26  ;;  %v1828_v17 = vpop.f32.mrf.mxu0  ;;  %vm2320_vm12 = vweird.f32 %v3611_v34  ;;  %vm2329_vm4 = vweird.f32 %v4538_v26 }
 0x270   : > { %v2312_v58 = vsel %vm2311_vm9, %v3607_v49, %v2308_v3  ;;  %v2616_v2 = vmul.f32 0.5, %v2615_v10  ;;  %v2315_v51 = vmul.f32 %v3611_v34, %v2314_v59  ;;  %v1917_v21 = vpop.f32.mrf.mxu1  ;;  %vm2321_vm15 = vmor %vm2319_vm14, %vm2320_vm12 }
 0x271   : > { %2937 = vst [vmem:[%s4501_s10 + $0x10] sm:$0xff] %v2905_v48  ;;  %v4545_v62 = vmul.f32 %v2312_v58, %v4484_v12  ;;  %v4547_v57 = vadd.f32 %v1917_v21, %v1828_v17 }
 0x272   : > { %v2617_v31 = vsub.f32 1.5, %v2616_v2  ;;  %v2316_v55 = vmul.f32 0.5, %v2315_v51  ;;  %v2498_v50 = vpop.xlane.xlu2 %2497 }
 0x273   : > { %v3613_v7 = vpop.eup %3612  ;;  %v4550_v39 = vmax.f32 %v2498_v50, 1e-24  ;;  %v2062_v33 = vand.u32 2147483647, %v4547_v57  ;;  %v2475_v5 = vmul.f32 %v4545_v62, %v4545_v62 }
 0x274   : > { %v2618_v49 = vmul.f32 %v3609_v44, %v2617_v31  ;;  %v2317_v6 = vsub.f32 1.5, %v2316_v55  ;;  %v2624_v12 = vmul.f32 %v3613_v7, %v4530_v24  ;;  %vm2630_vm0 = vweird.f32 %v3613_v7 }
 0x275   : > { %v3615_v16 = vpop.eup %3614  ;;  %3616 = vrsqrt.f32 %v4550_v39  ;;  %v4558_v61 = vadd.f32 1e-10, %v2062_v33  ;;  %2527 = vadd.xlane.f32.xlu2 %v2475_v5  ;;  %vm2631_vm3 = vmor %vm2629_vm1, %vm2630_vm0  ;;  %vm2639_vm7 = vweird.f32 %v4550_v39 }
 0x276   : > { %v2622_v11 = vsel %vm2621_vm13, %v3609_v44, %v2618_v49  ;;  %v2318_v15 = vmul.f32 %v3611_v34, %v2317_v6  ;;  %v2625_v23 = vmul.f32 %v3613_v7, %v2624_v12  ;;  %v2324_v22 = vmul.f32 %v3615_v16, %v4538_v26 }
 0x277   : > { %v2906_v36 = vmul.f32 %v2622_v11, %v4308_v43  ;;  %3618 = vrsqrt.f32 %v4558_v61  ;;  %v1831_v14 = vpop.f32.mrf.mxu0  ;;  %vm2330_vm2 = vweird.f32 %v3615_v16  ;;  %vm2339_vm10 = vweird.f32 %v4558_v61 }
 0x278   : > { %v2322_v52 = vsel %vm2321_vm15, %v3611_v34, %v2318_v15  ;;  %v2626_v27 = vmul.f32 0.5, %v2625_v23  ;;  %v2325_v13 = vmul.f32 %v3615_v16, %v2324_v22  ;;  %v2500_v42 = vpop.xlane.xlu0 %2499  ;;  %v1920_v41 = vpop.f32.mrf.mxu1  ;;  %vm2331_vm5 = vmor %vm2329_vm4, %vm2330_vm2 }
 0x279   : > { %2938 = vst [vmem:[%s4501_s10 + $0x18] sm:$0xff] %v2906_v36  ;;  %v4565_v53 = vmul.f32 %v2322_v52, %v4507_v4  ;;  %v4567_v44 = vmax.f32 %v2500_v42, 1e-24  ;;  %v4569_v32 = vadd.f32 %v1920_v41, %v1831_v14 }
 0x27a   : > { %v2627_v60 = vsub.f32 1.5, %v2626_v27  ;;  %v2326_v43 = vmul.f32 0.5, %v2325_v13 }
 0x27b   : > { %v3617_v56 = vpop.eup %3616  ;;  %3620 = vrsqrt.f32 %v4567_v44  ;;  %v2063_v29 = vand.u32 2147483647, %v4569_v32  ;;  %v2476_v19 = vmul.f32 %v4565_v53, %v4565_v53  ;;  %vm2649_vm13 = vweird.f32 %v4567_v44 }
 0x27c   : > { %v2628_v34 = vmul.f32 %v3613_v7, %v2627_v60  ;;  %v2327_v4 = vsub.f32 1.5, %v2326_v43  ;;  %v2634_v40 = vmul.f32 %v3617_v56, %v4550_v39  ;;  %vm2640_vm6 = vweird.f32 %v3617_v56 }
 0x27d   : > { %v3619_v3 = vpop.eup %3618  ;;  %v4578_v10 = vadd.f32 1e-10, %v2063_v29  ;;  %2529 = vadd.xlane.f32.xlu0 %v2476_v19  ;;  %vm2641_vm9 = vmor %vm2639_vm7, %vm2640_vm6 }
 0x27e   : > { %v2632_v24 = vsel %vm2631_vm3, %v3613_v7, %v2628_v34  ;;  %v2328_v59 = vmul.f32 %v3615_v16, %v2327_v4  ;;  %v2635_v48 = vmul.f32 %v3617_v56, %v2634_v40  ;;  %v2334_v17 = vmul.f32 %v3619_v3, %v4558_v61 }
 0x27f   : > { %v2907_v58 = vmul.f32 %v2632_v24, %v4333_v8  ;;  %3622 = vrsqrt.f32 %v4578_v10  ;;  %v1833_v2 = vpop.f32.mrf.mxu0  ;;  %vm2340_vm8 = vweird.f32 %v3619_v3  ;;  %vm2349_vm0 = vweird.f32 %v4578_v10 }
 0x280   : > { %v2332_v51 = vsel %vm2331_vm5, %v3615_v16, %v2328_v59  ;;  %v2636_v21 = vmul.f32 0.5, %v2635_v48  ;;  %v2335_v31 = vmul.f32 %v3619_v3, %v2334_v17  ;;  %v2502_v55 = vpop.xlane.xlu1 %2501  ;;  %v1922_v26 = vpop.f32.mrf.mxu1  ;;  %vm2341_vm11 = vmor %vm2339_vm10, %vm2340_vm8 }
 0x281   : > { %v3621_v50 = vpop.eup %3620  ;;  %2939 = vst [vmem:[%s4501_s10 + $0x20] sm:$0xff] %v2907_v58  ;;  %v4585_v33 = vmul.f32 %v2332_v51, %v4527_v25  ;;  %v4587_v7 = vmax.f32 %v2502_v55, 1e-24  ;;  %v4589_v5 = vadd.f32 %v1922_v26, %v1833_v2 }
 0x282   : > { %v2637_v49 = vsub.f32 1.5, %v2636_v21  ;;  %v2336_v8 = vmul.f32 0.5, %v2335_v31  ;;  %v2644_v6 = vmul.f32 %v3621_v50, %v4567_v44  ;;  %vm2650_vm12 = vweird.f32 %v3621_v50 }
 0x283   : > { %3624 = vrsqrt.f32 %v4587_v7  ;;  %v2064_v12 = vand.u32 2147483647, %v4589_v5  ;;  %v2477_v16 = vmul.f32 %v4585_v33, %v4585_v33  ;;  %vm2651_vm14 = vmor %vm2649_vm13, %vm2650_vm12  ;;  %vm2659_vm3 = vweird.f32 %v4587_v7 }
 0x284   : > { %v2638_v25 = vmul.f32 %v3617_v56, %v2637_v49  ;;  %v2337_v11 = vsub.f32 1.5, %v2336_v8  ;;  %v2645_v15 = vmul.f32 %v3621_v50, %v2644_v6 }
 0x285   : > { %v3623_v23 = vpop.eup %3622  ;;  %v4598_v22 = vadd.f32 1e-10, %v2064_v12  ;;  %2531 = vadd.xlane.f32.xlu1 %v2477_v16 }
 0x286   : > { %v2642_v39 = vsel %vm2641_vm9, %v3617_v56, %v2638_v25  ;;  %v2338_v36 = vmul.f32 %v3619_v3, %v2337_v11  ;;  %v2646_v14 = vmul.f32 0.5, %v2645_v15  ;;  %v2344_v52 = vmul.f32 %v3623_v23, %v4578_v10 }
 0x287   : > { %v2908_v27 = vmul.f32 %v2642_v39, %v4346_v63  ;;  %3626 = vrsqrt.f32 %v4598_v22  ;;  %v1836_v13 = vpop.f32.mrf.mxu0  ;;  %vm2350_vm15 = vweird.f32 %v3623_v23  ;;  %vm2359_vm6 = vweird.f32 %v4598_v22 }
 0x288   : > { %v2342_v42 = vsel %vm2341_vm11, %v3619_v3, %v2338_v36  ;;  %v2647_v41 = vsub.f32 1.5, %v2646_v14  ;;  %v2345_v60 = vmul.f32 %v3623_v23, %v2344_v52  ;;  %v2504_v61 = vpop.xlane.xlu2 %2503  ;;  %v1925_v43 = vpop.f32.mrf.mxu1  ;;  %vm2351_vm1 = vmor %vm2349_vm0, %vm2350_vm15 }
 0x289   : > { %v3625_v29 = vpop.eup %3624  ;;  %2940 = vst [vmem:[%s4501_s10 + $0x28] sm:$0xff] %v2908_v27  ;;  %v4605_v56 = vmul.f32 %v2342_v42, %v4547_v57  ;;  %v4607_v19 = vmax.f32 %v2504_v61, 1e-24  ;;  %v4609_v34 = vadd.f32 %v1925_v43, %v1836_v13 }
 0x28a   : > { %v2648_v63 = vmul.f32 %v3621_v50, %v2647_v41  ;;  %v2346_v4 = vmul.f32 0.5, %v2345_v60  ;;  %v2654_v40 = vmul.f32 %v3625_v29, %v4587_v7  ;;  %vm2660_vm2 = vweird.f32 %v3625_v29 }
 0x28b   : > { %3628 = vrsqrt.f32 %v4607_v19  ;;  %v2065_v3 = vand.u32 2147483647, %v4609_v34  ;;  %v2478_v57 = vmul.f32 %v4605_v56, %v4605_v56  ;;  %vm2661_vm4 = vmor %vm2659_vm3, %vm2660_vm2  ;;  %vm2669_vm9 = vweird.f32 %v4607_v19 }
 0x28c   : > { %v2652_v24 = vsel %vm2651_vm14, %v3621_v50, %v2648_v63  ;;  %v2347_v59 = vsub.f32 1.5, %v2346_v4  ;;  %v2655_v48 = vmul.f32 %v3625_v29, %v2654_v40 }
 0x28d   : > { %v3627_v17 = vpop.eup %3626  ;;  %v2909_v58 = vmul.f32 %v2652_v24, %v4361_v38  ;;  %v4618_v44 = vadd.f32 1e-10, %v2065_v3  ;;  %2533 = vadd.xlane.f32.xlu2 %v2478_v57 }
 0x28e   : > { %v2348_v2 = vmul.f32 %v3623_v23, %v2347_v59  ;;  %v2656_v51 = vmul.f32 0.5, %v2655_v48  ;;  %v2354_v21 = vmul.f32 %v3627_v17, %v4598_v22  ;;  %vm2360_vm5 = vweird.f32 %v3627_v17 }
 0x28f   : > { %2941 = vst [vmem:[%s4501_s10 + $0x30] sm:$0xff] %v2909_v58  ;;  %3630 = vrsqrt.f32 %v4618_v44  ;;  %v1838_v31 = vpop.f32.mrf.mxu0  ;;  %vm2361_vm7 = vmor %vm2359_vm6, %vm2360_vm5  ;;  %vm2369_vm12 = vweird.f32 %v4618_v44 }
 0x290   : > { %v2352_v55 = vsel %vm2351_vm1, %v3623_v23, %v2348_v2  ;;  %v2657_v26 = vsub.f32 1.5, %v2656_v51  ;;  %v2355_v50 = vmul.f32 %v3627_v17, %v2354_v21  ;;  %v2506_v49 = vpop.xlane.xlu0 %2505  ;;  %v1927_v38 = vpop.f32.mrf.mxu1 }
 0x291   : > { %v3629_v8 = vpop.eup %3628  ;;  %v4625_v6 = vmul.f32 %v2352_v55, %v4569_v32  ;;  %v4627_v12 = vmax.f32 %v2506_v49, 1e-24  ;;  %v4629_v10 = vadd.f32 %v1927_v38, %v1838_v31 }
 0x292   : > { %v2658_v16 = vmul.f32 %v3625_v29, %v2657_v26  ;;  %v2356_v25 = vmul.f32 0.5, %v2355_v50  ;;  %v2664_v11 = vmul.f32 %v3629_v8, %v4607_v19  ;;  %vm2670_vm8 = vweird.f32 %v3629_v8 }
 0x293   : > { %3632 = vrsqrt.f32 %v4627_v12  ;;  %v2066_v15 = vand.u32 2147483647, %v4629_v10  ;;  %v2479_v32 = vmul.f32 %v4625_v6, %v4625_v6  ;;  %vm2671_vm10 = vmor %vm2669_vm9, %vm2670_vm8  ;;  %vm2679_vm15 = vweird.f32 %v4627_v12 }
 0x294   : > { %v2662_v23 = vsel %vm2661_vm4, %v3625_v29, %v2658_v16  ;;  %v2357_v39 = vsub.f32 1.5, %v2356_v25  ;;  %v2665_v36 = vmul.f32 %v3629_v8, %v2664_v11 }
 0x295   : > { %v3631_v14 = vpop.eup %3630  ;;  %v2910_v52 = vmul.f32 %v2662_v23, %v4380_v1  ;;  %v4638_v7 = vadd.f32 1e-10, %v2066_v15  ;;  %2535 = vadd.xlane.f32.xlu0 %v2479_v32 }
 0x296   : > { %v2358_v27 = vmul.f32 %v3627_v17, %v2357_v39  ;;  %v2666_v13 = vmul.f32 0.5, %v2665_v36  ;;  %v2364_v42 = vmul.f32 %v3631_v14, %v4618_v44  ;;  %vm2370_vm11 = vweird.f32 %v3631_v14 }
 0x297   : > { %2942 = vst [vmem:[%s4501_s10 + $0x38] sm:$0xff] %v2910_v52  ;;  %3634 = vrsqrt.f32 %v4638_v7  ;;  %v1841_v41 = vpop.f32.mrf.mxu0  ;;  %vm2371_vm13 = vmor %vm2369_vm12, %vm2370_vm11  ;;  %vm2379_vm2 = vweird.f32 %v4638_v7 }
 0x298   : > { %v2362_v60 = vsel %vm2361_vm7, %v3627_v17, %v2358_v27  ;;  %v2667_v61 = vsub.f32 1.5, %v2666_v13  ;;  %v2365_v43 = vmul.f32 %v3631_v14, %v2364_v42  ;;  %v2508_v29 = vpop.xlane.xlu1 %2507  ;;  %v1930_v1 = vpop.f32.mrf.mxu1 }
 0x299   : > { %v3633_v63 = vpop.eup %3632  ;;  %v4645_v4 = vmul.f32 %v2362_v60, %v4589_v5  ;;  %v4647_v40 = vmax.f32 %v2508_v29, 1e-24  ;;  %v4649_v22 = vadd.f32 %v1930_v1, %v1841_v41 }
 0x29a   : > { %v2668_v3 = vmul.f32 %v3629_v8, %v2667_v61  ;;  %v2366_v57 = vmul.f32 0.5, %v2365_v43  ;;  %v2674_v24 = vmul.f32 %v3633_v63, %v4627_v12  ;;  %vm2680_vm14 = vweird.f32 %v3633_v63 }
 0x29b   : > { %3636 = vrsqrt.f32 %v4647_v40  ;;  %v2067_v59 = vand.u32 2147483647, %v4649_v22  ;;  %v2480_v5 = vmul.f32 %v4645_v4, %v4645_v4  ;;  %vm2681_vm0 = vmor %vm2679_vm15, %vm2680_vm14  ;;  %vm2689_vm5 = vweird.f32 %v4647_v40 }
 0x29c   : > { %v2672_v48 = vsel %vm2671_vm10, %v3629_v8, %v2668_v3  ;;  %v2367_v17 = vsub.f32 1.5, %v2366_v57  ;;  %v2675_v58 = vmul.f32 %v3633_v63, %v2674_v24 }
 0x29d   : > { %v3635_v2 = vpop.eup %3634  ;;  %v2911_v51 = vmul.f32 %v2672_v48, %v4395_v37  ;;  %v4658_v19 = vadd.f32 1e-10, %v2067_v59  ;;  %2537 = vadd.xlane.f32.xlu1 %v2480_v5 }
 0x29e   : > { %v2368_v21 = vmul.f32 %v3631_v14, %v2367_v17  ;;  %v2676_v31 = vmul.f32 0.5, %v2675_v58  ;;  %v2374_v55 = vmul.f32 %v3635_v2, %v4638_v7  ;;  %vm2380_vm1 = vweird.f32 %v3635_v2 }
 0x29f   : > { %2943 = vst [vmem:[%s4501_s10 + $0x40] sm:$0xff] %v2911_v51  ;;  %3638 = vrsqrt.f32 %v4658_v19  ;;  %v1843_v26 = vpop.f32.mrf.mxu0  ;;  %vm2381_vm3 = vmor %vm2379_vm2, %vm2380_vm1  ;;  %vm2389_vm8 = vweird.f32 %v4658_v19 }
 0x2a0   : > { %v2372_v50 = vsel %vm2371_vm13, %v3631_v14, %v2368_v21  ;;  %v2677_v49 = vsub.f32 1.5, %v2676_v31  ;;  %v2375_v38 = vmul.f32 %v3635_v2, %v2374_v55  ;;  %v2510_v8 = vpop.xlane.xlu2 %2509  ;;  %v1932_v37 = vpop.f32.mrf.mxu1 }
 0x2a1   : > { %v3637_v16 = vpop.eup %3636  ;;  %v4665_v25 = vmul.f32 %v2372_v50, %v4609_v34  ;;  %v4667_v11 = vmax.f32 %v2510_v8, 1e-24  ;;  %v4669_v44 = vadd.f32 %v1932_v37, %v1843_v26 }
 0x2a2   : > { %v2678_v15 = vmul.f32 %v3633_v63, %v2677_v49  ;;  %v2376_v32 = vmul.f32 0.5, %v2375_v38  ;;  %v2684_v23 = vmul.f32 %v3637_v16, %v4647_v40  ;;  %vm2690_vm4 = vweird.f32 %v3637_v16 }
 0x2a3   : > { %3640 = vrsqrt.f32 %v4667_v11  ;;  %v2068_v39 = vand.u32 2147483647, %v4669_v44  ;;  %v2481_v34 = vmul.f32 %v4665_v25, %v4665_v25  ;;  %vm2691_vm6 = vmor %vm2689_vm5, %vm2690_vm4  ;;  %vm2699_vm11 = vweird.f32 %v4667_v11 }
 0x2a4   : > { %v2682_v36 = vsel %vm2681_vm0, %v3633_v63, %v2678_v15  ;;  %v2377_v14 = vsub.f32 1.5, %v2376_v32  ;;  %v2685_v52 = vmul.f32 %v3637_v16, %v2684_v23 }
 0x2a5   : > { %v3639_v27 = vpop.eup %3638  ;;  %v2912_v13 = vmul.f32 %v2682_v36, %v4412_v45  ;;  %v4678_v12 = vadd.f32 1e-10, %v2068_v39  ;;  %2539 = vadd.xlane.f32.xlu2 %v2481_v34 }
 0x2a6   : > { %v2378_v42 = vmul.f32 %v3635_v2, %v2377_v14  ;;  %v2686_v41 = vmul.f32 0.5, %v2685_v52  ;;  %v2384_v60 = vmul.f32 %v3639_v27, %v4658_v19  ;;  %vm2390_vm7 = vweird.f32 %v3639_v27 }
 0x2a7   : > { %2944 = vst [vmem:[%s4501_s10 + $0x48] sm:$0xff] %v2912_v13  ;;  %3642 = vrsqrt.f32 %v4678_v12  ;;  %v1846_v61 = vpop.f32.mrf.mxu0  ;;  %vm2391_vm9 = vmor %vm2389_vm8, %vm2390_vm7  ;;  %vm2399_vm14 = vweird.f32 %v4678_v12 }
 0x2a8   : > { %v2382_v43 = vsel %vm2381_vm3, %v3635_v2, %v2378_v42  ;;  %v2687_v29 = vsub.f32 1.5, %v2686_v41  ;;  %v2385_v1 = vmul.f32 %v3639_v27, %v2384_v60  ;;  %v2512_v63 = vpop.xlane.xlu0 %2511  ;;  %v1935_v45 = vpop.f32.mrf.mxu1 }
 0x2a9   : > { %v3641_v3 = vpop.eup %3640  ;;  %v4685_v57 = vmul.f32 %v2382_v43, %v4629_v10  ;;  %v4687_v24 = vmax.f32 %v2512_v63, 1e-24  ;;  %v4689_v7 = vadd.f32 %v1935_v45, %v1846_v61 }
 0x2aa   : > { %v2688_v59 = vmul.f32 %v3637_v16, %v2687_v29  ;;  %v2386_v5 = vmul.f32 0.5, %v2385_v1  ;;  %v2694_v48 = vmul.f32 %v3641_v3, %v4667_v11  ;;  %vm2700_vm10 = vweird.f32 %v3641_v3 }
 0x2ab   : > { %3644 = vrsqrt.f32 %v4687_v24  ;;  %v2069_v17 = vand.u32 2147483647, %v4689_v7  ;;  %v2482_v10 = vmul.f32 %v4685_v57, %v4685_v57  ;;  %vm2701_vm12 = vmor %vm2699_vm11, %vm2700_vm10  ;;  %vm2709_vm1 = vweird.f32 %v4687_v24 }
 0x2ac   : > { %v2692_v58 = vsel %vm2691_vm6, %v3637_v16, %v2688_v59  ;;  %v2387_v2 = vsub.f32 1.5, %v2386_v5  ;;  %v2695_v51 = vmul.f32 %v3641_v3, %v2694_v48 }
 0x2ad   : > { %v3643_v21 = vpop.eup %3642  ;;  %v2913_v31 = vmul.f32 %v2692_v58, %v4426_v18  ;;  %v4698_v40 = vadd.f32 1e-10, %v2069_v17  ;;  %2541 = vadd.xlane.f32.xlu0 %v2482_v10 }
 0x2ae   : > { %v2388_v55 = vmul.f32 %v3639_v27, %v2387_v2  ;;  %v2696_v26 = vmul.f32 0.5, %v2695_v51  ;;  %v2394_v50 = vmul.f32 %v3643_v21, %v4678_v12  ;;  %vm2400_vm13 = vweird.f32 %v3643_v21 }
 0x2af   : > { %2945 = vst [vmem:[%s4501_s10 + $0x50] sm:$0xff] %v2913_v31  ;;  %3646 = vrsqrt.f32 %v4698_v40  ;;  %v1848_v49 = vpop.f32.mrf.mxu0  ;;  %vm2401_vm15 = vmor %vm2399_vm14, %vm2400_vm13  ;;  %vm2409_vm4 = vweird.f32 %v4698_v40 }
 0x2b0   : > { %v2392_v38 = vsel %vm2391_vm9, %v3639_v27, %v2388_v55  ;;  %v2697_v8 = vsub.f32 1.5, %v2696_v26  ;;  %v2395_v37 = vmul.f32 %v3643_v21, %v2394_v50  ;;  %v2514_v16 = vpop.xlane.xlu1 %2513  ;;  %v1937_v18 = vpop.f32.mrf.mxu1 }
 0x2b1   : > { %v3645_v15 = vpop.eup %3644  ;;  %v4705_v32 = vmul.f32 %v2392_v38, %v4649_v22  ;;  %v4707_v23 = vmax.f32 %v2514_v16, 1e-24  ;;  %v4709_v19 = vadd.f32 %v1937_v18, %v1848_v49 }
 0x2b2   : > { %v2698_v39 = vmul.f32 %v3641_v3, %v2697_v8  ;;  %v2396_v34 = vmul.f32 0.5, %v2395_v37  ;;  %v2704_v36 = vmul.f32 %v3645_v15, %v4687_v24  ;;  %vm2710_vm0 = vweird.f32 %v3645_v15 }
 0x2b3   : > { %3648 = vrsqrt.f32 %v4707_v23  ;;  %v2070_v14 = vand.u32 2147483647, %v4709_v19  ;;  %v2483_v22 = vmul.f32 %v4705_v32, %v4705_v32  ;;  %vm2711_vm2 = vmor %vm2709_vm1, %vm2710_vm0  ;;  %vm2719_vm7 = vweird.f32 %v4707_v23 }
 0x2b4   : > { %v2702_v52 = vsel %vm2701_vm12, %v3641_v3, %v2698_v39  ;;  %v2397_v27 = vsub.f32 1.5, %v2396_v34  ;;  %v2705_v13 = vmul.f32 %v3645_v15, %v2704_v36 }
 0x2b5   : > { %v3647_v42 = vpop.eup %3646  ;;  %v2914_v41 = vmul.f32 %v2702_v52, %v4435_v35  ;;  %v2102_v11 = vadd.f32 1e-10, %v2070_v14  ;;  %2543 = vadd.xlane.f32.xlu1 %v2483_v22 }
 0x2b6   : > { %v2398_v60 = vmul.f32 %v3643_v21, %v2397_v27  ;;  %v2706_v61 = vmul.f32 0.5, %v2705_v13  ;;  %v2404_v43 = vmul.f32 %v3647_v42, %v4698_v40  ;;  %vm2410_vm3 = vweird.f32 %v3647_v42 }
 0x2b7   : > { %2946 = vst [vmem:[%s4501_s10 + $0x58] sm:$0xff] %v2914_v41  ;;  %3650 = vrsqrt.f32 %v2102_v11  ;;  %vm2411_vm5 = vmor %vm2409_vm4, %vm2410_vm3  ;;  %vm2419_vm10 = vweird.f32 %v2102_v11 }
 0x2b8   : > { %v2402_v29 = vsel %vm2401_vm15, %v3643_v21, %v2398_v60  ;;  %v2707_v1 = vsub.f32 1.5, %v2706_v61  ;;  %v2405_v63 = vmul.f32 %v3647_v42, %v2404_v43  ;;  %v2516_v45 = vpop.xlane.xlu2 %2515 }
 0x2b9   : > { %v3649_v3 = vpop.eup %3648  ;;  %v4722_v59 = vmul.f32 %v2402_v29, %v4669_v44  ;;  %v2565_v35 = vmax.f32 %v2516_v45, 1e-24 }
 0x2ba   : > { %v2708_v5 = vmul.f32 %v3645_v15, %v2707_v1  ;;  %v2406_v12 = vmul.f32 0.5, %v2405_v63  ;;  %v2714_v48 = vmul.f32 %v3649_v3, %v4707_v23  ;;  %vm2720_vm6 = vweird.f32 %v3649_v3 }
 0x2bb   : > { %3652 = vrsqrt.f32 %v2565_v35  ;;  %v2484_v17 = vmul.f32 %v4722_v59, %v4722_v59  ;;  %vm2721_vm8 = vmor %vm2719_vm7, %vm2720_vm6  ;;  %vm2729_vm13 = vweird.f32 %v2565_v35 }
 0x2bc   : > { %v2712_v10 = vsel %vm2711_vm2, %v3645_v15, %v2708_v5  ;;  %v2407_v58 = vsub.f32 1.5, %v2406_v12  ;;  %v2715_v2 = vmul.f32 %v3649_v3, %v2714_v48 }
 0x2bd   : > { %v3651_v51 = vpop.eup %3650  ;;  %v2915_v44 = vmul.f32 %v2712_v10, %v4440_v9  ;;  %2545 = vadd.xlane.f32.xlu2 %v2484_v17 }
 0x2be   : > { %v2408_v21 = vmul.f32 %v3647_v42, %v2407_v58  ;;  %v2716_v24 = vmul.f32 0.5, %v2715_v2  ;;  %v2414_v31 = vmul.f32 %v3651_v51, %v2102_v11  ;;  %vm2420_vm9 = vweird.f32 %v3651_v51 }
 0x2bf   : > { %2947 = vst [vmem:[%s4501_s10 + $0x60] sm:$0xff] %v2915_v44  ;;  %vm2421_vm11 = vmor %vm2419_vm10, %vm2420_vm9 }
 0x2c0   : > { %v2412_v55 = vsel %vm2411_vm5, %v3647_v42, %v2408_v21  ;;  %v2717_v26 = vsub.f32 1.5, %v2716_v24  ;;  %v2415_v50 = vmul.f32 %v3651_v51, %v2414_v31  ;;  %v2518_v49 = vpop.xlane.xlu0 %2517 }
 0x2c1   : > { %v3653_v38 = vpop.eup %3652  ;;  %v4732_v8 = vmul.f32 %v2412_v55, %v4689_v7  ;;  %v2566_v37 = vmax.f32 %v2518_v49, 1e-24 }
 0x2c2   : > { %v2718_v16 = vmul.f32 %v3649_v3, %v2717_v26  ;;  %v2416_v9 = vmul.f32 0.5, %v2415_v50  ;;  %v2724_v40 = vmul.f32 %v3653_v38, %v2565_v35  ;;  %vm2730_vm12 = vweird.f32 %v3653_v38 }
 0x2c3   : > { %3654 = vrsqrt.f32 %v2566_v37  ;;  %v2485_v18 = vmul.f32 %v4732_v8, %v4732_v8  ;;  %vm2731_vm14 = vmor %vm2729_vm13, %vm2730_vm12  ;;  %vm2739_vm0 = vweird.f32 %v2566_v37 }
 0x2c4   : > { %v2722_v15 = vsel %vm2721_vm8, %v3649_v3, %v2718_v16  ;;  %v2417_v39 = vsub.f32 1.5, %v2416_v9  ;;  %v2725_v34 = vmul.f32 %v3653_v38, %v2724_v40 }
 0x2c5   : > { %v2916_v36 = vmul.f32 %v2722_v15, %v4445_v30  ;;  %2547 = vadd.xlane.f32.xlu0 %v2485_v18 }
 0x2c6   : > { %v2418_v7 = vmul.f32 %v3651_v51, %v2417_v39  ;;  %v2726_v14 = vmul.f32 0.5, %v2725_v34 }
 0x2c7   : > { %2948 = vst [vmem:[%s4501_s10 + $0x68] sm:$0xff] %v2916_v36 }
 0x2c8   : > { %v2422_v23 = vsel %vm2421_vm11, %v3651_v51, %v2418_v7  ;;  %v2727_v22 = vsub.f32 1.5, %v2726_v14  ;;  %v2520_v52 = vpop.xlane.xlu1 %2519 }
 0x2c9   : > { %v3655_v27 = vpop.eup %3654  ;;  %v4740_v13 = vmul.f32 %v2422_v23, %v4709_v19  ;;  %v2567_v42 = vmax.f32 %v2520_v52, 1e-24 }
 0x2ca   : > { %v2728_v41 = vmul.f32 %v3653_v38, %v2727_v22  ;;  %v2734_v60 = vmul.f32 %v3655_v27, %v2566_v37  ;;  %vm2740_vm15 = vweird.f32 %v3655_v27 }
 0x2cb   : > { %3656 = vrsqrt.f32 %v2567_v42  ;;  %v2486_v30 = vmul.f32 %v4740_v13, %v4740_v13  ;;  %vm2741_vm1 = vmor %vm2739_vm0, %vm2740_vm15  ;;  %vm2749_vm3 = vweird.f32 %v2567_v42 }
 0x2cc   : > { %v2732_v11 = vsel %vm2731_vm14, %v3653_v38, %v2728_v41  ;;  %v2735_v61 = vmul.f32 %v3655_v27, %v2734_v60 }
 0x2cd   : > { %v2917_v43 = vmul.f32 %v2732_v11, %v4449_v0  ;;  %2549 = vadd.xlane.f32.xlu1 %v2486_v30 }
 0x2ce   : > { %v2736_v29 = vmul.f32 0.5, %v2735_v61 }
 0x2cf   : > { %2949 = vst [vmem:[%s4501_s10 + $0x70] sm:$0xff] %v2917_v43 }
 0x2d0   : > { %v2737_v1 = vsub.f32 1.5, %v2736_v29  ;;  %v2522_v19 = vpop.xlane.xlu2 %2521 }
 0x2d1   : > { %v3657_v63 = vpop.eup %3656  ;;  %v2568_v45 = vmax.f32 %v2522_v19, 1e-24 }
 0x2d2   : > { %v2738_v3 = vmul.f32 %v3655_v27, %v2737_v1  ;;  %v2744_v35 = vmul.f32 %v3657_v63, %v2567_v42  ;;  %vm2750_vm2 = vweird.f32 %v3657_v63 }
 0x2d3   : > { %3658 = vrsqrt.f32 %v2568_v45  ;;  %vm2751_vm4 = vmor %vm2749_vm3, %vm2750_vm2  ;;  %vm2759_vm6 = vweird.f32 %v2568_v45 }
 0x2d4   : > { %v2742_v5 = vsel %vm2741_vm1, %v3655_v27, %v2738_v3  ;;  %v2745_v12 = vmul.f32 %v3657_v63, %v2744_v35 }
 0x2d5   : > { %v2918_v48 = vmul.f32 %v2742_v5, %v4456_v46 }
 0x2d6   : > { %v2746_v17 = vmul.f32 0.5, %v2745_v12 }
 0x2d7   : > { %2950 = vst [vmem:[%s4501_s10 + $0x78] sm:$0xff] %v2918_v48 }
 0x2d8   : > { %v2747_v0 = vsub.f32 1.5, %v2746_v17  ;;  %v2524_v10 = vpop.xlane.xlu0 %2523 }
 0x2d9   : > { %v3659_v58 = vpop.eup %3658  ;;  %v2569_v2 = vmax.f32 %v2524_v10, 1e-24 }
 0x2da   : > { %v2748_v51 = vmul.f32 %v3657_v63, %v2747_v0  ;;  %v2754_v44 = vmul.f32 %v3659_v58, %v2568_v45  ;;  %vm2760_vm5 = vweird.f32 %v3659_v58 }
 0x2db   : > { %3660 = vrsqrt.f32 %v2569_v2  ;;  %vm2761_vm7 = vmor %vm2759_vm6, %vm2760_vm5  ;;  %vm2769_vm9 = vweird.f32 %v2569_v2 }
 0x2dc   : > { %v2752_v21 = vsel %vm2751_vm4, %v3657_v63, %v2748_v51  ;;  %v2755_v24 = vmul.f32 %v3659_v58, %v2754_v44 }
 0x2dd   : > { %v2919_v31 = vmul.f32 %v2752_v21, %v4466_v20 }
 0x2de   : > { %v2756_v55 = vmul.f32 0.5, %v2755_v24 }
 0x2df   : > { %2951 = vst [vmem:[%s4501_s10 + $0x80] sm:$0xff] %v2919_v31 }
 0x2e0   : > { %v2757_v46 = vsub.f32 1.5, %v2756_v55  ;;  %v2526_v26 = vpop.xlane.xlu1 %2525 }
 0x2e1   : > { %v3661_v50 = vpop.eup %3660  ;;  %v2570_v49 = vmax.f32 %v2526_v26, 1e-24 }
 0x2e2   : > { %v2758_v38 = vmul.f32 %v3659_v58, %v2757_v46  ;;  %v2764_v37 = vmul.f32 %v3661_v50, %v2569_v2  ;;  %vm2770_vm8 = vweird.f32 %v3661_v50 }
 0x2e3   : > { %3662 = vrsqrt.f32 %v2570_v49  ;;  %vm2771_vm10 = vmor %vm2769_vm9, %vm2770_vm8  ;;  %vm2779_vm12 = vweird.f32 %v2570_v49 }
 0x2e4   : > { %v2762_v16 = vsel %vm2761_vm7, %v3659_v58, %v2758_v38  ;;  %v2765_v9 = vmul.f32 %v3661_v50, %v2764_v37 }
 0x2e5   : > { %v2920_v40 = vmul.f32 %v2762_v16, %v4482_v28 }
 0x2e6   : > { %v2766_v18 = vmul.f32 0.5, %v2765_v9 }
 0x2e7   : > { %2952 = vst [vmem:[%s4501_s10 + $0x88] sm:$0xff] %v2920_v40 }
 0x2e8   : > { %v2767_v20 = vsub.f32 1.5, %v2766_v18  ;;  %v2528_v15 = vpop.xlane.xlu2 %2527 }
 0x2e9   : > { %v3663_v39 = vpop.eup %3662  ;;  %v2571_v34 = vmax.f32 %v2528_v15, 1e-24 }
 0x2ea   : > { %v2768_v36 = vmul.f32 %v3661_v50, %v2767_v20  ;;  %v2774_v7 = vmul.f32 %v3663_v39, %v2570_v49  ;;  %vm2780_vm11 = vweird.f32 %v3663_v39 }
 0x2eb   : > { %3664 = vrsqrt.f32 %v2571_v34  ;;  %vm2781_vm13 = vmor %vm2779_vm12, %vm2780_vm11  ;;  %vm2789_vm15 = vweird.f32 %v2571_v34 }
 0x2ec   : > { %v2772_v14 = vsel %vm2771_vm10, %v3661_v50, %v2768_v36  ;;  %v2775_v23 = vmul.f32 %v3663_v39, %v2774_v7 }
 0x2ed   : > { %v2921_v22 = vmul.f32 %v2772_v14, %v4505_v47 }
 0x2ee   : > { %v2776_v52 = vmul.f32 0.5, %v2775_v23 }
 0x2ef   : > { %2953 = vst [vmem:[%s4501_s10 + $0x90] sm:$0xff] %v2921_v22 }
 0x2f0   : > { %v2777_v28 = vsub.f32 1.5, %v2776_v52  ;;  %v2530_v27 = vpop.xlane.xlu0 %2529 }
 0x2f1   : > { %v3665_v42 = vpop.eup %3664  ;;  %v2572_v41 = vmax.f32 %v2530_v27, 1e-24 }
 0x2f2   : > { %v2778_v60 = vmul.f32 %v3663_v39, %v2777_v28  ;;  %v2784_v30 = vmul.f32 %v3665_v42, %v2571_v34  ;;  %vm2790_vm14 = vweird.f32 %v3665_v42 }
 0x2f3   : > { %3666 = vrsqrt.f32 %v2572_v41  ;;  %vm2791_vm0 = vmor %vm2789_vm15, %vm2790_vm14  ;;  %vm2799_vm2 = vweird.f32 %v2572_v41 }
 0x2f4   : > { %v2782_v11 = vsel %vm2781_vm13, %v3663_v39, %v2778_v60  ;;  %v2785_v61 = vmul.f32 %v3665_v42, %v2784_v30 }
 0x2f5   : > { %v2922_v43 = vmul.f32 %v2782_v11, %v4525_v54 }
 0x2f6   : > { %v2786_v29 = vmul.f32 0.5, %v2785_v61 }
 0x2f7   : > { %2954 = vst [vmem:[%s4501_s10 + $0x98] sm:$0xff] %v2922_v43 }
 0x2f8   : > { %v2787_v47 = vsub.f32 1.5, %v2786_v29  ;;  %v2532_v1 = vpop.xlane.xlu1 %2531 }
 0x2f9   : > { %v3667_v19 = vpop.eup %3666  ;;  %v2573_v63 = vmax.f32 %v2532_v1, 1e-24 }
 0x2fa   : > { %v2788_v45 = vmul.f32 %v3665_v42, %v2787_v47  ;;  %v2794_v3 = vmul.f32 %v3667_v19, %v2572_v41  ;;  %vm2800_vm1 = vweird.f32 %v3667_v19 }
 0x2fb   : > { %3668 = vrsqrt.f32 %v2573_v63  ;;  %vm2801_vm3 = vmor %vm2799_vm2, %vm2800_vm1  ;;  %vm2809_vm5 = vweird.f32 %v2573_v63 }
 0x2fc   : > { %v2792_v35 = vsel %vm2791_vm0, %v3665_v42, %v2788_v45  ;;  %v2795_v5 = vmul.f32 %v3667_v19, %v2794_v3 }
 0x2fd   : > { %v2923_v12 = vmul.f32 %v2792_v35, %v4545_v62 }
 0x2fe   : > { %v2796_v48 = vmul.f32 0.5, %v2795_v5 }
 0x2ff   : > { %2955 = vst [vmem:[%s4501_s10 + $0xa0] sm:$0xff] %v2923_v12 }
 0x300   : > { %v2797_v54 = vsub.f32 1.5, %v2796_v48  ;;  %v2534_v17 = vpop.xlane.xlu2 %2533 }
 0x301   : > { %v3669_v0 = vpop.eup %3668  ;;  %v2574_v10 = vmax.f32 %v2534_v17, 1e-24 }
 0x302   : > { %v2798_v58 = vmul.f32 %v3667_v19, %v2797_v54  ;;  %v2804_v2 = vmul.f32 %v3669_v0, %v2573_v63  ;;  %vm2810_vm4 = vweird.f32 %v3669_v0 }
 0x303   : > { %3670 = vrsqrt.f32 %v2574_v10  ;;  %vm2811_vm6 = vmor %vm2809_vm5, %vm2810_vm4  ;;  %vm2819_vm8 = vweird.f32 %v2574_v10 }
 0x304   : > { %v2802_v51 = vsel %vm2801_vm3, %v3667_v19, %v2798_v58  ;;  %v2805_v44 = vmul.f32 %v3669_v0, %v2804_v2 }
 0x305   : > { %v2924_v21 = vmul.f32 %v2802_v51, %v4565_v53 }
 0x306   : > { %v2806_v24 = vmul.f32 0.5, %v2805_v44 }
 0x307   : > { %2956 = vst [vmem:[%s4501_s10 + $0xa8] sm:$0xff] %v2924_v21 }
 0x308   : > { %v2807_v62 = vsub.f32 1.5, %v2806_v24  ;;  %v2536_v31 = vpop.xlane.xlu0 %2535 }
 0x309   : > { %v3671_v55 = vpop.eup %3670  ;;  %v2575_v46 = vmax.f32 %v2536_v31, 1e-24 }
 0x30a   : > { %v2808_v26 = vmul.f32 %v3669_v0, %v2807_v62  ;;  %v2814_v50 = vmul.f32 %v3671_v55, %v2574_v10  ;;  %vm2820_vm7 = vweird.f32 %v3671_v55 }
 0x30b   : > { %3672 = vrsqrt.f32 %v2575_v46  ;;  %vm2821_vm9 = vmor %vm2819_vm8, %vm2820_vm7  ;;  %vm2829_vm11 = vweird.f32 %v2575_v46 }
 0x30c   : > { %v2812_v49 = vsel %vm2811_vm6, %v3669_v0, %v2808_v26  ;;  %v2815_v38 = vmul.f32 %v3671_v55, %v2814_v50 }
 0x30d   : > { %v2925_v37 = vmul.f32 %v2812_v49, %v4585_v33 }
 0x30e   : > { %v2816_v16 = vmul.f32 0.5, %v2815_v38 }
 0x30f   : > { %2957 = vst [vmem:[%s4501_s10 + $0xb0] sm:$0xff] %v2925_v37 }
 0x310   : > { %v2817_v53 = vsub.f32 1.5, %v2816_v16  ;;  %v2538_v9 = vpop.xlane.xlu1 %2537 }
 0x311   : > { %v3673_v40 = vpop.eup %3672  ;;  %v2576_v18 = vmax.f32 %v2538_v9, 1e-24 }
 0x312   : > { %v2818_v20 = vmul.f32 %v3671_v55, %v2817_v53  ;;  %v2824_v15 = vmul.f32 %v3673_v40, %v2575_v46  ;;  %vm2830_vm10 = vweird.f32 %v3673_v40 }
 0x313   : > { %3674 = vrsqrt.f32 %v2576_v18  ;;  %vm2831_vm12 = vmor %vm2829_vm11, %vm2830_vm10  ;;  %vm2839_vm14 = vweird.f32 %v2576_v18 }
 0x314   : > { %v2822_v39 = vsel %vm2821_vm9, %v3671_v55, %v2818_v20  ;;  %v2825_v34 = vmul.f32 %v3673_v40, %v2824_v15 }
 0x315   : > { %v2926_v36 = vmul.f32 %v2822_v39, %v4605_v56 }
 0x316   : > { %v2826_v7 = vmul.f32 0.5, %v2825_v34 }
 0x317   : > { %2958 = vst [vmem:[%s4501_s10 + $0xb8] sm:$0xff] %v2926_v36 }
 0x318   : > { %v2827_v33 = vsub.f32 1.5, %v2826_v7  ;;  %v2540_v14 = vpop.xlane.xlu2 %2539 }
 0x319   : > { %v3675_v23 = vpop.eup %3674  ;;  %v2577_v22 = vmax.f32 %v2540_v14, 1e-24 }
 0x31a   : > { %v2828_v52 = vmul.f32 %v3673_v40, %v2827_v33  ;;  %v2834_v28 = vmul.f32 %v3675_v23, %v2576_v18  ;;  %vm2840_vm13 = vweird.f32 %v3675_v23 }
 0x31b   : > { %3676 = vrsqrt.f32 %v2577_v22  ;;  %vm2841_vm15 = vmor %vm2839_vm14, %vm2840_vm13  ;;  %vm2849_vm1 = vweird.f32 %v2577_v22 }
 0x31c   : > { %v2832_v27 = vsel %vm2831_vm12, %v3673_v40, %v2828_v52  ;;  %v2835_v42 = vmul.f32 %v3675_v23, %v2834_v28 }
 0x31d   : > { %v2927_v41 = vmul.f32 %v2832_v27, %v4625_v6 }
 0x31e   : > { %v2836_v60 = vmul.f32 0.5, %v2835_v42 }
 0x31f   : > { %2959 = vst [vmem:[%s4501_s10 + $0xc0] sm:$0xff] %v2927_v41 }
 0x320   : > { %v2837_v56 = vsub.f32 1.5, %v2836_v60  ;;  %v2542_v30 = vpop.xlane.xlu0 %2541 }
 0x321   : > { %v3677_v11 = vpop.eup %3676  ;;  %v2578_v61 = vmax.f32 %v2542_v30, 1e-24 }
 0x322   : > { %v2838_v43 = vmul.f32 %v3675_v23, %v2837_v56  ;;  %v2844_v29 = vmul.f32 %v3677_v11, %v2577_v22  ;;  %vm2850_vm0 = vweird.f32 %v3677_v11 }
 0x323   : > { %3678 = vrsqrt.f32 %v2578_v61  ;;  %vm2851_vm2 = vmor %vm2849_vm1, %vm2850_vm0  ;;  %vm2859_vm4 = vweird.f32 %v2578_v61 }
 0x324   : > { %v2842_v47 = vsel %vm2841_vm15, %v3675_v23, %v2838_v43  ;;  %v2845_v1 = vmul.f32 %v3677_v11, %v2844_v29 }
 0x325   : > { %v2928_v19 = vmul.f32 %v2842_v47, %v4645_v4 }
 0x326   : > { %v2846_v63 = vmul.f32 0.5, %v2845_v1 }
 0x327   : > { %2960 = vst [vmem:[%s4501_s10 + $0xc8] sm:$0xff] %v2928_v19 }
 0x328   : > { %v2847_v6 = vsub.f32 1.5, %v2846_v63  ;;  %v2544_v45 = vpop.xlane.xlu1 %2543 }
 0x329   : > { %v3679_v3 = vpop.eup %3678  ;;  %v2579_v35 = vmax.f32 %v2544_v45, 1e-24 }
 0x32a   : > { %v2848_v5 = vmul.f32 %v3677_v11, %v2847_v6  ;;  %v2854_v12 = vmul.f32 %v3679_v3, %v2578_v61  ;;  %vm2860_vm3 = vweird.f32 %v3679_v3 }
 0x32b   : > { %3680 = vrsqrt.f32 %v2579_v35  ;;  %vm2861_vm5 = vmor %vm2859_vm4, %vm2860_vm3  ;;  %vm2869_vm7 = vweird.f32 %v2579_v35 }
 0x32c   : > { %v2852_v48 = vsel %vm2851_vm2, %v3677_v11, %v2848_v5  ;;  %v2855_v54 = vmul.f32 %v3679_v3, %v2854_v12 }
 0x32d   : > { %v2929_v17 = vmul.f32 %v2852_v48, %v4665_v25 }
 0x32e   : > { %v2856_v0 = vmul.f32 0.5, %v2855_v54 }
 0x32f   : > { %2961 = vst [vmem:[%s4501_s10 + $0xd0] sm:$0xff] %v2929_v17 }
 0x330   : > { %v2857_v4 = vsub.f32 1.5, %v2856_v0  ;;  %v2546_v10 = vpop.xlane.xlu2 %2545 }
 0x331   : > { %v3681_v58 = vpop.eup %3680  ;;  %v2580_v2 = vmax.f32 %v2546_v10, 1e-24 }
 0x332   : > { %v2858_v51 = vmul.f32 %v3679_v3, %v2857_v4  ;;  %v2864_v44 = vmul.f32 %v3681_v58, %v2579_v35  ;;  %vm2870_vm6 = vweird.f32 %v3681_v58 }
 0x333   : > { %3682 = vrsqrt.f32 %v2580_v2  ;;  %vm2871_vm8 = vmor %vm2869_vm7, %vm2870_vm6  ;;  %vm2879_vm10 = vweird.f32 %v2580_v2 }
 0x334   : > { %v2862_v21 = vsel %vm2861_vm5, %v3679_v3, %v2858_v51  ;;  %v2865_v24 = vmul.f32 %v3681_v58, %v2864_v44 }
 0x335   : > { %v2930_v62 = vmul.f32 %v2862_v21, %v4685_v57 }
 0x336   : > { %v2866_v31 = vmul.f32 0.5, %v2865_v24 }
 0x337   : > { %2962 = vst [vmem:[%s4501_s10 + $0xd8] sm:$0xff] %v2930_v62 }
 0x338   : > { %v2867_v25 = vsub.f32 1.5, %v2866_v31  ;;  %v2548_v55 = vpop.xlane.xlu0 %2547 }
 0x339   : > { %v3683_v46 = vpop.eup %3682  ;;  %v2581_v26 = vmax.f32 %v2548_v55, 1e-24 }
 0x33a   : > { %v2868_v50 = vmul.f32 %v3681_v58, %v2867_v25  ;;  %v2874_v49 = vmul.f32 %v3683_v46, %v2580_v2  ;;  %vm2880_vm9 = vweird.f32 %v3683_v46 }
 0x33b   : > { %3684 = vrsqrt.f32 %v2581_v26  ;;  %vm2881_vm11 = vmor %vm2879_vm10, %vm2880_vm9  ;;  %vm2889_vm13 = vweird.f32 %v2581_v26 }
 0x33c   : > { %v2872_v38 = vsel %vm2871_vm8, %v3681_v58, %v2868_v50  ;;  %v2875_v37 = vmul.f32 %v3683_v46, %v2874_v49 }
 0x33d   : > { %v2931_v16 = vmul.f32 %v2872_v38, %v4705_v32 }
 0x33e   : > { %v2876_v53 = vmul.f32 0.5, %v2875_v37 }
 0x33f   : > { %2963 = vst [vmem:[%s4501_s10 + $0xe0] sm:$0xff] %v2931_v16 }
 0x340   : > { %v2877_v57 = vsub.f32 1.5, %v2876_v53  ;;  %v2550_v9 = vpop.xlane.xlu1 %2549 }
 0x341   : > { %v3685_v40 = vpop.eup %3684  ;;  %v2582_v18 = vmax.f32 %v2550_v9, 1e-24 }
 0x342   : > { %v2878_v20 = vmul.f32 %v3683_v46, %v2877_v57  ;;  %v2884_v15 = vmul.f32 %v3685_v40, %v2581_v26  ;;  %vm2890_vm12 = vweird.f32 %v3685_v40 }
 0x343   : > { %3686 = vrsqrt.f32 %v2582_v18  ;;  %vm2891_vm14 = vmor %vm2889_vm13, %vm2890_vm12  ;;  %vm2899_vm0 = vweird.f32 %v2582_v18 }
 0x344   : > { %v2882_v39 = vsel %vm2881_vm11, %v3683_v46, %v2878_v20  ;;  %v2885_v34 = vmul.f32 %v3685_v40, %v2884_v15 }
 0x345   : > { %v2932_v36 = vmul.f32 %v2882_v39, %v4722_v59 }
 0x346   : > { %v2886_v32 = vmul.f32 0.5, %v2885_v34 }
 0x347   : > { %2964 = vst [vmem:[%s4501_s10 + $0xe8] sm:$0xff] %v2932_v36 }
 0x348   : > { %v2887_v7 = vsub.f32 1.5, %v2886_v32 }
 0x349   : > { %v3687_v33 = vpop.eup %3686 }
 0x34a   : > { %v2888_v14 = vmul.f32 %v3685_v40, %v2887_v7  ;;  %v2894_v23 = vmul.f32 %v3687_v33, %v2582_v18  ;;  %vm2900_vm15 = vweird.f32 %v3687_v33 }
 0x34b   : > { %vm2901_vm1 = vmor %vm2899_vm0, %vm2900_vm15 }
 0x34c   : > { %v2892_v22 = vsel %vm2891_vm14, %v3685_v40, %v2888_v14  ;;  %v2895_v52 = vmul.f32 %v3687_v33, %v2894_v23 }
 0x34d   : > { %v2933_v28 = vmul.f32 %v2892_v22, %v4732_v8 }
 0x34e   : > { %v2896_v27 = vmul.f32 0.5, %v2895_v52 }
 0x34f   : > { %2965 = vst [vmem:[%s4501_s10 + $0xf0] sm:$0xff] %v2933_v28 }
 0x350   : > { %v2897_v59 = vsub.f32 1.5, %v2896_v27 }
 0x352   : > { %v2898_v42 = vmul.f32 %v3687_v33, %v2897_v59 }
 0x354   : > { %v2902_v41 = vsel %vm2901_vm1, %v3687_v33, %v2898_v42 }
 0x355   : > { %v2934_v8 = vmul.f32 %v2902_v41, %v4740_v13 }
 0x357   : > { %2966 = vst [vmem:[%s4501_s10 + $0xf8] sm:$0xff] %v2934_v8 }
 0x358   : > { %3715 = shalt.err (!%p3712_p5)
}
 0x359   : > { %s3768_s24 = smov 128   ;;  %s3769_s10 = smov 8  }
 0x35a   : > { %3503 = dma.vmem_to_hbm [thread:$0]  (%p3840_p4), %s2981_s15, 4096, %s2983_s16, %s2968_s21, %s3768_s24, %s3768_s24, %s3769_s10  }
 0x35b PF: > { %p3509_p6 = scmp.ge.s32.totalorder %s3766_s23, 2  ;;  %s2997_s11 = sand.u32 1, %s3746_s18  }
 0x35c   : > { %s2998_s12 = scalar_lea.sflag [#allocation5], %s2997_s11 }
 0x35d   : > { %p3506_p7 = pnand %p3509_p6, %p3847_p8 }
 0x35f   : > { %p3507_p9 = pneg %p3506_p7 }
 0x361   : > { %3741 = dma.done.wait (%p3507_p9), %s2998_s12, 4096  }
 0x362   : > { %3743 = vsyncadd (%p3507_p9), %s2998_s12, 4294963200  ;;  %s18_s23 = sadd.s32 1, %s3766_s23   ;;  %s4827_s18 = smov %s3750_s19 }
 0x363   : > { %p15_p10 = scmp.ge.s32.totalorder %s18_s23, 4   ;;  %s4828_s19 = smov %s3754_s20 }
 0x364   : > { %s4829_s20 = smov %s3853_s6  ;;  %s4830_s21 = smov %s3762_s22 }
 0x365   : > { %s4831_s22 = smov %s4833_s26  ;;  %17 = sbr.rel (!%p15_p10) target bundleno = 4 (0x4), region = 95 }
 0x36a   :  { %3004 = vsyncpa [#allocation5], 1 }
 0x36b   :  { %3006 = vsyncpa [#allocation5 + $0x1], 1 }

// kernel: tpu_custom_call.1
= control target key start
LH: loop header
LB: loop body
LE: loop exit
PB: predicated region body
PF: predicated region fallthrough
CT: control target
= control target key end

     0   :  { %10 = vsyncpa [#allocation5], 0  ;;  %s4819_s0 = inlined_call_operand.vmem [shape: f32[512,4], index: 0, kind: input, shape index: {}]   ;;  %s4820_s1 = inlined_call_operand.vmem [shape: f32[512,4], index: 1, kind: input, shape index: {}]   ;;  %s4821_s2 = inlined_call_operand.vmem [shape: f32[4,256], index: 2, kind: input, shape index: {}]   ;;  %s4822_s3 = inlined_call_operand.vmem [shape: f32[4,256], index: 3, kind: input, shape index: {}]   ;;  %s4823_s4 = inlined_call_operand.vmem [shape: bf16[256,128], index: 4, kind: input, shape index: {}]   ;;  %s4824_s5 = inlined_call_operand.hbm [shape: f32[512,128], index: 5, kind: output, shape index: {}]  }
   0x1   :  { %12 = vsyncpa [#allocation5 + $0x1], 0  ;;  %s3800_s18 = smov 0   ;;  %s3802_s19 = smov 0  }
   0x2   :  { %s3804_s20 = smov 0   ;;  %s3806_s21 = smov 0  }
   0x3   :  { %s3808_s22 = smov 0   ;;  %s3810_s23 = smov 0  }
   0x4 LB: > { %s3110_s24 = sadd.s32 4294967295, %s3766_s23   ;;  %s3111_s25 = sadd.s32 4294967294, %s3766_s23   ;;  %s3766_s23 = sphi %s3810_s23, %s18_s23   ;;  %s3762_s22 = sphi %s3808_s22, %s4831_s22   ;;  %s3758_s21 = sphi %s3806_s21, %s4830_s21   ;;  %s3754_s20 = sphi %s3804_s20, %s4829_s20   ;;  %s3750_s19 = sphi %s3802_s19, %s4828_s19   ;;  %s3746_s18 = sphi %s3800_s18, %s4827_s18  }
   0x5   : > { %s30_s26 = sadd.s32 1, %s3762_s22  ;;  %s167_s27 = sadd.s32 1, %s3754_s20 }
   0x6   : > { %p32_p0 = scmp.ge.s32.totalorder %s30_s26, 2  ;;  %p177_p1 = scmp.ne.s32.totalorder %s3754_s20, %s3750_s19 }
   0x7   : > { %p178_p2 = scmp.eq.s32.totalorder %s3110_s24, 1  ;;  %p183_p3 = scmp.ne.s32.totalorder %s3750_s19, %s3746_s18 }
   0x8   : > { %s4833_s26 = smov (%p32_p0, %s30_s26), 0  ;;  %p184_p5 = scmp.eq.s32.totalorder %s3111_s25, 1 }
   0x9   : > { %p3840_p4 = por %p178_p2, %p177_p1  ;;  %s164_s29 = ssub.s32 %s3762_s22, %s4833_s26 }
   0xa   : > { %p3117_p6 = scmp.ge.s32.totalorder %s3766_s23, 1  ;;  %p165_p7 = scmp.eq.s32.totalorder %s164_s29, 0 }
   0xb   : > { %p3847_p8 = por %p184_p5, %p183_p3  ;;  %p247_p9 = scmp.lt.s32.totalorder %s3766_s23, 3 }
   0xc   : > { %s3853_s6 = scalar_select %p165_p7, %s3754_s20, %s167_s27  }
   0xd   : > { %p248_p10 = pnand %p3117_p6, %p247_p9 }
   0xe   : > { %s3119_s9 = sshll.u32 (!%p248_p10), %s3758_s21, 5  ;;  %s3500_s11 = sshll.u32 (!%p248_p10), %s3758_s21, 8 }
   0xf   : > { %251 = sbr.rel (%p248_p10) target bundleno = 859 (0x35b), region = 40  ;;  %p296_p11 = scmp.lt.s32.totalorder (!%p248_p10), %s3119_s9, 63 }
  0x10   : > { %s2979_s14 = scalar_lea.hbm (!%p248_p10), %s4824_s5, %s3500_s11  ;;  %s3708_s7 = scalar_lea.hbm (!%p248_p10), %s4824_s5, 512 }
  0x11   : > { %s2982_s16 = sshll.u32 (!%p248_p10), %s2979_s14, 4  ;;  %s2983_s16 = int_to_ptr.hbm [resolvable:$true] %s2982_s16 }
  0x12   : > { %s3702_s17 = sshra.s32 (!%p248_p10), %s2983_s16, 4  ;;  %s3703_s17 = int_to_ptr.hbm [resolvable:$true] %s3702_s17 }
  0x13   : > { %s3704_s25 = scalar_lea.hbm (!%p248_p10), %s3703_s17, 256  ;;  %p3709_p1 = scmp.lt.s32.totalorder (!%p248_p10), %s3703_s17, %s4824_s5 }
  0x14   : > { %v394_v0 = vld [vmem:[%s4821_s2] sm:$0xff]  ;;  %s4835_s9 = smov (!%p296_p11, %s3119_s9), 63  ;;  %vm496_vm0 = vcmask 1043456   ;;  %vm399_vm1 = vcmask 31744   ;;  %v3491_v29 = vld [vmem:[%s4823_s4 + $0x38] sm:$0xff]  ;;  %v3490_v39 = vld [vmem:[%s4823_s4 + $0x30] sm:$0xff]  ;;  %p3705_p12 = scmp.ne.s32.totalorder %s3703_s17, %s3704_s25 }
  0x15   : > { %396 = vst [vmem:[#allocation1] ss:$2 sm:$0xff] %v394_v0  ;;  %s3120_s10 = sshll.u32 %s4835_s9, 3  ;;  %v759_v1 = vld [vmem:[%s4822_s3] sm:$0xff]  ;;  %v3499_v30 = vld [vmem:[%s4823_s4 + $0x78] sm:$0xff]  ;;  %v3498_v40 = vld [vmem:[%s4823_s4 + $0x70] sm:$0xff]  ;;  %p3710_p2 = scmp.lt.s32.totalorder %s3708_s7, %s3704_s25 }
  0x16   : > { %s3870_s15 = scalar_lea.vmem %s4819_s0, %s3120_s10  ;;  %s3940_s24 = scalar_lea.vmem %s4820_s1, %s3120_s10  ;;  %v3489_v49 = vld [vmem:[%s4823_s4 + $0x28] sm:$0xff]  ;;  %v3488_v59 = vld [vmem:[%s4823_s4 + $0x20] sm:$0xff] }
  0x17   : > { %v378_v2 = vld [vmem:[%s3870_s15 + $0x80] sm:$0xff]  ;;  %v379_v5 = vld [vmem:[%s3870_s15 + $0x88] sm:$0xff]  ;;  %v380_v8 = vld [vmem:[%s3870_s15 + $0x90] sm:$0xff]  ;;  %p3706_p13 = pnand %p3705_p12, %p3840_p4  ;;  %p3711_p3 = por %p3710_p2, %p3709_p1 }
  0x18   : > { %v381_v9 = vld [vmem:[%s3870_s15 + $0x98] sm:$0xff]  ;;  %v382_v10 = vld [vmem:[%s3870_s15 + $0xa0] sm:$0xff]  ;;  %v383_v11 = vld [vmem:[%s3870_s15 + $0xa8] sm:$0xff] }
  0x19   : > { %v384_v12 = vld [vmem:[%s3870_s15 + $0xb0] sm:$0xff]  ;;  %v385_v13 = vld [vmem:[%s3870_s15 + $0xb8] sm:$0xff]  ;;  %v386_v14 = vld [vmem:[%s3870_s15 + $0xc0] sm:$0xff]  ;;  %p3707_p0 = pneg %p3706_p13 }
  0x1a   : > { %v387_v15 = vld [vmem:[%s3870_s15 + $0xc8] sm:$0xff]  ;;  %v388_v16 = vld [vmem:[%s3870_s15 + $0xd0] sm:$0xff]  ;;  %v389_v17 = vld [vmem:[%s3870_s15 + $0xd8] sm:$0xff] }
  0x1b   : > { %v390_v18 = vld [vmem:[%s3870_s15 + $0xe0] sm:$0xff]  ;;  %v391_v20 = vld [vmem:[%s3870_s15 + $0xe8] sm:$0xff]  ;;  %v392_v22 = vld [vmem:[%s3870_s15 + $0xf0] sm:$0xff]  ;;  %p3712_p5 = pnand %p3711_p3, %p3707_p0 }
  0x1c   : > { %v397_v3 = vld.sshfl [vmem:[#allocation1] sm:$0xff pattern:$0x75316420]  ;;  %v398_v4 = vld.sshfl [vmem:[#allocation1 + $0x8] sm:$0xff pattern:$0x75316420] }
  0x1d   : > { %3501 = vmatpush.msk.msra.mxu2 %vm496_vm0, %v397_v3  ;;  %3502 = vmatpush.msk.msra.mxu3 %vm496_vm0, %v398_v4  ;;  %761 = vst [vmem:[#allocation1] ss:$2 sm:$0xff] %v759_v1  ;;  %v362_v19 = vld [vmem:[%s3870_s15] sm:$0xff]  ;;  %v363_v21 = vld [vmem:[%s3870_s15 + $0x8] sm:$0xff]  ;;  %v364_v23 = vld [vmem:[%s3870_s15 + $0x10] sm:$0xff] }
  0x1e   : > { %3140 = vmatmul.msk.f32.vlgmr.msra.gmra.mxu2 %vm399_vm1, %v378_v2  ;;  %3173 = vmatmul.msk.f32.vlgmr.msra.gmra.mxu3 %vm399_vm1, %v378_v2  ;;  %v393_v24 = vld [vmem:[%s3870_s15 + $0xf8] sm:$0xff]  ;;  %v727_v26 = vld [vmem:[%s3940_s24] sm:$0xff]  ;;  %v728_v32 = vld [vmem:[%s3940_s24 + $0x8] sm:$0xff] }
  0x1f   : > { %3123 = vmatpush.msk.msra.mxu0 %vm496_vm0, %v397_v3  ;;  %3156 = vmatpush.msk.msra.mxu1 %vm496_vm0, %v398_v4  ;;  %v365_v25 = vld [vmem:[%s3870_s15 + $0x18] sm:$0xff]  ;;  %v366_v31 = vld [vmem:[%s3870_s15 + $0x20] sm:$0xff]  ;;  %v367_v35 = vld [vmem:[%s3870_s15 + $0x28] sm:$0xff] }
  0x20   : > { %3124 = vmatmul.msk.f32.vlgmr.msra.gmra.mxu0 %vm399_vm1, %v362_v19  ;;  %3157 = vmatmul.msk.f32.vlgmr.msra.gmra.mxu1 %vm399_vm1, %v362_v19  ;;  %v729_v36 = vld [vmem:[%s3940_s24 + $0x10] sm:$0xff]  ;;  %v730_v42 = vld [vmem:[%s3940_s24 + $0x18] sm:$0xff]  ;;  %v731_v46 = vld [vmem:[%s3940_s24 + $0x20] sm:$0xff] }
  0x21   : > { %1762 = vmatpush.bf16.msrb.mxu0 %v3491_v29  ;;  %1851 = vmatpush.bf16.msrb.mxu1 %v3499_v30  ;;  %v368_v41 = vld [vmem:[%s3870_s15 + $0x30] sm:$0xff]  ;;  %v369_v45 = vld [vmem:[%s3870_s15 + $0x38] sm:$0xff]  ;;  %v3497_v50 = vld [vmem:[%s4823_s4 + $0x68] sm:$0xff] }
  0x22   : > { %v370_v51 = vld [vmem:[%s3870_s15 + $0x40] sm:$0xff]  ;;  %v732_v52 = vld [vmem:[%s3940_s24 + $0x28] sm:$0xff]  ;;  %v733_v56 = vld [vmem:[%s3940_s24 + $0x30] sm:$0xff] }
  0x23   : > { %v371_v55 = vld [vmem:[%s3870_s15 + $0x48] sm:$0xff]  ;;  %v3496_v60 = vld [vmem:[%s4823_s4 + $0x60] sm:$0xff]  ;;  %v372_v61 = vld [vmem:[%s3870_s15 + $0x50] sm:$0xff] }
  0x24   : > { %v762_v6 = vld.sshfl [vmem:[#allocation1] sm:$0xff pattern:$0x75316420]  ;;  %v763_v7 = vld.sshfl [vmem:[#allocation1 + $0x8] sm:$0xff pattern:$0x75316420] }
  0x25   : > { %3189 = vmatpush.msk.msrb.mxu2 %vm496_vm0, %v762_v6  ;;  %3222 = vmatpush.msk.msrb.mxu3 %vm496_vm0, %v763_v7  ;;  %v734_v62 = vld [vmem:[%s3940_s24 + $0x38] sm:$0xff]  ;;  %v735_v2 = vld [vmem:[%s3940_s24 + $0x40] sm:$0xff]  ;;  %v740_v29 = vld [vmem:[%s3940_s24 + $0x68] sm:$0xff] }
  0x26   : > { %3141 = vmatmul.msk.f32.gmra.mxu2 %vm399_vm1, %v379_v5  ;;  %3174 = vmatmul.msk.f32.gmra.mxu3 %vm399_vm1, %v379_v5  ;;  %v373_v1 = vld [vmem:[%s3870_s15 + $0x58] sm:$0xff]  ;;  %v374_v7 = vld [vmem:[%s3870_s15 + $0x60] sm:$0xff] }
  0x27   : > { %1763 = vmatpush.bf16.msrb.mxu0 %v3490_v39  ;;  %1852 = vmatpush.bf16.msrb.mxu1 %v3498_v40  ;;  %v3487_v5 = vld [vmem:[%s4823_s4 + $0x18] sm:$0xff]  ;;  %v741_v40 = vld [vmem:[%s3940_s24 + $0x70] sm:$0xff] }
  0x28   : > { %3125 = vmatmul.msk.f32.gmra.mxu0 %vm399_vm1, %v363_v21  ;;  %3158 = vmatmul.msk.f32.gmra.mxu1 %vm399_vm1, %v363_v21  ;;  %v3495_v6 = vld [vmem:[%s4823_s4 + $0x58] sm:$0xff] }
  0x29   : > { %v377_v21 = vld [vmem:[%s3870_s15 + $0x78] sm:$0xff] }
  0x2b   : > { %1764 = vmatpush.bf16.msrb.mxu0 %v3489_v49  ;;  %1853 = vmatpush.bf16.msrb.mxu1 %v3497_v50  ;;  %v3484_v50 = vld [vmem:[%s4823_s4] sm:$0xff] }
  0x2e   : > { %3142 = vmatmul.msk.f32.gmra.mxu2 %vm399_vm1, %v380_v8  ;;  %3175 = vmatmul.msk.f32.gmra.mxu3 %vm399_vm1, %v380_v8  ;;  %v736_v8 = vld [vmem:[%s3940_s24 + $0x48] sm:$0xff] }
  0x2f   : > { %1765 = vmatpush.bf16.msrb.mxu0 %v3488_v59  ;;  %1854 = vmatpush.bf16.msrb.mxu1 %v3496_v60 }
  0x30   : > { %3126 = vmatmul.msk.f32.gmra.mxu0 %vm399_vm1, %v364_v23  ;;  %3159 = vmatmul.msk.f32.gmra.mxu1 %vm399_vm1, %v364_v23 }
  0x33   : > { %1766 = vmatpush.bf16.msrb.mxu0 %v3487_v5  ;;  %1855 = vmatpush.bf16.msrb.mxu1 %v3495_v6 }
  0x36   : > { %3143 = vmatmul.msk.f32.gmra.mxu2 %vm399_vm1, %v381_v9  ;;  %3176 = vmatmul.msk.f32.gmra.mxu3 %vm399_vm1, %v381_v9 }
  0x38   : > { %3127 = vmatmul.msk.f32.gmra.mxu0 %vm399_vm1, %v365_v25  ;;  %3160 = vmatmul.msk.f32.gmra.mxu1 %vm399_vm1, %v365_v25 }
  0x3e   : > { %3144 = vmatmul.msk.f32.gmra.mxu2 %vm399_vm1, %v382_v10  ;;  %3177 = vmatmul.msk.f32.gmra.mxu3 %vm399_vm1, %v382_v10 }
  0x40   : > { %3128 = vmatmul.msk.f32.gmra.mxu0 %vm399_vm1, %v366_v31  ;;  %3161 = vmatmul.msk.f32.gmra.mxu1 %vm399_vm1, %v366_v31 }
  0x46   : > { %3145 = vmatmul.msk.f32.gmra.mxu2 %vm399_vm1, %v383_v11  ;;  %3178 = vmatmul.msk.f32.gmra.mxu3 %vm399_vm1, %v383_v11  ;;  %v375_v11 = vld [vmem:[%s3870_s15 + $0x68] sm:$0xff] }
  0x48   : > { %3129 = vmatmul.msk.f32.gmra.mxu0 %vm399_vm1, %v367_v35  ;;  %3162 = vmatmul.msk.f32.gmra.mxu1 %vm399_vm1, %v367_v35  ;;  %v3493_v35 = vld [vmem:[%s4823_s4 + $0x48] sm:$0xff] }
  0x4e   : > { %3146 = vmatmul.msk.f32.gmra.mxu2 %vm399_vm1, %v384_v12  ;;  %3179 = vmatmul.msk.f32.gmra.mxu3 %vm399_vm1, %v384_v12  ;;  %v737_v12 = vld [vmem:[%s3940_s24 + $0x50] sm:$0xff] }
  0x50   : > { %3130 = vmatmul.msk.f32.gmra.mxu0 %vm399_vm1, %v368_v41  ;;  %3163 = vmatmul.msk.f32.gmra.mxu1 %vm399_vm1, %v368_v41 }
  0x56   : > { %3147 = vmatmul.msk.f32.gmra.mxu2 %vm399_vm1, %v385_v13  ;;  %3180 = vmatmul.msk.f32.gmra.mxu3 %vm399_vm1, %v385_v13 }
  0x58   : > { %3131 = vmatmul.msk.f32.gmra.mxu0 %vm399_vm1, %v369_v45  ;;  %3164 = vmatmul.msk.f32.gmra.mxu1 %vm399_vm1, %v369_v45  ;;  %v742_v45 = vld [vmem:[%s3940_s24 + $0x78] sm:$0xff] }
  0x5e   : > { %3148 = vmatmul.msk.f32.gmra.mxu2 %vm399_vm1, %v386_v14  ;;  %3181 = vmatmul.msk.f32.gmra.mxu3 %vm399_vm1, %v386_v14 }
  0x60   : > { %3132 = vmatmul.msk.f32.gmra.mxu0 %vm399_vm1, %v370_v51  ;;  %3165 = vmatmul.msk.f32.gmra.mxu1 %vm399_vm1, %v370_v51  ;;  %v3492_v51 = vld [vmem:[%s4823_s4 + $0x40] sm:$0xff] }
  0x66   : > { %3149 = vmatmul.msk.f32.gmra.mxu2 %vm399_vm1, %v387_v15  ;;  %3182 = vmatmul.msk.f32.gmra.mxu3 %vm399_vm1, %v387_v15  ;;  %v3486_v15 = vld [vmem:[%s4823_s4 + $0x10] sm:$0xff] }
  0x67   : > { %1767 = vmatpush.bf16.msrb.mxu0 %v3486_v15 }
  0x68   : > { %3133 = vmatmul.msk.f32.gmra.mxu0 %vm399_vm1, %v371_v55  ;;  %3166 = vmatmul.msk.f32.gmra.mxu1 %vm399_vm1, %v371_v55 }
  0x6e   : > { %3150 = vmatmul.msk.f32.gmra.mxu2 %vm399_vm1, %v388_v16  ;;  %3183 = vmatmul.msk.f32.gmra.mxu3 %vm399_vm1, %v388_v16  ;;  %v3494_v16 = vld [vmem:[%s4823_s4 + $0x50] sm:$0xff] }
  0x6f   : > { %1856 = vmatpush.bf16.msrb.mxu1 %v3494_v16 }
  0x70   : > { %3134 = vmatmul.msk.f32.gmra.mxu0 %vm399_vm1, %v372_v61  ;;  %3167 = vmatmul.msk.f32.gmra.mxu1 %vm399_vm1, %v372_v61 }
  0x73   : > { %1857 = vmatpush.bf16.msrb.mxu1 %v3493_v35 }
  0x76   : > { %3151 = vmatmul.msk.f32.gmra.mxu2 %vm399_vm1, %v389_v17  ;;  %3184 = vmatmul.msk.f32.gmra.mxu3 %vm399_vm1, %v389_v17  ;;  %v376_v17 = vld [vmem:[%s3870_s15 + $0x70] sm:$0xff] }
  0x77   : > { %1858 = vmatpush.bf16.msrb.mxu1 %v3492_v51 }
  0x78   : > { %3135 = vmatmul.msk.f32.gmra.mxu0 %vm399_vm1, %v373_v1  ;;  %3168 = vmatmul.msk.f32.gmra.mxu1 %vm399_vm1, %v373_v1 }
  0x7e   : > { %3152 = vmatmul.msk.f32.gmra.mxu2 %vm399_vm1, %v390_v18  ;;  %3185 = vmatmul.msk.f32.gmra.mxu3 %vm399_vm1, %v390_v18  ;;  %v738_v18 = vld [vmem:[%s3940_s24 + $0x58] sm:$0xff] }
  0x80   : > { %3136 = vmatmul.msk.f32.gmra.mxu0 %vm399_vm1, %v374_v7  ;;  %3169 = vmatmul.msk.f32.gmra.mxu1 %vm399_vm1, %v374_v7  ;;  %v744_v7 = vld [vmem:[%s3940_s24 + $0x88] sm:$0xff] }
  0x86   : > { %3153 = vmatmul.msk.f32.gmra.mxu2 %vm399_vm1, %v391_v20  ;;  %3186 = vmatmul.msk.f32.gmra.mxu3 %vm399_vm1, %v391_v20 }
  0x88   : > { %3137 = vmatmul.msk.f32.gmra.mxu0 %vm399_vm1, %v375_v11  ;;  %3170 = vmatmul.msk.f32.gmra.mxu1 %vm399_vm1, %v375_v11 }
  0x8e   : > { %3154 = vmatmul.msk.f32.gmra.mxu2 %vm399_vm1, %v392_v22  ;;  %3187 = vmatmul.msk.f32.gmra.mxu3 %vm399_vm1, %v392_v22  ;;  %v739_v22 = vld [vmem:[%s3940_s24 + $0x60] sm:$0xff] }
  0x90   : > { %3138 = vmatmul.msk.f32.gmra.mxu0 %vm399_vm1, %v376_v17  ;;  %3171 = vmatmul.msk.f32.gmra.mxu1 %vm399_vm1, %v376_v17 }
  0x96   : > { %3155 = vmatmul.msk.f32.gmra.mxu2 %vm399_vm1, %v393_v24  ;;  %3188 = vmatmul.msk.f32.gmra.mxu3 %vm399_vm1, %v393_v24 }
  0x98   : > { %3139 = vmatmul.msk.f32.gmra.mxu0 %vm399_vm1, %v377_v21  ;;  %3172 = vmatmul.msk.f32.gmra.mxu1 %vm399_vm1, %v377_v21 }
  0x9d   : > { %v518_v23 = vpop.f32.mrf.mxu0  ;;  %v631_v24 = vpop.f32.mrf.mxu1 }
  0x9e   : > { %3190 = vmatmul.msk.f32.vlgmr.msrb.gmra.mxu2 %vm399_vm1, %v727_v26  ;;  %3223 = vmatmul.msk.f32.vlgmr.msrb.gmra.mxu3 %vm399_vm1, %v727_v26 }
  0xa1   : > { %v3948_v27 = vpop.f32.mrf.mxu2  ;;  %v3950_v28 = vpop.f32.mrf.mxu3 }
  0xa5   : > { %v634_v39 = vpop.f32.mrf.mxu1 }
  0xa6   : > { %3191 = vmatmul.msk.f32.gmra.mxu2 %vm399_vm1, %v728_v32  ;;  %3224 = vmatmul.msk.f32.gmra.mxu3 %vm399_vm1, %v728_v32  ;;  %v3485_v32 = vld [vmem:[%s4823_s4 + $0x8] sm:$0xff] }
  0xa7   : > { %1768 = vmatpush.bf16.msrb.mxu0 %v3485_v32  ;;  %v745_v32 = vld [vmem:[%s3940_s24 + $0x90] sm:$0xff] }
  0xa9   : > { %v3964_v33 = vpop.f32.mrf.mxu2  ;;  %v3966_v34 = vpop.f32.mrf.mxu3 }
  0xab   : > { %1769 = vmatpush.bf16.msrb.mxu0 %v3484_v50 }
  0xad   : > { %v637_v49 = vpop.f32.mrf.mxu1 }
  0xae   : > { %3192 = vmatmul.msk.f32.gmra.mxu2 %vm399_vm1, %v729_v36  ;;  %3225 = vmatmul.msk.f32.gmra.mxu3 %vm399_vm1, %v729_v36  ;;  %v521_v36 = vpop.f32.mrf.mxu0 }
  0xb1   : > { %v3974_v37 = vpop.f32.mrf.mxu2  ;;  %v3976_v38 = vpop.f32.mrf.mxu3 }
  0xb5   : > { %v640_v60 = vpop.f32.mrf.mxu1 }
  0xb6   : > { %3193 = vmatmul.msk.f32.gmra.mxu2 %vm399_vm1, %v730_v42  ;;  %3226 = vmatmul.msk.f32.gmra.mxu3 %vm399_vm1, %v730_v42 }
  0xb9   : > { %v3990_v43 = vpop.f32.mrf.mxu2  ;;  %v3992_v44 = vpop.f32.mrf.mxu3 }
  0xbd   : > { %v4149_v17 = vpop.f32.mrf.mxu1 }
  0xbe   : > { %3194 = vmatmul.msk.f32.gmra.mxu2 %vm399_vm1, %v731_v46  ;;  %3227 = vmatmul.msk.f32.gmra.mxu3 %vm399_vm1, %v731_v46  ;;  %v524_v46 = vpop.f32.mrf.mxu0 }
  0xc1   : > { %v4000_v47 = vpop.f32.mrf.mxu2  ;;  %v4002_v48 = vpop.f32.mrf.mxu3 }
  0xc6   : > { %3195 = vmatmul.msk.f32.gmra.mxu2 %vm399_vm1, %v732_v52  ;;  %3228 = vmatmul.msk.f32.gmra.mxu3 %vm399_vm1, %v732_v52  ;;  %v527_v59 = vpop.f32.mrf.mxu0 }
  0xc9   : > { %v4016_v53 = vpop.f32.mrf.mxu2  ;;  %v4018_v54 = vpop.f32.mrf.mxu3 }
  0xce   : > { %3196 = vmatmul.msk.f32.gmra.mxu2 %vm399_vm1, %v733_v56  ;;  %3229 = vmatmul.msk.f32.gmra.mxu3 %vm399_vm1, %v733_v56  ;;  %v743_v56 = vld [vmem:[%s3940_s24 + $0x80] sm:$0xff]  ;;  %v4147_v16 = vpop.f32.mrf.mxu0 }
  0xd1   : > { %v4026_v57 = vpop.f32.mrf.mxu2  ;;  %v4028_v58 = vpop.f32.mrf.mxu3 }
  0xd6   : > { %3197 = vmatmul.msk.f32.gmra.mxu2 %vm399_vm1, %v734_v62  ;;  %3230 = vmatmul.msk.f32.gmra.mxu3 %vm399_vm1, %v734_v62 }
  0xd9   : > { %v4042_v63 = vpop.f32.mrf.mxu2  ;;  %v4044_v0 = vpop.f32.mrf.mxu3 }
  0xde   : > { %3198 = vmatmul.msk.f32.gmra.mxu2 %vm399_vm1, %v735_v2  ;;  %3231 = vmatmul.msk.f32.gmra.mxu3 %vm399_vm1, %v735_v2 }
  0xe1   : > { %v4052_v3 = vpop.f32.mrf.mxu2  ;;  %v4054_v4 = vpop.f32.mrf.mxu3 }
  0xe6   : > { %3199 = vmatmul.msk.f32.gmra.mxu2 %vm399_vm1, %v736_v8  ;;  %3232 = vmatmul.msk.f32.gmra.mxu3 %vm399_vm1, %v736_v8 }
  0xe9   : > { %v4068_v9 = vpop.f32.mrf.mxu2  ;;  %v4070_v10 = vpop.f32.mrf.mxu3 }
  0xee   : > { %3200 = vmatmul.msk.f32.gmra.mxu2 %vm399_vm1, %v737_v12  ;;  %3233 = vmatmul.msk.f32.gmra.mxu3 %vm399_vm1, %v737_v12 }
  0xf1   : > { %v4078_v13 = vpop.f32.mrf.mxu2  ;;  %v4080_v14 = vpop.f32.mrf.mxu3 }
  0xf6   : > { %3201 = vmatmul.msk.f32.gmra.mxu2 %vm399_vm1, %v738_v18  ;;  %3234 = vmatmul.msk.f32.gmra.mxu3 %vm399_vm1, %v738_v18 }
  0xf9   : > { %v4094_v19 = vpop.f32.mrf.mxu2  ;;  %v4096_v20 = vpop.f32.mrf.mxu3 }
  0xfe   : > { %3202 = vmatmul.msk.f32.gmra.mxu2 %vm399_vm1, %v739_v22  ;;  %3235 = vmatmul.msk.f32.gmra.mxu3 %vm399_vm1, %v739_v22 }
 0x101   : > { %v4104_v25 = vpop.f32.mrf.mxu2  ;;  %v4106_v26 = vpop.f32.mrf.mxu3 }
 0x106   : > { %3203 = vmatmul.msk.f32.gmra.mxu2 %vm399_vm1, %v740_v29  ;;  %3236 = vmatmul.msk.f32.gmra.mxu3 %vm399_vm1, %v740_v29 }
 0x109   : > { %v4111_v30 = vpop.f32.mrf.mxu2  ;;  %v4113_v31 = vpop.f32.mrf.mxu3 }
 0x10e   : > { %3204 = vmatmul.msk.f32.gmra.mxu2 %vm399_vm1, %v741_v40  ;;  %3237 = vmatmul.msk.f32.gmra.mxu3 %vm399_vm1, %v741_v40 }
 0x111   : > { %v4124_v41 = vpop.f32.mrf.mxu2  ;;  %v4126_v42 = vpop.f32.mrf.mxu3 }
 0x116   : > { %3205 = vmatmul.msk.f32.gmra.mxu2 %vm399_vm1, %v742_v45  ;;  %3238 = vmatmul.msk.f32.gmra.mxu3 %vm399_vm1, %v742_v45 }
 0x119   : > { %v4137_v52 = vpop.f32.mrf.mxu2  ;;  %v4139_v55 = vpop.f32.mrf.mxu3 }
 0x11e   : > { %3206 = vmatmul.msk.f32.gmra.mxu2 %vm399_vm1, %v743_v56  ;;  %3239 = vmatmul.msk.f32.gmra.mxu3 %vm399_vm1, %v743_v56 }
 0x121   : > { %v881_v61 = vpop.f32.mrf.mxu2  ;;  %v994_v62 = vpop.f32.mrf.mxu3 }
 0x122   : > { %v1090_v1 = vmul.f32 %v881_v61, %v518_v23  ;;  %v1282_v2 = vmul.f32 %v881_v61, %v631_v24  ;;  %v1122_v5 = vmul.f32 %v994_v62, %v631_v24  ;;  %v1250_v6 = vmul.f32 %v994_v62, %v518_v23 }
 0x124   : > { %v1154_v8 = vsub.f32 %v1090_v1, %v1122_v5  ;;  %v1314_v11 = vadd.f32 %v1282_v2, %v1250_v6  ;;  %v746_v5 = vld [vmem:[%s3940_s24 + $0x98] sm:$0xff] }
 0x126   : > { %v1186_v12 = vpack.c.bf16 %v1154_v8, %v1154_v8  ;;  %v1346_v15 = vpack.c.bf16 %v1314_v11, %v1314_v11  ;;  %3207 = vmatmul.msk.f32.gmra.mxu2 %vm399_vm1, %v744_v7  ;;  %3240 = vmatmul.msk.f32.gmra.mxu3 %vm399_vm1, %v744_v7 }
 0x128   : > { %1218 = vst [vmem:[#allocation2] sm:$0xf] %v1186_v12 }
 0x129   : > { %1378 = vst [vmem:[#allocation2 + $0x4] sm:$0xf] %v1346_v15  ;;  %v884_v18 = vpop.f32.mrf.mxu2  ;;  %v997_v21 = vpop.f32.mrf.mxu3 }
 0x12a   : > { %v1091_v22 = vmul.f32 %v884_v18, %v521_v36  ;;  %v1283_v23 = vmul.f32 %v884_v18, %v634_v39  ;;  %v1123_v24 = vmul.f32 %v997_v21, %v634_v39  ;;  %v1251_v29 = vmul.f32 %v997_v21, %v521_v36  ;;  %v4154_v39 = vpop.f32.mrf.mxu0  ;;  %v646_v36 = vpop.f32.mrf.mxu1 }
 0x12c   : > { %v1155_v35 = vsub.f32 %v1091_v22, %v1123_v24  ;;  %v1315_v40 = vadd.f32 %v1283_v23, %v1251_v29 }
 0x12e   : > { %v1187_v45 = vpack.c.bf16 %v1155_v35, %v1155_v35  ;;  %v1347_v50 = vpack.c.bf16 %v1315_v40, %v1315_v40  ;;  %3208 = vmatmul.msk.f32.gmra.mxu2 %vm399_vm1, %v745_v32  ;;  %3241 = vmatmul.msk.f32.gmra.mxu3 %vm399_vm1, %v745_v32  ;;  %v747_v40 = vld [vmem:[%s3940_s24 + $0xa0] sm:$0xff] }
 0x12f   : > { %v3257_v12 = vld [vmem:[#allocation2] sm:$0xf] }
 0x130   : > { %1219 = vst [vmem:[#allocation2 + $0x8] sm:$0xf] %v1187_v45  ;;  %v3452_v21 = vld [vmem:[#allocation2 + $0x4] sm:$0xf] }
 0x131   : > { %1379 = vst [vmem:[#allocation2 + $0xc] sm:$0xf] %v1347_v50  ;;  %v887_v51 = vpop.f32.mrf.mxu2  ;;  %v1000_v56 = vpop.f32.mrf.mxu3 }
 0x132   : > { %v1092_v61 = vmul.f32 %v887_v51, %v524_v46  ;;  %v1284_v62 = vmul.f32 %v887_v51, %v637_v49  ;;  %v1124_v1 = vmul.f32 %v1000_v56, %v637_v49  ;;  %v1252_v2 = vmul.f32 %v1000_v56, %v524_v46  ;;  %v536_v51 = vpop.f32.mrf.mxu0  ;;  %v649_v56 = vpop.f32.mrf.mxu1 }
 0x134   : > { %v1156_v6 = vsub.f32 %v1092_v61, %v1124_v1  ;;  %v1316_v7 = vadd.f32 %v1284_v62, %v1252_v2 }
 0x136   : > { %v1188_v8 = vpack.c.bf16 %v1156_v6, %v1156_v6  ;;  %v1348_v11 = vpack.c.bf16 %v1316_v7, %v1316_v7  ;;  %3209 = vmatmul.msk.f32.gmra.mxu2 %vm399_vm1, %v746_v5  ;;  %3242 = vmatmul.msk.f32.gmra.mxu3 %vm399_vm1, %v746_v5  ;;  %v748_v7 = vld [vmem:[%s3940_s24 + $0xa8] sm:$0xff] }
 0x137   : > { %v3453_v15 = vld [vmem:[#allocation2 + $0x4] sm:$0xf0] }
 0x138   : > { %1220 = vst [vmem:[#allocation2 + $0x10] sm:$0xf] %v1188_v8  ;;  %v3258_v18 = vor.u32 %v3453_v15, %v3257_v12  ;;  %v3259_v49 = vld [vmem:[#allocation2 + $0x8] sm:$0xf0] }
 0x139   : > { %1380 = vst [vmem:[#allocation2 + $0x14] sm:$0xf] %v1348_v11  ;;  %v890_v46 = vpop.f32.mrf.mxu2  ;;  %v1003_v22 = vpop.f32.mrf.mxu3  ;;  %v3262_v23 = vor.u32 %v3452_v21, %v3259_v49 }
 0x13a   : > { %v1093_v24 = vmul.f32 %v890_v46, %v527_v59  ;;  %v1285_v29 = vmul.f32 %v890_v46, %v640_v60  ;;  %v1125_v32 = vmul.f32 %v1003_v22, %v640_v60  ;;  %v1253_v35 = vmul.f32 %v1003_v22, %v527_v59  ;;  %1770 = vmatmul.bf16.vlgmr.msrb.gmra.mxu0 %v3258_v18  ;;  %v539_v18 = vpop.f32.mrf.mxu0  ;;  %v652_v21 = vpop.f32.mrf.mxu1 }
 0x13b   : > { %1859 = vmatmul.bf16.vlgmr.msrb.gmra.mxu1 %v3262_v23 }
 0x13c   : > { %v1157_v45 = vsub.f32 %v1093_v24, %v1125_v32  ;;  %v1317_v50 = vadd.f32 %v1285_v29, %v1253_v35 }
 0x13e   : > { %v1189_v61 = vpack.c.bf16 %v1157_v45, %v1157_v45  ;;  %v1349_v62 = vpack.c.bf16 %v1317_v50, %v1317_v50  ;;  %3210 = vmatmul.msk.f32.gmra.mxu2 %vm399_vm1, %v747_v40  ;;  %3243 = vmatmul.msk.f32.gmra.mxu3 %vm399_vm1, %v747_v40  ;;  %v749_v50 = vld [vmem:[%s3940_s24 + $0xb0] sm:$0xff] }
 0x13f   : > { %v3265_v49 = vld [vmem:[#allocation2 + $0x10] sm:$0xf] }
 0x140   : > { %1221 = vst [vmem:[#allocation2 + $0x18] sm:$0xf] %v1189_v61  ;;  %v3454_v23 = vld [vmem:[#allocation2 + $0x14] sm:$0xf] }
 0x141   : > { %1381 = vst [vmem:[#allocation2 + $0x1c] sm:$0xf] %v1349_v62  ;;  %v893_v1 = vpop.f32.mrf.mxu2  ;;  %v1006_v2 = vpop.f32.mrf.mxu3 }
 0x142   : > { %v1094_v59 = vmul.f32 %v893_v1, %v4147_v16  ;;  %v1286_v60 = vmul.f32 %v893_v1, %v4149_v17  ;;  %v1126_v5 = vmul.f32 %v1006_v2, %v4149_v17  ;;  %v1254_v6 = vmul.f32 %v1006_v2, %v4147_v16 }
 0x144   : > { %v1158_v8 = vsub.f32 %v1094_v59, %v1126_v5  ;;  %v1318_v11 = vadd.f32 %v1286_v60, %v1254_v6  ;;  %v542_v59 = vpop.f32.mrf.mxu0  ;;  %v655_v60 = vpop.f32.mrf.mxu1 }
 0x146   : > { %v1190_v12 = vpack.c.bf16 %v1158_v8, %v1158_v8  ;;  %v1350_v15 = vpack.c.bf16 %v1318_v11, %v1318_v11  ;;  %3211 = vmatmul.msk.f32.gmra.mxu2 %vm399_vm1, %v748_v7  ;;  %3244 = vmatmul.msk.f32.gmra.mxu3 %vm399_vm1, %v748_v7  ;;  %v750_v11 = vld [vmem:[%s3940_s24 + $0xb8] sm:$0xff] }
 0x147   : > { %v3455_v46 = vld [vmem:[#allocation2 + $0x14] sm:$0xf0] }
 0x148   : > { %1222 = vst [vmem:[#allocation2 + $0x20] sm:$0xf] %v1190_v12  ;;  %v3266_v22 = vor.u32 %v3455_v46, %v3265_v49  ;;  %v3267_v17 = vld [vmem:[#allocation2 + $0x18] sm:$0xf0] }
 0x149   : > { %1382 = vst [vmem:[#allocation2 + $0x24] sm:$0xf] %v1350_v15  ;;  %v896_v16 = vpop.f32.mrf.mxu2  ;;  %v1009_v24 = vpop.f32.mrf.mxu3  ;;  %v3270_v29 = vor.u32 %v3454_v23, %v3267_v17 }
 0x14a   : > { %v1095_v32 = vmul.f32 %v896_v16, %v4154_v39  ;;  %v1287_v35 = vmul.f32 %v896_v16, %v646_v36  ;;  %v1127_v40 = vmul.f32 %v1009_v24, %v646_v36  ;;  %v1255_v45 = vmul.f32 %v1009_v24, %v4154_v39  ;;  %1775 = vmatmul.bf16.gmra.mxu0 %v3266_v22 }
 0x14b   : > { %1864 = vmatmul.bf16.gmra.mxu1 %v3270_v29 }
 0x14c   : > { %v1159_v61 = vsub.f32 %v1095_v32, %v1127_v40  ;;  %v1319_v62 = vadd.f32 %v1287_v35, %v1255_v45 }
 0x14e   : > { %v1191_v1 = vpack.c.bf16 %v1159_v61, %v1159_v61  ;;  %v1351_v2 = vpack.c.bf16 %v1319_v62, %v1319_v62  ;;  %3212 = vmatmul.msk.f32.gmra.mxu2 %vm399_vm1, %v749_v50  ;;  %3245 = vmatmul.msk.f32.gmra.mxu3 %vm399_vm1, %v749_v50  ;;  %v545_v50 = vpop.f32.mrf.mxu0  ;;  %v658_v61 = vpop.f32.mrf.mxu1  ;;  %v751_v62 = vld [vmem:[%s3940_s24 + $0xc0] sm:$0xff] }
 0x14f   : > { %v3273_v22 = vld [vmem:[#allocation2 + $0x20] sm:$0xf] }
 0x150   : > { %1223 = vst [vmem:[#allocation2 + $0x28] sm:$0xf] %v1191_v1  ;;  %v3456_v16 = vld [vmem:[#allocation2 + $0x24] sm:$0xf] }
 0x151   : > { %1383 = vst [vmem:[#allocation2 + $0x2c] sm:$0xf] %v1351_v2  ;;  %v899_v5 = vpop.f32.mrf.mxu2  ;;  %v1012_v36 = vpop.f32.mrf.mxu3 }
 0x152   : > { %v1096_v6 = vmul.f32 %v899_v5, %v536_v51  ;;  %v1288_v39 = vmul.f32 %v899_v5, %v649_v56  ;;  %v1128_v7 = vmul.f32 %v1012_v36, %v649_v56  ;;  %v1256_v8 = vmul.f32 %v1012_v36, %v536_v51 }
 0x154   : > { %v1160_v12 = vsub.f32 %v1096_v6, %v1128_v7  ;;  %v1320_v15 = vadd.f32 %v1288_v39, %v1256_v8 }
 0x156   : > { %v1192_v49 = vpack.c.bf16 %v1160_v12, %v1160_v12  ;;  %v1352_v46 = vpack.c.bf16 %v1320_v15, %v1320_v15  ;;  %3213 = vmatmul.msk.f32.gmra.mxu2 %vm399_vm1, %v750_v11  ;;  %3246 = vmatmul.msk.f32.gmra.mxu3 %vm399_vm1, %v750_v11  ;;  %v752_v11 = vld [vmem:[%s3940_s24 + $0xc8] sm:$0xff] }
 0x157   : > { %v3457_v23 = vld [vmem:[#allocation2 + $0x24] sm:$0xf0] }
 0x158   : > { %1224 = vst [vmem:[#allocation2 + $0x30] sm:$0xf] %v1192_v49  ;;  %v3274_v17 = vor.u32 %v3457_v23, %v3273_v22  ;;  %v3275_v24 = vld [vmem:[#allocation2 + $0x28] sm:$0xf0]  ;;  %v548_v49 = vpop.f32.mrf.mxu0 }
 0x159   : > { %1384 = vst [vmem:[#allocation2 + $0x34] sm:$0xf] %v1352_v46  ;;  %v902_v29 = vpop.f32.mrf.mxu2  ;;  %v1015_v56 = vpop.f32.mrf.mxu3  ;;  %v3278_v51 = vor.u32 %v3456_v16, %v3275_v24 }
 0x15a   : > { %v1097_v32 = vmul.f32 %v902_v29, %v539_v18  ;;  %v1289_v35 = vmul.f32 %v902_v29, %v652_v21  ;;  %v1129_v40 = vmul.f32 %v1015_v56, %v652_v21  ;;  %v1257_v45 = vmul.f32 %v1015_v56, %v539_v18  ;;  %1780 = vmatmul.bf16.gmra.mxu0 %v3274_v17  ;;  %v661_v46 = vpop.f32.mrf.mxu1 }
 0x15b   : > { %1869 = vmatmul.bf16.gmra.mxu1 %v3278_v51 }
 0x15c   : > { %v1161_v1 = vsub.f32 %v1097_v32, %v1129_v40  ;;  %v1321_v2 = vadd.f32 %v1289_v35, %v1257_v45 }
 0x15e   : > { %v1193_v5 = vpack.c.bf16 %v1161_v1, %v1161_v1  ;;  %v1353_v36 = vpack.c.bf16 %v1321_v2, %v1321_v2  ;;  %3214 = vmatmul.msk.f32.gmra.mxu2 %vm399_vm1, %v751_v62  ;;  %3247 = vmatmul.msk.f32.gmra.mxu3 %vm399_vm1, %v751_v62  ;;  %v753_v62 = vld [vmem:[%s3940_s24 + $0xd0] sm:$0xff] }
 0x15f   : > { %v3281_v17 = vld [vmem:[#allocation2 + $0x30] sm:$0xf] }
 0x160   : > { %1225 = vst [vmem:[#allocation2 + $0x38] sm:$0xf] %v1193_v5  ;;  %v3458_v29 = vld [vmem:[#allocation2 + $0x34] sm:$0xf] }
 0x161   : > { %1385 = vst [vmem:[#allocation2 + $0x3c] sm:$0xf] %v1353_v36  ;;  %v905_v6 = vpop.f32.mrf.mxu2  ;;  %v1018_v39 = vpop.f32.mrf.mxu3 }
 0x162   : > { %v1098_v21 = vmul.f32 %v905_v6, %v542_v59  ;;  %v1290_v18 = vmul.f32 %v905_v6, %v655_v60  ;;  %v1130_v7 = vmul.f32 %v1018_v39, %v655_v60  ;;  %v1258_v8 = vmul.f32 %v1018_v39, %v542_v59  ;;  %v551_v6 = vpop.f32.mrf.mxu0  ;;  %v664_v39 = vpop.f32.mrf.mxu1 }
 0x164   : > { %v1162_v12 = vsub.f32 %v1098_v21, %v1130_v7  ;;  %v1322_v15 = vadd.f32 %v1290_v18, %v1258_v8 }
 0x166   : > { %v1194_v22 = vpack.c.bf16 %v1162_v12, %v1162_v12  ;;  %v1354_v23 = vpack.c.bf16 %v1322_v15, %v1322_v15  ;;  %3215 = vmatmul.msk.f32.gmra.mxu2 %vm399_vm1, %v752_v11  ;;  %3248 = vmatmul.msk.f32.gmra.mxu3 %vm399_vm1, %v752_v11  ;;  %v754_v11 = vld [vmem:[%s3940_s24 + $0xd8] sm:$0xff] }
 0x167   : > { %v3459_v16 = vld [vmem:[#allocation2 + $0x34] sm:$0xf0] }
 0x168   : > { %1226 = vst [vmem:[#allocation2 + $0x40] sm:$0xf] %v1194_v22  ;;  %v3282_v24 = vor.u32 %v3459_v16, %v3281_v17  ;;  %v3283_v56 = vld [vmem:[#allocation2 + $0x38] sm:$0xf0] }
 0x169   : > { %1386 = vst [vmem:[#allocation2 + $0x44] sm:$0xf] %v1354_v23  ;;  %v908_v59 = vpop.f32.mrf.mxu2  ;;  %v1021_v60 = vpop.f32.mrf.mxu3  ;;  %v3286_v51 = vor.u32 %v3458_v29, %v3283_v56 }
 0x16a   : > { %v1099_v32 = vmul.f32 %v908_v59, %v545_v50  ;;  %v1291_v35 = vmul.f32 %v908_v59, %v658_v61  ;;  %v1131_v40 = vmul.f32 %v1021_v60, %v658_v61  ;;  %v1259_v45 = vmul.f32 %v1021_v60, %v545_v50  ;;  %1785 = vmatmul.bf16.gmra.mxu0 %v3282_v24  ;;  %v554_v59 = vpop.f32.mrf.mxu0  ;;  %v667_v60 = vpop.f32.mrf.mxu1 }
 0x16b   : > { %1874 = vmatmul.bf16.gmra.mxu1 %v3286_v51 }
 0x16c   : > { %v1163_v1 = vsub.f32 %v1099_v32, %v1131_v40  ;;  %v1323_v2 = vadd.f32 %v1291_v35, %v1259_v45 }
 0x16e   : > { %v1195_v5 = vpack.c.bf16 %v1163_v1, %v1163_v1  ;;  %v1355_v36 = vpack.c.bf16 %v1323_v2, %v1323_v2  ;;  %3216 = vmatmul.msk.f32.gmra.mxu2 %vm399_vm1, %v753_v62  ;;  %3249 = vmatmul.msk.f32.gmra.mxu3 %vm399_vm1, %v753_v62  ;;  %v755_v62 = vld [vmem:[%s3940_s24 + $0xe0] sm:$0xff] }
 0x16f   : > { %v3289_v17 = vld [vmem:[#allocation2 + $0x40] sm:$0xf] }
 0x170   : > { %1227 = vst [vmem:[#allocation2 + $0x48] sm:$0xf] %v1195_v5  ;;  %v3460_v29 = vld [vmem:[#allocation2 + $0x44] sm:$0xf] }
 0x171   : > { %1387 = vst [vmem:[#allocation2 + $0x4c] sm:$0xf] %v1355_v36  ;;  %v911_v21 = vpop.f32.mrf.mxu2  ;;  %v1024_v18 = vpop.f32.mrf.mxu3 }
 0x172   : > { %v1100_v61 = vmul.f32 %v911_v21, %v548_v49  ;;  %v1292_v50 = vmul.f32 %v911_v21, %v661_v46  ;;  %v1132_v7 = vmul.f32 %v1024_v18, %v661_v46  ;;  %v1260_v8 = vmul.f32 %v1024_v18, %v548_v49 }
 0x174   : > { %v1164_v12 = vsub.f32 %v1100_v61, %v1132_v7  ;;  %v1324_v15 = vadd.f32 %v1292_v50, %v1260_v8  ;;  %v756_v7 = vld [vmem:[%s3940_s24 + $0xe8] sm:$0xff]  ;;  %v557_v8 = vpop.f32.mrf.mxu0 }
 0x176   : > { %v1196_v22 = vpack.c.bf16 %v1164_v12, %v1164_v12  ;;  %v1356_v23 = vpack.c.bf16 %v1324_v15, %v1324_v15  ;;  %3217 = vmatmul.msk.f32.gmra.mxu2 %vm399_vm1, %v754_v11  ;;  %3250 = vmatmul.msk.f32.gmra.mxu3 %vm399_vm1, %v754_v11  ;;  %v670_v11 = vpop.f32.mrf.mxu1 }
 0x177   : > { %v3461_v16 = vld [vmem:[#allocation2 + $0x44] sm:$0xf0] }
 0x178   : > { %1228 = vst [vmem:[#allocation2 + $0x50] sm:$0xf] %v1196_v22  ;;  %v3290_v24 = vor.u32 %v3461_v16, %v3289_v17  ;;  %v3291_v56 = vld [vmem:[#allocation2 + $0x48] sm:$0xf0] }
 0x179   : > { %1388 = vst [vmem:[#allocation2 + $0x54] sm:$0xf] %v1356_v23  ;;  %v914_v49 = vpop.f32.mrf.mxu2  ;;  %v1027_v46 = vpop.f32.mrf.mxu3  ;;  %v3294_v51 = vor.u32 %v3460_v29, %v3291_v56 }
 0x17a   : > { %v1101_v32 = vmul.f32 %v914_v49, %v551_v6  ;;  %v1293_v35 = vmul.f32 %v914_v49, %v664_v39  ;;  %v1133_v40 = vmul.f32 %v1027_v46, %v664_v39  ;;  %v1261_v45 = vmul.f32 %v1027_v46, %v551_v6  ;;  %1790 = vmatmul.bf16.gmra.mxu0 %v3290_v24 }
 0x17b   : > { %1879 = vmatmul.bf16.gmra.mxu1 %v3294_v51 }
 0x17c   : > { %v1165_v1 = vsub.f32 %v1101_v32, %v1133_v40  ;;  %v1325_v2 = vadd.f32 %v1293_v35, %v1261_v45  ;;  %v757_v40 = vld [vmem:[%s3940_s24 + $0xf0] sm:$0xff] }
 0x17e   : > { %v1197_v5 = vpack.c.bf16 %v1165_v1, %v1165_v1  ;;  %v1357_v36 = vpack.c.bf16 %v1325_v2, %v1325_v2  ;;  %3218 = vmatmul.msk.f32.gmra.mxu2 %vm399_vm1, %v755_v62  ;;  %3251 = vmatmul.msk.f32.gmra.mxu3 %vm399_vm1, %v755_v62  ;;  %v560_v1 = vpop.f32.mrf.mxu0  ;;  %v673_v2 = vpop.f32.mrf.mxu1 }
 0x17f   : > { %v3297_v17 = vld [vmem:[#allocation2 + $0x50] sm:$0xf] }
 0x180   : > { %1229 = vst [vmem:[#allocation2 + $0x58] sm:$0xf] %v1197_v5  ;;  %v3462_v29 = vld [vmem:[#allocation2 + $0x54] sm:$0xf] }
 0x181   : > { %1389 = vst [vmem:[#allocation2 + $0x5c] sm:$0xf] %v1357_v36  ;;  %v917_v21 = vpop.f32.mrf.mxu2  ;;  %v1030_v18 = vpop.f32.mrf.mxu3 }
 0x182   : > { %v1102_v61 = vmul.f32 %v917_v21, %v554_v59  ;;  %v1294_v50 = vmul.f32 %v917_v21, %v667_v60  ;;  %v1134_v39 = vmul.f32 %v1030_v18, %v667_v60  ;;  %v1262_v6 = vmul.f32 %v1030_v18, %v554_v59 }
 0x184   : > { %v1166_v12 = vsub.f32 %v1102_v61, %v1134_v39  ;;  %v1326_v15 = vadd.f32 %v1294_v50, %v1262_v6 }
 0x186   : > { %v1198_v22 = vpack.c.bf16 %v1166_v12, %v1166_v12  ;;  %v1358_v23 = vpack.c.bf16 %v1326_v15, %v1326_v15  ;;  %3219 = vmatmul.msk.f32.gmra.mxu2 %vm399_vm1, %v756_v7  ;;  %3252 = vmatmul.msk.f32.gmra.mxu3 %vm399_vm1, %v756_v7  ;;  %v758_v7 = vld [vmem:[%s3940_s24 + $0xf8] sm:$0xff]  ;;  %s292_s24 = sand.u32 1, %s3750_s19  }
 0x187   : > { %v3463_v16 = vld [vmem:[#allocation2 + $0x54] sm:$0xf0]  ;;  %s3118_s9 = sshll.u32 %s292_s24, 8  ;;  %s2968_s21 = scalar_lea.sflag [#allocation5], %s292_s24 }
 0x188   : > { %1230 = vst [vmem:[#allocation2 + $0x60] sm:$0xf] %v1198_v22  ;;  %v3298_v24 = vor.u32 %v3463_v16, %v3297_v17  ;;  %v3299_v56 = vld [vmem:[#allocation2 + $0x58] sm:$0xf0]  ;;  %v563_v22 = vpop.f32.mrf.mxu0  ;;  %s4501_s10 = scalar_lea.vmem [#allocation4], %s3118_s9 }
 0x189   : > { %1390 = vst [vmem:[#allocation2 + $0x64] sm:$0xf] %v1358_v23  ;;  %v920_v59 = vpop.f32.mrf.mxu2  ;;  %v1033_v60 = vpop.f32.mrf.mxu3  ;;  %v3302_v49 = vor.u32 %v3462_v29, %v3299_v56  ;;  %s2980_s15 = sshll.u32 %s4501_s10, 4  ;;  %s2981_s15 = int_to_ptr.vmem [resolvable:$true] %s2980_s15 }
 0x18a   : > { %v1103_v46 = vmul.f32 %v920_v59, %v557_v8  ;;  %v1295_v51 = vmul.f32 %v920_v59, %v670_v11  ;;  %v1135_v32 = vmul.f32 %v1033_v60, %v670_v11  ;;  %v1263_v35 = vmul.f32 %v1033_v60, %v557_v8  ;;  %1795 = vmatmul.bf16.gmra.mxu0 %v3298_v24  ;;  %v676_v23 = vpop.f32.mrf.mxu1 }
 0x18b   : > { %1884 = vmatmul.bf16.gmra.mxu1 %v3302_v49 }
 0x18c   : > { %v1167_v45 = vsub.f32 %v1103_v46, %v1135_v32  ;;  %v1327_v62 = vadd.f32 %v1295_v51, %v1263_v35 }
 0x18e   : > { %v1199_v5 = vpack.c.bf16 %v1167_v45, %v1167_v45  ;;  %v1359_v36 = vpack.c.bf16 %v1327_v62, %v1327_v62  ;;  %3220 = vmatmul.msk.f32.gmra.mxu2 %vm399_vm1, %v757_v40  ;;  %3253 = vmatmul.msk.f32.gmra.mxu3 %vm399_vm1, %v757_v40 }
 0x18f   : > { %v3305_v17 = vld [vmem:[#allocation2 + $0x60] sm:$0xf] }
 0x190   : > { %1231 = vst [vmem:[#allocation2 + $0x68] sm:$0xf] %v1199_v5  ;;  %v3464_v29 = vld [vmem:[#allocation2 + $0x64] sm:$0xf] }
 0x191   : > { %1391 = vst [vmem:[#allocation2 + $0x6c] sm:$0xf] %v1359_v36  ;;  %v923_v21 = vpop.f32.mrf.mxu2  ;;  %v1036_v18 = vpop.f32.mrf.mxu3 }
 0x192   : > { %v1104_v61 = vmul.f32 %v923_v21, %v560_v1  ;;  %v1296_v50 = vmul.f32 %v923_v21, %v673_v2  ;;  %v1136_v39 = vmul.f32 %v1036_v18, %v673_v2  ;;  %v1264_v6 = vmul.f32 %v1036_v18, %v560_v1 }
 0x194   : > { %v1168_v8 = vsub.f32 %v1104_v61, %v1136_v39  ;;  %v1328_v11 = vadd.f32 %v1296_v50, %v1264_v6 }
 0x196   : > { %v1200_v12 = vpack.c.bf16 %v1168_v8, %v1168_v8  ;;  %v1360_v15 = vpack.c.bf16 %v1328_v11, %v1328_v11  ;;  %3221 = vmatmul.msk.f32.gmra.mxu2 %vm399_vm1, %v758_v7  ;;  %3254 = vmatmul.msk.f32.gmra.mxu3 %vm399_vm1, %v758_v7 }
 0x197   : > { %v3465_v16 = vld [vmem:[#allocation2 + $0x64] sm:$0xf0] }
 0x198   : > { %1232 = vst [vmem:[#allocation2 + $0x70] sm:$0xf] %v1200_v12  ;;  %v3306_v24 = vor.u32 %v3465_v16, %v3305_v17  ;;  %v3307_v56 = vld [vmem:[#allocation2 + $0x68] sm:$0xf0] }
 0x199   : > { %1392 = vst [vmem:[#allocation2 + $0x74] sm:$0xf] %v1360_v15  ;;  %v926_v59 = vpop.f32.mrf.mxu2  ;;  %v1039_v60 = vpop.f32.mrf.mxu3  ;;  %v3310_v49 = vor.u32 %v3464_v29, %v3307_v56 }
 0x19a   : > { %v1105_v46 = vmul.f32 %v926_v59, %v563_v22  ;;  %v1297_v51 = vmul.f32 %v926_v59, %v676_v23  ;;  %v1137_v32 = vmul.f32 %v1039_v60, %v676_v23  ;;  %v1265_v35 = vmul.f32 %v1039_v60, %v563_v22  ;;  %1800 = vmatmul.bf16.gmra.mxu0 %v3306_v24 }
 0x19b   : > { %1889 = vmatmul.bf16.gmra.mxu1 %v3310_v49 }
 0x19c   : > { %v1169_v40 = vsub.f32 %v1105_v46, %v1137_v32  ;;  %v1329_v45 = vadd.f32 %v1297_v51, %v1265_v35 }
 0x19e   : > { %v1201_v62 = vpack.c.bf16 %v1169_v40, %v1169_v40  ;;  %v1361_v1 = vpack.c.bf16 %v1329_v45, %v1329_v45 }
 0x19f   : > { %v3313_v8 = vld [vmem:[#allocation2 + $0x70] sm:$0xf] }
 0x1a0   : > { %1233 = vst [vmem:[#allocation2 + $0x78] sm:$0xf] %v1201_v62  ;;  %v3466_v15 = vld [vmem:[#allocation2 + $0x74] sm:$0xf] }
 0x1a1   : > { %1393 = vst [vmem:[#allocation2 + $0x7c] sm:$0xf] %v1361_v1  ;;  %v929_v2 = vpop.f32.mrf.mxu2  ;;  %v1042_v5 = vpop.f32.mrf.mxu3 }
 0x1a2   : > { %v1106_v36 = vmul.f32 %v929_v2, %v3948_v27  ;;  %v1298_v21 = vmul.f32 %v929_v2, %v3950_v28  ;;  %v1138_v18 = vmul.f32 %v1042_v5, %v3950_v28  ;;  %v1266_v61 = vmul.f32 %v1042_v5, %v3948_v27 }
 0x1a4   : > { %v1170_v50 = vsub.f32 %v1106_v36, %v1138_v18  ;;  %v1330_v39 = vadd.f32 %v1298_v21, %v1266_v61 }
 0x1a6   : > { %v1202_v6 = vpack.c.bf16 %v1170_v50, %v1170_v50  ;;  %v1362_v7 = vpack.c.bf16 %v1330_v39, %v1330_v39 }
 0x1a7   : > { %v3467_v11 = vld [vmem:[#allocation2 + $0x74] sm:$0xf0] }
 0x1a8   : > { %1234 = vst [vmem:[#allocation2 + $0x80] sm:$0xf] %v1202_v6  ;;  %v3314_v12 = vor.u32 %v3467_v11, %v3313_v8  ;;  %v3315_v22 = vld [vmem:[#allocation2 + $0x78] sm:$0xf0] }
 0x1a9   : > { %1394 = vst [vmem:[#allocation2 + $0x84] sm:$0xf] %v1362_v7  ;;  %v932_v23 = vpop.f32.mrf.mxu2  ;;  %v1045_v17 = vpop.f32.mrf.mxu3  ;;  %v3318_v16 = vor.u32 %v3466_v15, %v3315_v22 }
 0x1aa   : > { %v1107_v24 = vmul.f32 %v932_v23, %v3964_v33  ;;  %v1299_v28 = vmul.f32 %v932_v23, %v3966_v34  ;;  %v1139_v27 = vmul.f32 %v1045_v17, %v3966_v34  ;;  %v1267_v29 = vmul.f32 %v1045_v17, %v3964_v33  ;;  %1805 = vmatmul.bf16.gmra.mxu0 %v3314_v12 }
 0x1ab   : > { %1894 = vmatmul.bf16.gmra.mxu1 %v3318_v16 }
 0x1ac   : > { %v1171_v56 = vsub.f32 %v1107_v24, %v1139_v27  ;;  %v1331_v59 = vadd.f32 %v1299_v28, %v1267_v29 }
 0x1ae   : > { %v1203_v60 = vpack.c.bf16 %v1171_v56, %v1171_v56  ;;  %v1363_v49 = vpack.c.bf16 %v1331_v59, %v1331_v59 }
 0x1af   : > { %v3321_v5 = vld [vmem:[#allocation2 + $0x80] sm:$0xf] }
 0x1b0   : > { %1235 = vst [vmem:[#allocation2 + $0x88] sm:$0xf] %v1203_v60  ;;  %v3468_v61 = vld [vmem:[#allocation2 + $0x84] sm:$0xf] }
 0x1b1   : > { %1395 = vst [vmem:[#allocation2 + $0x8c] sm:$0xf] %v1363_v49  ;;  %v935_v46 = vpop.f32.mrf.mxu2  ;;  %v1048_v51 = vpop.f32.mrf.mxu3 }
 0x1b2   : > { %v1108_v32 = vmul.f32 %v935_v46, %v3974_v37  ;;  %v1300_v35 = vmul.f32 %v935_v46, %v3976_v38  ;;  %v1140_v40 = vmul.f32 %v1048_v51, %v3976_v38  ;;  %v1268_v34 = vmul.f32 %v1048_v51, %v3974_v37 }
 0x1b4   : > { %v1172_v45 = vsub.f32 %v1108_v32, %v1140_v40  ;;  %v1332_v33 = vadd.f32 %v1300_v35, %v1268_v34 }
 0x1b6   : > { %v1204_v62 = vpack.c.bf16 %v1172_v45, %v1172_v45  ;;  %v1364_v1 = vpack.c.bf16 %v1332_v33, %v1332_v33 }
 0x1b7   : > { %v1771_v2 = vpop.f32.mrf.mxu0  ;;  %v3469_v36 = vld [vmem:[#allocation2 + $0x84] sm:$0xf0] }
 0x1b8   : > { %1236 = vst [vmem:[#allocation2 + $0x90] sm:$0xf] %v1204_v62  ;;  %v1860_v21 = vpop.f32.mrf.mxu1  ;;  %v3322_v18 = vor.u32 %v3469_v36, %v3321_v5  ;;  %v3323_v50 = vld [vmem:[#allocation2 + $0x88] sm:$0xf0] }
 0x1b9   : > { %1396 = vst [vmem:[#allocation2 + $0x94] sm:$0xf] %v1364_v1  ;;  %v4213_v39 = vadd.f32 %v1860_v21, %v1771_v2  ;;  %v938_v6 = vpop.f32.mrf.mxu2  ;;  %v1051_v7 = vpop.f32.mrf.mxu3  ;;  %v3326_v38 = vor.u32 %v3468_v61, %v3323_v50 }
 0x1ba   : > { %v1109_v37 = vmul.f32 %v938_v6, %v3990_v43  ;;  %v1301_v8 = vmul.f32 %v938_v6, %v3992_v44  ;;  %v1141_v11 = vmul.f32 %v1051_v7, %v3992_v44  ;;  %v1269_v12 = vmul.f32 %v1051_v7, %v3990_v43  ;;  %1810 = vmatmul.bf16.gmra.mxu0 %v3322_v18 }
 0x1bb   : > { %v2039_v15 = vand.u32 2147483647, %v4213_v39  ;;  %1899 = vmatmul.bf16.gmra.mxu1 %v3326_v38 }
 0x1bc   : > { %v1173_v22 = vsub.f32 %v1109_v37, %v1141_v11  ;;  %v1333_v23 = vadd.f32 %v1301_v8, %v1269_v12 }
 0x1bd   : > { %v2071_v17 = vadd.f32 1e-10, %v2039_v15 }
 0x1be   : > { %v1205_v16 = vpack.c.bf16 %v1173_v22, %v1173_v22  ;;  %v1365_v24 = vpack.c.bf16 %v1333_v23, %v1333_v23 }
 0x1bf   : > { %3560 = vrsqrt.f32 %v2071_v17  ;;  %v1773_v28 = vpop.f32.mrf.mxu0  ;;  %v3329_v1 = vld [vmem:[#allocation2 + $0x90] sm:$0xf]  ;;  %vm2109_vm3 = vweird.f32 %v2071_v17 }
 0x1c0   : > { %1237 = vst [vmem:[#allocation2 + $0x98] sm:$0xf] %v1205_v16  ;;  %v1862_v27 = vpop.f32.mrf.mxu1 }
 0x1c1   : > { %1397 = vst [vmem:[#allocation2 + $0x9c] sm:$0xf] %v1365_v24  ;;  %v4220_v29 = vadd.f32 %v1862_v27, %v1773_v28  ;;  %v941_v56 = vpop.f32.mrf.mxu2  ;;  %v1054_v44 = vpop.f32.mrf.mxu3 }
 0x1c2   : > { %v1110_v43 = vmul.f32 %v941_v56, %v4000_v47  ;;  %v1302_v59 = vmul.f32 %v941_v56, %v4002_v48  ;;  %v1142_v60 = vmul.f32 %v1054_v44, %v4002_v48  ;;  %v1270_v49 = vmul.f32 %v1054_v44, %v4000_v47  ;;  %v3470_v47 = vld [vmem:[#allocation2 + $0x94] sm:$0xf] }
 0x1c3   : > { %v2040_v46 = vand.u32 2147483647, %v4220_v29 }
 0x1c4   : > { %v1174_v51 = vsub.f32 %v1110_v43, %v1142_v60  ;;  %v1334_v32 = vadd.f32 %v1302_v59, %v1270_v49 }
 0x1c5   : > { %v3561_v35 = vpop.eup %3560  ;;  %v4227_v40 = vadd.f32 1e-10, %v2040_v46 }
 0x1c6   : > { %v2104_v34 = vmul.f32 %v3561_v35, %v2071_v17  ;;  %v1206_v45 = vpack.c.bf16 %v1174_v51, %v1174_v51  ;;  %v1366_v33 = vpack.c.bf16 %v1334_v32, %v1334_v32  ;;  %vm2110_vm2 = vweird.f32 %v3561_v35 }
 0x1c7   : > { %3562 = vrsqrt.f32 %v4227_v40  ;;  %v1776_v62 = vpop.f32.mrf.mxu0  ;;  %v3471_v2 = vld [vmem:[#allocation2 + $0x94] sm:$0xf0]  ;;  %vm2111_vm4 = vmor %vm2109_vm3, %vm2110_vm2  ;;  %vm2119_vm6 = vweird.f32 %v4227_v40 }
 0x1c8   : > { %v2105_v5 = vmul.f32 %v3561_v35, %v2104_v34  ;;  %1238 = vst [vmem:[#allocation2 + $0xa0] sm:$0xf] %v1206_v45  ;;  %v1865_v48 = vpop.f32.mrf.mxu1  ;;  %v3330_v36 = vor.u32 %v3471_v2, %v3329_v1  ;;  %v3331_v21 = vld [vmem:[#allocation2 + $0x98] sm:$0xf0] }
 0x1c9   : > { %1398 = vst [vmem:[#allocation2 + $0xa4] sm:$0xf] %v1366_v33  ;;  %v4230_v18 = vadd.f32 %v1865_v48, %v1776_v62  ;;  %v944_v61 = vpop.f32.mrf.mxu2  ;;  %v1057_v50 = vpop.f32.mrf.mxu3  ;;  %v3334_v6 = vor.u32 %v3470_v47, %v3331_v21 }
 0x1ca   : > { %v1111_v7 = vmul.f32 %v944_v61, %v4016_v53  ;;  %v1303_v38 = vmul.f32 %v944_v61, %v4018_v54  ;;  %v1143_v37 = vmul.f32 %v1057_v50, %v4018_v54  ;;  %v1271_v8 = vmul.f32 %v1057_v50, %v4016_v53  ;;  %1815 = vmatmul.bf16.gmra.mxu0 %v3330_v36 }
 0x1cb   : > { %v2041_v11 = vand.u32 2147483647, %v4230_v18  ;;  %1904 = vmatmul.bf16.gmra.mxu1 %v3334_v6  ;;  %v2106_v12 = vmul.f32 0.5, %v2105_v5 }
 0x1cc   : > { %v1175_v15 = vsub.f32 %v1111_v7, %v1143_v37  ;;  %v1335_v22 = vadd.f32 %v1303_v38, %v1271_v8 }
 0x1cd   : > { %v3563_v23 = vpop.eup %3562  ;;  %v4237_v16 = vadd.f32 1e-10, %v2041_v11  ;;  %v2107_v24 = vsub.f32 1.5, %v2106_v12 }
 0x1ce   : > { %v2114_v28 = vmul.f32 %v3563_v23, %v4227_v40  ;;  %v1207_v27 = vpack.c.bf16 %v1175_v15, %v1175_v15  ;;  %v1367_v56 = vpack.c.bf16 %v1335_v22, %v1335_v22  ;;  %vm2120_vm5 = vweird.f32 %v3563_v23 }
 0x1cf   : > { %3564 = vrsqrt.f32 %v4237_v16  ;;  %v1778_v54 = vpop.f32.mrf.mxu0  ;;  %v2108_v53 = vmul.f32 %v3561_v35, %v2107_v24  ;;  %v3337_v61 = vld [vmem:[#allocation2 + $0xa0] sm:$0xf]  ;;  %vm2121_vm7 = vmor %vm2119_vm6, %vm2120_vm5  ;;  %vm2129_vm9 = vweird.f32 %v4237_v16 }
 0x1d0   : > { %v2115_v44 = vmul.f32 %v3563_v23, %v2114_v28  ;;  %1239 = vst [vmem:[#allocation2 + $0xa8] sm:$0xf] %v1207_v27  ;;  %v1867_v43 = vpop.f32.mrf.mxu1  ;;  %v3472_v37 = vld [vmem:[#allocation2 + $0xa4] sm:$0xf] }
 0x1d1   : > { %1399 = vst [vmem:[#allocation2 + $0xac] sm:$0xf] %v1367_v56  ;;  %v4241_v59 = vadd.f32 %v1867_v43, %v1778_v54  ;;  %v947_v60 = vpop.f32.mrf.mxu2  ;;  %v1060_v49 = vpop.f32.mrf.mxu3  ;;  %v2112_v46 = vsel %vm2111_vm4, %v3561_v35, %v2108_v53 }
 0x1d2   : > { %v2116_v51 = vmul.f32 0.5, %v2115_v44  ;;  %v1112_v32 = vmul.f32 %v947_v60, %v4026_v57  ;;  %v1304_v34 = vmul.f32 %v947_v60, %v4028_v58  ;;  %v1144_v45 = vmul.f32 %v1060_v49, %v4028_v58 }
 0x1d3   : > { %v2042_v33 = vand.u32 2147483647, %v4241_v59  ;;  %v1272_v17 = vmul.f32 %v1060_v49, %v4026_v57  ;;  %v4249_v62 = vmul.f32 %v2112_v46, %v4213_v39 }
 0x1d4   : > { %v1176_v1 = vsub.f32 %v1112_v32, %v1144_v45  ;;  %v2117_v2 = vsub.f32 1.5, %v2116_v51 }
 0x1d5   : > { %v4251_v5 = vpop.eup %3564  ;;  %v4253_v35 = vadd.f32 1e-10, %v2042_v33  ;;  %v1336_v48 = vadd.f32 %v1304_v34, %v1272_v17  ;;  %v2455_v36 = vmul.f32 %v4249_v62, %v4249_v62 }
 0x1d6   : > { %v2124_v58 = vmul.f32 %v4251_v5, %v4237_v16  ;;  %v1208_v47 = vpack.c.bf16 %v1176_v1, %v1176_v1  ;;  %v2118_v21 = vmul.f32 %v3563_v23, %v2117_v2  ;;  %vm2130_vm8 = vweird.f32 %v4251_v5 }
 0x1d7   : > { %3566 = vrsqrt.f32 %v4253_v35  ;;  %v1368_v57 = vpack.c.bf16 %v1336_v48, %v1336_v48  ;;  %2487 = vadd.xlane.f32.xlu0 %v2455_v36  ;;  %v1781_v39 = vpop.f32.mrf.mxu0  ;;  %v3473_v50 = vld [vmem:[#allocation2 + $0xa4] sm:$0xf0]  ;;  %vm2131_vm10 = vmor %vm2129_vm9, %vm2130_vm8  ;;  %vm2139_vm12 = vweird.f32 %v4253_v35 }
 0x1d8   : > { %v2125_v6 = vmul.f32 %v4251_v5, %v2124_v58  ;;  %1240 = vst [vmem:[#allocation2 + $0xb0] sm:$0xf] %v1208_v47  ;;  %v1870_v7 = vpop.f32.mrf.mxu1  ;;  %v3338_v38 = vor.u32 %v3473_v50, %v3337_v61  ;;  %v3339_v8 = vld [vmem:[#allocation2 + $0xa8] sm:$0xf0]  ;;  %v2122_v11 = vsel %vm2121_vm7, %v3563_v23, %v2118_v21 }
 0x1d9   : > { %1400 = vst [vmem:[#allocation2 + $0xb4] sm:$0xf] %v1368_v57  ;;  %v4263_v12 = vadd.f32 %v1870_v7, %v1781_v39  ;;  %v950_v40 = vpop.f32.mrf.mxu2  ;;  %v1063_v15 = vpop.f32.mrf.mxu3  ;;  %v3342_v22 = vor.u32 %v3472_v37, %v3339_v8  ;;  %v4266_v24 = vmul.f32 %v2122_v11, %v4220_v29 }
 0x1da   : > { %v1113_v28 = vmul.f32 %v950_v40, %v4042_v63  ;;  %v1305_v27 = vmul.f32 %v950_v40, %v4044_v0  ;;  %v1145_v56 = vmul.f32 %v1063_v15, %v4044_v0  ;;  %v1273_v54 = vmul.f32 %v1063_v15, %v4042_v63  ;;  %1820 = vmatmul.bf16.gmra.mxu0 %v3338_v38 }
 0x1db   : > { %v2043_v23 = vand.u32 2147483647, %v4263_v12  ;;  %1909 = vmatmul.bf16.gmra.mxu1 %v3342_v22  ;;  %v2456_v53 = vmul.f32 %v4266_v24, %v4266_v24  ;;  %v2126_v44 = vmul.f32 0.5, %v2125_v6 }
 0x1dc   : > { %v1177_v43 = vsub.f32 %v1113_v28, %v1145_v56  ;;  %v1337_v60 = vadd.f32 %v1305_v27, %v1273_v54 }
 0x1dd   : > { %v3567_v29 = vpop.eup %3566  ;;  %v4275_v49 = vadd.f32 1e-10, %v2043_v23  ;;  %v2127_v46 = vsub.f32 1.5, %v2126_v44 }
 0x1de   : > { %v2134_v0 = vmul.f32 %v3567_v29, %v4253_v35  ;;  %v1209_v51 = vpack.c.bf16 %v1177_v43, %v1177_v43  ;;  %v1369_v63 = vpack.c.bf16 %v1337_v60, %v1337_v60  ;;  %vm2140_vm11 = vweird.f32 %v3567_v29 }
 0x1df   : > { %3568 = vrsqrt.f32 %v4275_v49  ;;  %2489 = vadd.xlane.f32.xlu0 %v2456_v53  ;;  %v1783_v32 = vpop.f32.mrf.mxu0  ;;  %v2128_v34 = vmul.f32 %v4251_v5, %v2127_v46  ;;  %v3345_v11 = vld [vmem:[#allocation2 + $0xb0] sm:$0xf]  ;;  %vm2141_vm13 = vmor %vm2139_vm12, %vm2140_vm11  ;;  %vm2149_vm15 = vweird.f32 %v4275_v49 }
 0x1e0   : > { %v2135_v45 = vmul.f32 %v3567_v29, %v2134_v0  ;;  %1241 = vst [vmem:[#allocation2 + $0xb8] sm:$0xf] %v1209_v51  ;;  %v1872_v33 = vpop.f32.mrf.mxu1  ;;  %v3474_v27 = vld [vmem:[#allocation2 + $0xb4] sm:$0xf] }
 0x1e1   : > { %1401 = vst [vmem:[#allocation2 + $0xbc] sm:$0xf] %v1369_v63  ;;  %v4282_v17 = vadd.f32 %v1872_v33, %v1783_v32  ;;  %v953_v1 = vpop.f32.mrf.mxu2  ;;  %v1066_v2 = vpop.f32.mrf.mxu3  ;;  %v2132_v48 = vsel %vm2131_vm10, %v4251_v5, %v2128_v34 }
 0x1e2   : > { %v2136_v36 = vmul.f32 0.5, %v2135_v45  ;;  %v1114_v58 = vmul.f32 %v953_v1, %v4052_v3  ;;  %v1306_v47 = vmul.f32 %v953_v1, %v4054_v4  ;;  %v1146_v21 = vmul.f32 %v1066_v2, %v4054_v4 }
 0x1e3   : > { %v2044_v16 = vand.u32 2147483647, %v4282_v17  ;;  %v1274_v57 = vmul.f32 %v1066_v2, %v4052_v3  ;;  %v4291_v39 = vmul.f32 %v2132_v48, %v4230_v18 }
 0x1e4   : > { %v1178_v61 = vsub.f32 %v1114_v58, %v1146_v21  ;;  %v2137_v50 = vsub.f32 1.5, %v2136_v36 }
 0x1e5   : > { %v4293_v6 = vpop.eup %3568  ;;  %v4295_v5 = vadd.f32 1e-10, %v2044_v16  ;;  %v1338_v7 = vadd.f32 %v1306_v47, %v1274_v57  ;;  %v2457_v38 = vmul.f32 %v4291_v39, %v4291_v39 }
 0x1e6   : > { %v2144_v4 = vmul.f32 %v4293_v6, %v4275_v49  ;;  %v1210_v37 = vpack.c.bf16 %v1178_v61, %v1178_v61  ;;  %v2138_v8 = vmul.f32 %v3567_v29, %v2137_v50  ;;  %vm2150_vm14 = vweird.f32 %v4293_v6 }
 0x1e7   : > { %3570 = vrsqrt.f32 %v4295_v5  ;;  %v1370_v3 = vpack.c.bf16 %v1338_v7, %v1338_v7  ;;  %2491 = vadd.xlane.f32.xlu1 %v2457_v38  ;;  %v1786_v18 = vpop.f32.mrf.mxu0  ;;  %v3475_v40 = vld [vmem:[#allocation2 + $0xb4] sm:$0xf0]  ;;  %vm2151_vm0 = vmor %vm2149_vm15, %vm2150_vm14  ;;  %vm2159_vm2 = vweird.f32 %v4295_v5 }
 0x1e8   : > { %v2145_v15 = vmul.f32 %v4293_v6, %v2144_v4  ;;  %1242 = vst [vmem:[#allocation2 + $0xc0] sm:$0xf] %v1210_v37  ;;  %v1875_v22 = vpop.f32.mrf.mxu1  ;;  %v3346_v28 = vor.u32 %v3475_v40, %v3345_v11  ;;  %v3347_v56 = vld [vmem:[#allocation2 + $0xb8] sm:$0xf0]  ;;  %v2142_v54 = vsel %vm2141_vm13, %v3567_v29, %v2138_v8 }
 0x1e9   : > { %1402 = vst [vmem:[#allocation2 + $0xc4] sm:$0xf] %v1370_v3  ;;  %v4305_v23 = vadd.f32 %v1875_v22, %v1786_v18  ;;  %v956_v35 = vpop.f32.mrf.mxu2  ;;  %v1069_v53 = vpop.f32.mrf.mxu3  ;;  %v3350_v44 = vor.u32 %v3474_v27, %v3347_v56  ;;  %v4308_v43 = vmul.f32 %v2142_v54, %v4241_v59 }
 0x1ea   : > { %v1115_v60 = vmul.f32 %v956_v35, %v4068_v9  ;;  %v1307_v46 = vmul.f32 %v956_v35, %v4070_v10  ;;  %v1147_v0 = vmul.f32 %v1069_v53, %v4070_v10  ;;  %v1275_v51 = vmul.f32 %v1069_v53, %v4068_v9  ;;  %1825 = vmatmul.bf16.gmra.mxu0 %v3346_v28 }
 0x1eb   : > { %v2045_v29 = vand.u32 2147483647, %v4305_v23  ;;  %1914 = vmatmul.bf16.gmra.mxu1 %v3350_v44  ;;  %v2458_v63 = vmul.f32 %v4308_v43, %v4308_v43  ;;  %v2146_v32 = vmul.f32 0.5, %v2145_v15 }
 0x1ec   : > { %v1179_v34 = vsub.f32 %v1115_v60, %v1147_v0  ;;  %v1339_v45 = vadd.f32 %v1307_v46, %v1275_v51 }
 0x1ed   : > { %v3571_v59 = vpop.eup %3570  ;;  %v4317_v33 = vadd.f32 1e-10, %v2045_v29  ;;  %v2147_v1 = vsub.f32 1.5, %v2146_v32 }
 0x1ee   : > { %v2154_v10 = vmul.f32 %v3571_v59, %v4295_v5  ;;  %v1211_v2 = vpack.c.bf16 %v1179_v34, %v1179_v34  ;;  %v1371_v9 = vpack.c.bf16 %v1339_v45, %v1339_v45  ;;  %vm2160_vm1 = vweird.f32 %v3571_v59 }
 0x1ef   : > { %3572 = vrsqrt.f32 %v4317_v33  ;;  %2493 = vadd.xlane.f32.xlu1 %v2458_v63  ;;  %v1788_v48 = vpop.f32.mrf.mxu0  ;;  %v2148_v36 = vmul.f32 %v4293_v6, %v2147_v1  ;;  %v3353_v27 = vld [vmem:[#allocation2 + $0xc0] sm:$0xf]  ;;  %vm2161_vm3 = vmor %vm2159_vm2, %vm2160_vm1  ;;  %vm2169_vm5 = vweird.f32 %v4317_v33 }
 0x1f0   : > { %v2155_v58 = vmul.f32 %v3571_v59, %v2154_v10  ;;  %1243 = vst [vmem:[#allocation2 + $0xc8] sm:$0xf] %v1211_v2  ;;  %v1877_v47 = vpop.f32.mrf.mxu1  ;;  %v3476_v44 = vld [vmem:[#allocation2 + $0xc4] sm:$0xf] }
 0x1f1   : > { %1403 = vst [vmem:[#allocation2 + $0xcc] sm:$0xf] %v1371_v9  ;;  %v4324_v21 = vadd.f32 %v1877_v47, %v1788_v48  ;;  %v959_v16 = vpop.f32.mrf.mxu2  ;;  %v1072_v57 = vpop.f32.mrf.mxu3  ;;  %v2152_v61 = vsel %vm2151_vm0, %v4293_v6, %v2148_v36 }
 0x1f2   : > { %v2156_v50 = vmul.f32 0.5, %v2155_v58  ;;  %v1116_v7 = vmul.f32 %v959_v16, %v4078_v13  ;;  %v1308_v38 = vmul.f32 %v959_v16, %v4080_v14  ;;  %v1148_v4 = vmul.f32 %v1072_v57, %v4080_v14 }
 0x1f3   : > { %v2046_v49 = vand.u32 2147483647, %v4324_v21  ;;  %v1276_v37 = vmul.f32 %v1072_v57, %v4078_v13  ;;  %v4333_v8 = vmul.f32 %v2152_v61, %v4263_v12 }
 0x1f4   : > { %v1180_v3 = vsub.f32 %v1116_v7, %v1148_v4  ;;  %v2157_v18 = vsub.f32 1.5, %v2156_v50 }
 0x1f5   : > { %v3573_v11 = vpop.eup %3572  ;;  %v4335_v40 = vadd.f32 1e-10, %v2046_v49  ;;  %v1340_v6 = vadd.f32 %v1308_v38, %v1276_v37  ;;  %v2459_v15 = vmul.f32 %v4333_v8, %v4333_v8 }
 0x1f6   : > { %v2164_v22 = vmul.f32 %v3573_v11, %v4317_v33  ;;  %v1212_v14 = vpack.c.bf16 %v1180_v3, %v1180_v3  ;;  %v2158_v28 = vmul.f32 %v3571_v59, %v2157_v18  ;;  %vm2170_vm4 = vweird.f32 %v3573_v11 }
 0x1f7   : > { %3574 = vrsqrt.f32 %v4335_v40  ;;  %v1372_v13 = vpack.c.bf16 %v1340_v6, %v1340_v6  ;;  %2495 = vadd.xlane.f32.xlu2 %v2459_v15  ;;  %v1791_v12 = vpop.f32.mrf.mxu0  ;;  %v3477_v56 = vld [vmem:[#allocation2 + $0xc4] sm:$0xf0]  ;;  %vm2171_vm6 = vmor %vm2169_vm5, %vm2170_vm4  ;;  %vm2179_vm8 = vweird.f32 %v4335_v40 }
 0x1f8   : > { %v2165_v54 = vmul.f32 %v3573_v11, %v2164_v22  ;;  %1244 = vst [vmem:[#allocation2 + $0xd0] sm:$0xf] %v1212_v14  ;;  %v1880_v35 = vpop.f32.mrf.mxu1  ;;  %v3354_v53 = vor.u32 %v3477_v56, %v3353_v27  ;;  %v3355_v60 = vld [vmem:[#allocation2 + $0xc8] sm:$0xf0]  ;;  %v2162_v46 = vsel %vm2161_vm3, %v3571_v59, %v2158_v28 }
 0x1f9   : > { %1404 = vst [vmem:[#allocation2 + $0xd4] sm:$0xf] %v1372_v13  ;;  %v4343_v0 = vadd.f32 %v1880_v35, %v1791_v12  ;;  %v962_v5 = vpop.f32.mrf.mxu2  ;;  %v1075_v51 = vpop.f32.mrf.mxu3  ;;  %v3358_v29 = vor.u32 %v3476_v44, %v3355_v60  ;;  %v4346_v63 = vmul.f32 %v2162_v46, %v4282_v17 }
 0x1fa   : > { %v2166_v32 = vmul.f32 0.5, %v2165_v54  ;;  %v1117_v34 = vmul.f32 %v962_v5, %v4094_v19  ;;  %v1309_v45 = vmul.f32 %v962_v5, %v4096_v20  ;;  %v1149_v1 = vmul.f32 %v1075_v51, %v4096_v20  ;;  %1830 = vmatmul.bf16.gmra.mxu0 %v3354_v53 }
 0x1fb   : > { %v2047_v10 = vand.u32 2147483647, %v4343_v0  ;;  %v1277_v59 = vmul.f32 %v1075_v51, %v4094_v19  ;;  %1919 = vmatmul.bf16.gmra.mxu1 %v3358_v29  ;;  %v2460_v2 = vmul.f32 %v4346_v63, %v4346_v63 }
 0x1fc   : > { %v2167_v9 = vsub.f32 1.5, %v2166_v32  ;;  %v1181_v17 = vsub.f32 %v1117_v34, %v1149_v1 }
 0x1fd   : > { %v3575_v48 = vpop.eup %3574  ;;  %v4355_v36 = vadd.f32 1e-10, %v2047_v10  ;;  %v1341_v58 = vadd.f32 %v1309_v45, %v1277_v59 }
 0x1fe   : > { %v2168_v47 = vmul.f32 %v3573_v11, %v2167_v9  ;;  %v2174_v20 = vmul.f32 %v3575_v48, %v4335_v40  ;;  %v1213_v16 = vpack.c.bf16 %v1181_v17, %v1181_v17  ;;  %vm2180_vm7 = vweird.f32 %v3575_v48 }
 0x1ff   : > { %3576 = vrsqrt.f32 %v4355_v36  ;;  %v1373_v19 = vpack.c.bf16 %v1341_v58, %v1341_v58  ;;  %2497 = vadd.xlane.f32.xlu2 %v2460_v2  ;;  %v1793_v57 = vpop.f32.mrf.mxu0  ;;  %v3361_v35 = vld [vmem:[#allocation2 + $0xd0] sm:$0xf]  ;;  %vm2181_vm9 = vmor %vm2179_vm8, %vm2180_vm7  ;;  %vm2189_vm11 = vweird.f32 %v4355_v36 }
 0x200   : > { %v2172_v61 = vsel %vm2171_vm6, %v3573_v11, %v2168_v47  ;;  %v2175_v50 = vmul.f32 %v3575_v48, %v2174_v20  ;;  %1245 = vst [vmem:[#allocation2 + $0xd8] sm:$0xf] %v1213_v16  ;;  %v1882_v7 = vpop.f32.mrf.mxu1  ;;  %v3478_v5 = vld [vmem:[#allocation2 + $0xd4] sm:$0xf] }
 0x201   : > { %v4361_v38 = vmul.f32 %v2172_v61, %v4305_v23  ;;  %1405 = vst [vmem:[#allocation2 + $0xdc] sm:$0xf] %v1373_v19  ;;  %v4363_v4 = vadd.f32 %v1882_v7, %v1793_v57  ;;  %v965_v33 = vpop.f32.mrf.mxu2  ;;  %v1078_v49 = vpop.f32.mrf.mxu3 }
 0x202   : > { %v2176_v37 = vmul.f32 0.5, %v2175_v50  ;;  %v1118_v3 = vmul.f32 %v965_v33, %v4104_v25  ;;  %v1310_v18 = vmul.f32 %v965_v33, %v4106_v26  ;;  %v1150_v6 = vmul.f32 %v1078_v49, %v4106_v26 }
 0x203   : > { %v2048_v11 = vand.u32 2147483647, %v4363_v4  ;;  %v1278_v15 = vmul.f32 %v1078_v49, %v4104_v25  ;;  %v2461_v23 = vmul.f32 %v4361_v38, %v4361_v38 }
 0x204   : > { %v1182_v22 = vsub.f32 %v1118_v3, %v1150_v6  ;;  %v2177_v14 = vsub.f32 1.5, %v2176_v37 }
 0x205   : > { %v3577_v28 = vpop.eup %3576  ;;  %v4372_v13 = vadd.f32 1e-10, %v2048_v11  ;;  %v1342_v12 = vadd.f32 %v1310_v18, %v1278_v15  ;;  %2499 = vadd.xlane.f32.xlu0 %v2461_v23 }
 0x206   : > { %v2184_v27 = vmul.f32 %v3577_v28, %v4355_v36  ;;  %v1214_v56 = vpack.c.bf16 %v1182_v22, %v1182_v22  ;;  %v2178_v54 = vmul.f32 %v3575_v48, %v2177_v14  ;;  %vm2190_vm10 = vweird.f32 %v3577_v28 }
 0x207   : > { %3578 = vrsqrt.f32 %v4372_v13  ;;  %v1374_v25 = vpack.c.bf16 %v1342_v12, %v1342_v12  ;;  %v1796_v26 = vpop.f32.mrf.mxu0  ;;  %v3479_v53 = vld [vmem:[#allocation2 + $0xd4] sm:$0xf0]  ;;  %vm2191_vm12 = vmor %vm2189_vm11, %vm2190_vm10  ;;  %vm2199_vm14 = vweird.f32 %v4372_v13 }
 0x208   : > { %v2185_v44 = vmul.f32 %v3577_v28, %v2184_v27  ;;  %1246 = vst [vmem:[#allocation2 + $0xe0] sm:$0xf] %v1214_v56  ;;  %v1885_v60 = vpop.f32.mrf.mxu1  ;;  %v3362_v46 = vor.u32 %v3479_v53, %v3361_v35  ;;  %v3363_v51 = vld [vmem:[#allocation2 + $0xd8] sm:$0xf0]  ;;  %v2182_v29 = vsel %vm2181_vm9, %v3575_v48, %v2178_v54 }
 0x209   : > { %1406 = vst [vmem:[#allocation2 + $0xe4] sm:$0xf] %v1374_v25  ;;  %v4377_v32 = vadd.f32 %v1885_v60, %v1796_v26  ;;  %v968_v34 = vpop.f32.mrf.mxu2  ;;  %v1081_v45 = vpop.f32.mrf.mxu3  ;;  %v3366_v40 = vor.u32 %v3478_v5, %v3363_v51  ;;  %v4380_v1 = vmul.f32 %v2182_v29, %v4324_v21 }
 0x20a   : > { %v2186_v10 = vmul.f32 0.5, %v2185_v44  ;;  %v1119_v59 = vmul.f32 %v968_v34, %v4111_v30  ;;  %v1311_v2 = vmul.f32 %v968_v34, %v4113_v31  ;;  %v1151_v9 = vmul.f32 %v1081_v45, %v4113_v31  ;;  %1835 = vmatmul.bf16.gmra.mxu0 %v3362_v46 }
 0x20b   : > { %v2049_v17 = vand.u32 2147483647, %v4377_v32  ;;  %v1279_v48 = vmul.f32 %v1081_v45, %v4111_v30  ;;  %1924 = vmatmul.bf16.gmra.mxu1 %v3366_v40  ;;  %v2462_v58 = vmul.f32 %v4380_v1, %v4380_v1 }
 0x20c   : > { %v2187_v47 = vsub.f32 1.5, %v2186_v10  ;;  %v1183_v21 = vsub.f32 %v1119_v59, %v1151_v9 }
 0x20d   : > { %v3579_v20 = vpop.eup %3578  ;;  %v4389_v16 = vadd.f32 1e-10, %v2049_v17  ;;  %v1343_v19 = vadd.f32 %v1311_v2, %v1279_v48  ;;  %2501 = vadd.xlane.f32.xlu1 %v2462_v58 }
 0x20e   : > { %v2188_v57 = vmul.f32 %v3577_v28, %v2187_v47  ;;  %v2194_v31 = vmul.f32 %v3579_v20, %v4372_v13  ;;  %v1215_v61 = vpack.c.bf16 %v1183_v21, %v1183_v21  ;;  %vm2200_vm13 = vweird.f32 %v3579_v20 }
 0x20f   : > { %3580 = vrsqrt.f32 %v4389_v16  ;;  %v1375_v30 = vpack.c.bf16 %v1343_v19, %v1343_v19  ;;  %v1798_v50 = vpop.f32.mrf.mxu0  ;;  %vm2201_vm15 = vmor %vm2199_vm14, %vm2200_vm13  ;;  %v3369_v53 = vld [vmem:[#allocation2 + $0xe0] sm:$0xf]  ;;  %vm2209_vm1 = vweird.f32 %v4389_v16 }
 0x210   : > { %v2192_v7 = vsel %vm2191_vm12, %v3577_v28, %v2188_v57  ;;  %v2195_v33 = vmul.f32 %v3579_v20, %v2194_v31  ;;  %1247 = vst [vmem:[#allocation2 + $0xe8] sm:$0xf] %v1215_v61  ;;  %v1887_v49 = vpop.f32.mrf.mxu1  ;;  %v3480_v29 = vld [vmem:[#allocation2 + $0xe4] sm:$0xf] }
 0x211   : > { %v4395_v37 = vmul.f32 %v2192_v7, %v4343_v0  ;;  %1407 = vst [vmem:[#allocation2 + $0xec] sm:$0xf] %v1375_v30  ;;  %v4397_v3 = vadd.f32 %v1887_v49, %v1798_v50  ;;  %v971_v18 = vpop.f32.mrf.mxu2  ;;  %v1084_v36 = vpop.f32.mrf.mxu3 }
 0x212   : > { %v2196_v6 = vmul.f32 0.5, %v2195_v33  ;;  %v1120_v11 = vmul.f32 %v971_v18, %v4124_v41  ;;  %v1312_v15 = vmul.f32 %v971_v18, %v4126_v42  ;;  %v1152_v23 = vmul.f32 %v1084_v36, %v4126_v42 }
 0x213   : > { %v2050_v22 = vand.u32 2147483647, %v4397_v3  ;;  %v1280_v14 = vmul.f32 %v1084_v36, %v4124_v41  ;;  %v2463_v0 = vmul.f32 %v4395_v37, %v4395_v37 }
 0x214   : > { %v2197_v28 = vsub.f32 1.5, %v2196_v6  ;;  %v1184_v12 = vsub.f32 %v1120_v11, %v1152_v23 }
 0x215   : > { %v3581_v27 = vpop.eup %3580  ;;  %v4406_v56 = vadd.f32 1e-10, %v2050_v22  ;;  %v1344_v54 = vadd.f32 %v1312_v15, %v1280_v14  ;;  %2503 = vadd.xlane.f32.xlu2 %v2463_v0 }
 0x216   : > { %v2198_v25 = vmul.f32 %v3579_v20, %v2197_v28  ;;  %v2204_v42 = vmul.f32 %v3581_v27, %v4389_v16  ;;  %v1216_v26 = vpack.c.bf16 %v1184_v12, %v1184_v12  ;;  %vm2210_vm0 = vweird.f32 %v3581_v27 }
 0x217   : > { %3582 = vrsqrt.f32 %v4406_v56  ;;  %v1376_v41 = vpack.c.bf16 %v1344_v54, %v1344_v54  ;;  %v1801_v35 = vpop.f32.mrf.mxu0  ;;  %v3481_v44 = vld [vmem:[#allocation2 + $0xe4] sm:$0xf0]  ;;  %vm2211_vm2 = vmor %vm2209_vm1, %vm2210_vm0  ;;  %vm2219_vm4 = vweird.f32 %v4406_v56 }
 0x218   : > { %v2202_v60 = vsel %vm2201_vm15, %v3579_v20, %v2198_v25  ;;  %v2205_v46 = vmul.f32 %v3581_v27, %v2204_v42  ;;  %1248 = vst [vmem:[#allocation2 + $0xf0] sm:$0xf] %v1216_v26  ;;  %v1890_v5 = vpop.f32.mrf.mxu1  ;;  %v3370_v51 = vor.u32 %v3481_v44, %v3369_v53  ;;  %v3371_v34 = vld [vmem:[#allocation2 + $0xe8] sm:$0xf0] }
 0x219   : > { %v4412_v45 = vmul.f32 %v2202_v60, %v4363_v4  ;;  %1408 = vst [vmem:[#allocation2 + $0xf4] sm:$0xf] %v1376_v41  ;;  %v4414_v13 = vadd.f32 %v1890_v5, %v1801_v35  ;;  %v974_v40 = vpop.f32.mrf.mxu2  ;;  %v1087_v10 = vpop.f32.mrf.mxu3  ;;  %v3374_v59 = vor.u32 %v3480_v29, %v3371_v34 }
 0x21a   : > { %v2206_v2 = vmul.f32 0.5, %v2205_v46  ;;  %v1121_v9 = vmul.f32 %v974_v40, %v4137_v52  ;;  %v1313_v17 = vmul.f32 %v974_v40, %v4139_v55  ;;  %v1153_v48 = vmul.f32 %v1087_v10, %v4139_v55  ;;  %1840 = vmatmul.bf16.gmra.mxu0 %v3370_v51 }
 0x21b   : > { %v2051_v58 = vand.u32 2147483647, %v4414_v13  ;;  %v1281_v47 = vmul.f32 %v1087_v10, %v4137_v52  ;;  %1929 = vmatmul.bf16.gmra.mxu1 %v3374_v59  ;;  %v2464_v4 = vmul.f32 %v4412_v45, %v4412_v45 }
 0x21c   : > { %v2207_v21 = vsub.f32 1.5, %v2206_v2  ;;  %v1185_v20 = vsub.f32 %v1121_v9, %v1153_v48 }
 0x21d   : > { %v3583_v19 = vpop.eup %3582  ;;  %v2083_v57 = vadd.f32 1e-10, %v2051_v58  ;;  %v1345_v31 = vadd.f32 %v1313_v17, %v1281_v47  ;;  %2505 = vadd.xlane.f32.xlu0 %v2464_v4 }
 0x21e   : > { %v2208_v61 = vmul.f32 %v3581_v27, %v2207_v21  ;;  %v2214_v55 = vmul.f32 %v3583_v19, %v4406_v56  ;;  %v1217_v30 = vpack.c.bf16 %v1185_v20, %v1185_v20  ;;  %vm2220_vm3 = vweird.f32 %v3583_v19 }
 0x21f   : > { %3584 = vrsqrt.f32 %v2083_v57  ;;  %v1377_v52 = vpack.c.bf16 %v1345_v31, %v1345_v31  ;;  %v1803_v50 = vpop.f32.mrf.mxu0  ;;  %vm2221_vm5 = vmor %vm2219_vm4, %vm2220_vm3  ;;  %v3377_v28 = vld [vmem:[#allocation2 + $0xf0] sm:$0xf]  ;;  %vm2229_vm7 = vweird.f32 %v2083_v57 }
 0x220   : > { %v2212_v7 = vsel %vm2211_vm2, %v3581_v27, %v2208_v61  ;;  %v2215_v33 = vmul.f32 %v3583_v19, %v2214_v55  ;;  %1249 = vst [vmem:[#allocation2 + $0xf8] sm:$0xf] %v1217_v30  ;;  %v1892_v49 = vpop.f32.mrf.mxu1  ;;  %v3482_v26 = vld [vmem:[#allocation2 + $0xf4] sm:$0xf] }
 0x221   : > { %v4426_v18 = vmul.f32 %v2212_v7, %v4377_v32  ;;  %1409 = vst [vmem:[#allocation2 + $0xfc] sm:$0xf] %v1377_v52  ;;  %v4428_v36 = vadd.f32 %v1892_v49, %v1803_v50 }
 0x222   : > { %v2216_v6 = vmul.f32 0.5, %v2215_v33 }
 0x223   : > { %v2052_v16 = vand.u32 2147483647, %v4428_v36  ;;  %v2465_v11 = vmul.f32 %v4426_v18, %v4426_v18 }
 0x224   : > { %v2217_v15 = vsub.f32 1.5, %v2216_v6 }
 0x225   : > { %v3585_v23 = vpop.eup %3584  ;;  %v2084_v22 = vadd.f32 1e-10, %v2052_v16  ;;  %2507 = vadd.xlane.f32.xlu1 %v2465_v11 }
 0x226   : > { %v2218_v14 = vmul.f32 %v3583_v19, %v2217_v15  ;;  %v2224_v0 = vmul.f32 %v3585_v23, %v2083_v57  ;;  %vm2230_vm6 = vweird.f32 %v3585_v23 }
 0x227   : > { %3586 = vrsqrt.f32 %v2084_v22  ;;  %v1806_v32 = vpop.f32.mrf.mxu0  ;;  %v3483_v12 = vld [vmem:[#allocation2 + $0xf4] sm:$0xf0]  ;;  %vm2231_vm8 = vmor %vm2229_vm7, %vm2230_vm6  ;;  %vm2239_vm10 = vweird.f32 %v2084_v22 }
 0x228   : > { %v2222_v27 = vsel %vm2221_vm5, %v3583_v19, %v2218_v14  ;;  %v2225_v54 = vmul.f32 %v3585_v23, %v2224_v0  ;;  %v1895_v25 = vpop.f32.mrf.mxu1  ;;  %v3378_v42 = vor.u32 %v3483_v12, %v3377_v28  ;;  %v3379_v41 = vld [vmem:[#allocation2 + $0xf8] sm:$0xf0] }
 0x229   : > { %v4435_v35 = vmul.f32 %v2222_v27, %v4397_v3  ;;  %v1896_v53 = vadd.f32 %v1895_v25, %v1806_v32  ;;  %v3382_v44 = vor.u32 %v3482_v26, %v3379_v41 }
 0x22a   : > { %v2226_v60 = vmul.f32 0.5, %v2225_v54  ;;  %1845 = vmatmul.bf16.gmra.mxu0 %v3378_v42 }
 0x22b   : > { %v2053_v56 = vand.u32 2147483647, %v1896_v53  ;;  %1934 = vmatmul.bf16.gmra.mxu1 %v3382_v44  ;;  %v2466_v46 = vmul.f32 %v4435_v35, %v4435_v35 }
 0x22c   : > { %v2227_v5 = vsub.f32 1.5, %v2226_v60 }
 0x22d   : > { %v3587_v51 = vpop.eup %3586  ;;  %v2085_v29 = vadd.f32 1e-10, %v2053_v56  ;;  %2509 = vadd.xlane.f32.xlu2 %v2466_v46 }
 0x22e   : > { %v2228_v34 = vmul.f32 %v3585_v23, %v2227_v5  ;;  %v2234_v40 = vmul.f32 %v3587_v51, %v2084_v22  ;;  %vm2240_vm9 = vweird.f32 %v3587_v51 }
 0x22f   : > { %3588 = vrsqrt.f32 %v2085_v29  ;;  %v1808_v3 = vpop.f32.mrf.mxu0  ;;  %vm2241_vm11 = vmor %vm2239_vm10, %vm2240_vm9  ;;  %vm2249_vm13 = vweird.f32 %v2085_v29 }
 0x230   : > { %v2232_v10 = vsel %vm2231_vm8, %v3585_v23, %v2228_v34  ;;  %v2235_v59 = vmul.f32 %v3587_v51, %v2234_v40  ;;  %v1897_v2 = vpop.f32.mrf.mxu1 }
 0x231   : > { %v4440_v9 = vmul.f32 %v2232_v10, %v4414_v13  ;;  %v1898_v17 = vadd.f32 %v1897_v2, %v1808_v3 }
 0x232   : > { %v2236_v48 = vmul.f32 0.5, %v2235_v59 }
 0x233   : > { %v2054_v58 = vand.u32 2147483647, %v1898_v17  ;;  %v2467_v47 = vmul.f32 %v4440_v9, %v4440_v9 }
 0x234   : > { %v2237_v4 = vsub.f32 1.5, %v2236_v48 }
 0x235   : > { %v3589_v21 = vpop.eup %3588  ;;  %v2086_v20 = vadd.f32 1e-10, %v2054_v58  ;;  %2511 = vadd.xlane.f32.xlu0 %v2467_v47 }
 0x236   : > { %v2238_v19 = vmul.f32 %v3587_v51, %v2237_v4  ;;  %v2244_v57 = vmul.f32 %v3589_v21, %v2085_v29  ;;  %vm2250_vm12 = vweird.f32 %v3589_v21 }
 0x237   : > { %3590 = vrsqrt.f32 %v2086_v20  ;;  %v1811_v31 = vpop.f32.mrf.mxu0  ;;  %vm2251_vm14 = vmor %vm2249_vm13, %vm2250_vm12  ;;  %vm2259_vm0 = vweird.f32 %v2086_v20 }
 0x238   : > { %v2242_v61 = vsel %vm2241_vm11, %v3587_v51, %v2238_v19  ;;  %v2245_v13 = vmul.f32 %v3589_v21, %v2244_v57  ;;  %v1900_v55 = vpop.f32.mrf.mxu1 }
 0x239   : > { %v4445_v30 = vmul.f32 %v2242_v61, %v4428_v36  ;;  %v1901_v52 = vadd.f32 %v1900_v55, %v1811_v31 }
 0x23a   : > { %v2246_v50 = vmul.f32 0.5, %v2245_v13 }
 0x23b   : > { %v2055_v7 = vand.u32 2147483647, %v1901_v52  ;;  %v2468_v33 = vmul.f32 %v4445_v30, %v4445_v30 }
 0x23c   : > { %v2247_v49 = vsub.f32 1.5, %v2246_v50 }
 0x23d   : > { %v3591_v6 = vpop.eup %3590  ;;  %v2087_v16 = vadd.f32 1e-10, %v2055_v7  ;;  %2513 = vadd.xlane.f32.xlu1 %v2468_v33 }
 0x23e   : > { %v2248_v11 = vmul.f32 %v3589_v21, %v2247_v49  ;;  %v2254_v15 = vmul.f32 %v3591_v6, %v2086_v20  ;;  %vm2260_vm15 = vweird.f32 %v3591_v6 }
 0x23f   : > { %3592 = vrsqrt.f32 %v2087_v16  ;;  %v1813_v23 = vpop.f32.mrf.mxu0  ;;  %vm2261_vm1 = vmor %vm2259_vm0, %vm2260_vm15  ;;  %vm2269_vm3 = vweird.f32 %v2087_v16 }
 0x240   : > { %v2252_v22 = vsel %vm2251_vm14, %v3589_v21, %v2248_v11  ;;  %v2255_v36 = vmul.f32 %v3591_v6, %v2254_v15  ;;  %v1902_v14 = vpop.f32.mrf.mxu1 }
 0x241   : > { %v4449_v0 = vmul.f32 %v2252_v22, %v1896_v53  ;;  %v4451_v32 = vadd.f32 %v1902_v14, %v1813_v23 }
 0x242   : > { %v2256_v28 = vmul.f32 0.5, %v2255_v36 }
 0x243   : > { %v2056_v12 = vand.u32 2147483647, %v4451_v32  ;;  %v2469_v27 = vmul.f32 %v4449_v0, %v4449_v0 }
 0x244   : > { %v2257_v54 = vsub.f32 1.5, %v2256_v28 }
 0x245   : > { %v3593_v25 = vpop.eup %3592  ;;  %v2088_v42 = vadd.f32 1e-10, %v2056_v12  ;;  %2515 = vadd.xlane.f32.xlu2 %v2469_v27 }
 0x246   : > { %v2258_v26 = vmul.f32 %v3591_v6, %v2257_v54  ;;  %v2264_v41 = vmul.f32 %v3593_v25, %v2087_v16  ;;  %vm2270_vm2 = vweird.f32 %v3593_v25 }
 0x247   : > { %3594 = vrsqrt.f32 %v2088_v42  ;;  %v1816_v53 = vpop.f32.mrf.mxu0  ;;  %vm2271_vm4 = vmor %vm2269_vm3, %vm2270_vm2  ;;  %vm2279_vm6 = vweird.f32 %v2088_v42 }
 0x248   : > { %v2262_v44 = vsel %vm2261_vm1, %v3591_v6, %v2258_v26  ;;  %v2265_v60 = vmul.f32 %v3593_v25, %v2264_v41  ;;  %v1905_v56 = vpop.f32.mrf.mxu1 }
 0x249   : > { %v4456_v46 = vmul.f32 %v2262_v44, %v1898_v17  ;;  %v4458_v5 = vadd.f32 %v1905_v56, %v1816_v53 }
 0x24a   : > { %v2266_v51 = vmul.f32 0.5, %v2265_v60  ;;  %v2488_v29 = vpop.xlane.xlu0 %2487 }
 0x24b   : > { %v2551_v34 = vmax.f32 %v2488_v29, 1e-24  ;;  %v2057_v40 = vand.u32 2147483647, %v4458_v5  ;;  %v2470_v3 = vmul.f32 %v4456_v46, %v4456_v46 }
 0x24c   : > { %v2267_v10 = vsub.f32 1.5, %v2266_v51 }
 0x24d   : > { %v3595_v59 = vpop.eup %3594  ;;  %3596 = vrsqrt.f32 %v2551_v34  ;;  %v4463_v2 = vadd.f32 1e-10, %v2057_v40  ;;  %2517 = vadd.xlane.f32.xlu0 %v2470_v3  ;;  %vm2589_vm9 = vweird.f32 %v2551_v34 }
 0x24e   : > { %v2268_v48 = vmul.f32 %v3593_v25, %v2267_v10  ;;  %v2274_v17 = vmul.f32 %v3595_v59, %v2088_v42  ;;  %vm2280_vm5 = vweird.f32 %v3595_v59 }
 0x24f   : > { %3598 = vrsqrt.f32 %v4463_v2  ;;  %v1818_v58 = vpop.f32.mrf.mxu0  ;;  %vm2281_vm7 = vmor %vm2279_vm6, %vm2280_vm5  ;;  %vm2289_vm12 = vweird.f32 %v4463_v2 }
 0x250   : > { %v2272_v47 = vsel %vm2271_vm4, %v3593_v25, %v2268_v48  ;;  %v2275_v4 = vmul.f32 %v3595_v59, %v2274_v17  ;;  %v1907_v21 = vpop.f32.mrf.mxu1 }
 0x251   : > { %v4466_v20 = vmul.f32 %v2272_v47, %v1901_v52  ;;  %v4468_v19 = vadd.f32 %v1907_v21, %v1818_v58 }
 0x252   : > { %v2276_v57 = vmul.f32 0.5, %v2275_v4  ;;  %v2490_v31 = vpop.xlane.xlu0 %2489 }
 0x253   : > { %v3597_v61 = vpop.eup %3596  ;;  %v4470_v13 = vmax.f32 %v2490_v31, 1e-24  ;;  %v2058_v55 = vand.u32 2147483647, %v4468_v19  ;;  %v2471_v50 = vmul.f32 %v4466_v20, %v4466_v20 }
 0x254   : > { %v2277_v7 = vsub.f32 1.5, %v2276_v57  ;;  %v2584_v33 = vmul.f32 %v3597_v61, %v2551_v34  ;;  %vm2590_vm8 = vweird.f32 %v3597_v61 }
 0x255   : > { %v3599_v49 = vpop.eup %3598  ;;  %3600 = vrsqrt.f32 %v4470_v13  ;;  %v4476_v52 = vadd.f32 1e-10, %v2058_v55  ;;  %2519 = vadd.xlane.f32.xlu1 %v2471_v50  ;;  %vm2591_vm11 = vmor %vm2589_vm9, %vm2590_vm8  ;;  %vm2599_vm15 = vweird.f32 %v4470_v13 }
 0x256   : > { %v2278_v6 = vmul.f32 %v3595_v59, %v2277_v7  ;;  %v2585_v16 = vmul.f32 %v3597_v61, %v2584_v33  ;;  %v2284_v11 = vmul.f32 %v3599_v49, %v4463_v2  ;;  %vm2290_vm10 = vweird.f32 %v3599_v49 }
 0x257   : > { %3602 = vrsqrt.f32 %v4476_v52  ;;  %v1821_v15 = vpop.f32.mrf.mxu0  ;;  %vm2291_vm13 = vmor %vm2289_vm12, %vm2290_vm10  ;;  %vm2299_vm2 = vweird.f32 %v4476_v52 }
 0x258   : > { %v2282_v23 = vsel %vm2281_vm7, %v3595_v59, %v2278_v6  ;;  %v2586_v22 = vmul.f32 0.5, %v2585_v16  ;;  %v2285_v36 = vmul.f32 %v3599_v49, %v2284_v11  ;;  %v1910_v14 = vpop.f32.mrf.mxu1 }
 0x259   : > { %v4482_v28 = vmul.f32 %v2282_v23, %v4451_v32  ;;  %v4484_v12 = vadd.f32 %v1910_v14, %v1821_v15 }
 0x25a   : > { %v2587_v27 = vsub.f32 1.5, %v2586_v22  ;;  %v2286_v54 = vmul.f32 0.5, %v2285_v36  ;;  %v2492_v25 = vpop.xlane.xlu1 %2491 }
 0x25b   : > { %v3601_v42 = vpop.eup %3600  ;;  %v4488_v26 = vmax.f32 %v2492_v25, 1e-24  ;;  %v2059_v41 = vand.u32 2147483647, %v4484_v12  ;;  %v2472_v53 = vmul.f32 %v4482_v28, %v4482_v28 }
 0x25c   : > { %v2588_v44 = vmul.f32 %v3597_v61, %v2587_v27  ;;  %v2287_v32 = vsub.f32 1.5, %v2286_v54  ;;  %v2594_v60 = vmul.f32 %v3601_v42, %v4470_v13  ;;  %vm2600_vm14 = vweird.f32 %v3601_v42 }
 0x25d   : > { %v3603_v56 = vpop.eup %3602  ;;  %3604 = vrsqrt.f32 %v4488_v26  ;;  %v4496_v51 = vadd.f32 1e-10, %v2059_v41  ;;  %2521 = vadd.xlane.f32.xlu2 %v2472_v53  ;;  %vm2601_vm1 = vmor %vm2599_vm15, %vm2600_vm14  ;;  %vm2609_vm5 = vweird.f32 %v4488_v26 }
 0x25e   : > { %v2592_v29 = vsel %vm2591_vm11, %v3597_v61, %v2588_v44  ;;  %v2288_v34 = vmul.f32 %v3599_v49, %v2287_v32  ;;  %v2595_v40 = vmul.f32 %v3601_v42, %v2594_v60  ;;  %v2294_v3 = vmul.f32 %v3603_v56, %v4476_v52 }
 0x25f   : > { %v2903_v10 = vmul.f32 %v2592_v29, %v4249_v62  ;;  %3606 = vrsqrt.f32 %v4496_v51  ;;  %v1823_v59 = vpop.f32.mrf.mxu0  ;;  %vm2300_vm0 = vweird.f32 %v3603_v56  ;;  %vm2309_vm8 = vweird.f32 %v4496_v51 }
 0x260   : > { %v2292_v48 = vsel %vm2291_vm13, %v3599_v49, %v2288_v34  ;;  %v2596_v17 = vmul.f32 0.5, %v2595_v40  ;;  %v2295_v58 = vmul.f32 %v3603_v56, %v2294_v3  ;;  %v1912_v2 = vpop.f32.mrf.mxu1  ;;  %vm2301_vm3 = vmor %vm2299_vm2, %vm2300_vm0 }
 0x261   : > { %2935 = vst [vmem:[%s4501_s10] sm:$0xff] %v2903_v10  ;;  %v4505_v47 = vmul.f32 %v2292_v48, %v4458_v5  ;;  %v4507_v4 = vadd.f32 %v1912_v2, %v1823_v59 }
 0x262   : > { %v2597_v21 = vsub.f32 1.5, %v2596_v17  ;;  %v2296_v62 = vmul.f32 0.5, %v2295_v58  ;;  %v2494_v57 = vpop.xlane.xlu1 %2493 }
 0x263   : > { %v3605_v31 = vpop.eup %3604  ;;  %v4510_v61 = vmax.f32 %v2494_v57, 1e-24  ;;  %v2060_v55 = vand.u32 2147483647, %v4507_v4  ;;  %v2473_v50 = vmul.f32 %v4505_v47, %v4505_v47 }
 0x264   : > { %v2598_v7 = vmul.f32 %v3601_v42, %v2597_v21  ;;  %v2297_v33 = vsub.f32 1.5, %v2296_v62  ;;  %v2604_v5 = vmul.f32 %v3605_v31, %v4488_v26  ;;  %vm2610_vm4 = vweird.f32 %v3605_v31 }
 0x265   : > { %v3607_v49 = vpop.eup %3606  ;;  %3608 = vrsqrt.f32 %v4510_v61  ;;  %v4518_v13 = vadd.f32 1e-10, %v2060_v55  ;;  %2523 = vadd.xlane.f32.xlu0 %v2473_v50  ;;  %vm2611_vm7 = vmor %vm2609_vm5, %vm2610_vm4  ;;  %vm2619_vm11 = vweird.f32 %v4510_v61 }
 0x266   : > { %v2602_v6 = vsel %vm2601_vm1, %v3601_v42, %v2598_v7  ;;  %v2298_v16 = vmul.f32 %v3603_v56, %v2297_v33  ;;  %v2605_v11 = vmul.f32 %v3605_v31, %v2604_v5  ;;  %v2304_v15 = vmul.f32 %v3607_v49, %v4496_v51 }
 0x267   : > { %v2904_v23 = vmul.f32 %v2602_v6, %v4266_v24  ;;  %3610 = vrsqrt.f32 %v4518_v13  ;;  %v1826_v22 = vpop.f32.mrf.mxu0  ;;  %vm2310_vm6 = vweird.f32 %v3607_v49  ;;  %vm2319_vm14 = vweird.f32 %v4518_v13 }
 0x268   : > { %v2302_v36 = vsel %vm2301_vm3, %v3603_v56, %v2298_v16  ;;  %v2606_v14 = vmul.f32 0.5, %v2605_v11  ;;  %v2305_v52 = vmul.f32 %v3607_v49, %v2304_v15  ;;  %v1915_v27 = vpop.f32.mrf.mxu1  ;;  %vm2311_vm9 = vmor %vm2309_vm8, %vm2310_vm6 }
 0x269   : > { %2936 = vst [vmem:[%s4501_s10 + $0x8] sm:$0xff] %v2904_v23  ;;  %v4525_v54 = vmul.f32 %v2302_v36, %v4468_v19  ;;  %v4527_v25 = vadd.f32 %v1915_v27, %v1826_v22 }
 0x26a   : > { %v2607_v42 = vsub.f32 1.5, %v2606_v14  ;;  %v2306_v41 = vmul.f32 0.5, %v2305_v52  ;;  %v2496_v53 = vpop.xlane.xlu2 %2495 }
 0x26b   : > { %v3609_v44 = vpop.eup %3608  ;;  %v4530_v24 = vmax.f32 %v2496_v53, 1e-24  ;;  %v2061_v32 = vand.u32 2147483647, %v4527_v25  ;;  %v2474_v60 = vmul.f32 %v4525_v54, %v4525_v54 }
 0x26c   : > { %v2608_v56 = vmul.f32 %v3605_v31, %v2607_v42  ;;  %v2307_v29 = vsub.f32 1.5, %v2306_v41  ;;  %v2614_v19 = vmul.f32 %v3609_v44, %v4510_v61  ;;  %vm2620_vm10 = vweird.f32 %v3609_v44 }
 0x26d   : > { %v3611_v34 = vpop.eup %3610  ;;  %3612 = vrsqrt.f32 %v4530_v24  ;;  %v4538_v26 = vadd.f32 1e-10, %v2061_v32  ;;  %2525 = vadd.xlane.f32.xlu1 %v2474_v60  ;;  %vm2621_vm13 = vmor %vm2619_vm11, %vm2620_vm10  ;;  %vm2629_vm1 = vweird.f32 %v4530_v24 }
 0x26e   : > { %v2612_v40 = vsel %vm2611_vm7, %v3605_v31, %v2608_v56  ;;  %v2308_v3 = vmul.f32 %v3607_v49, %v2307_v29  ;;  %v2615_v10 = vmul.f32 %v3609_v44, %v2614_v19  ;;  %v2314_v59 = vmul.f32 %v3611_v34, %v4518_v13 }
 0x26f   : > { %v2905_v48 = vmul.f32 %v2612_v40, %v4291_v39  ;;  %3614 = vrsqrt.f32 %v4538_v26  ;;  %v1828_v17 = vpop.f32.mrf.mxu0  ;;  %vm2320_vm12 = vweird.f32 %v3611_v34  ;;  %vm2329_vm4 = vweird.f32 %v4538_v26 }
 0x270   : > { %v2312_v58 = vsel %vm2311_vm9, %v3607_v49, %v2308_v3  ;;  %v2616_v2 = vmul.f32 0.5, %v2615_v10  ;;  %v2315_v51 = vmul.f32 %v3611_v34, %v2314_v59  ;;  %v1917_v21 = vpop.f32.mrf.mxu1  ;;  %vm2321_vm15 = vmor %vm2319_vm14, %vm2320_vm12 }
 0x271   : > { %2937 = vst [vmem:[%s4501_s10 + $0x10] sm:$0xff] %v2905_v48  ;;  %v4545_v62 = vmul.f32 %v2312_v58, %v4484_v12  ;;  %v4547_v57 = vadd.f32 %v1917_v21, %v1828_v17 }
 0x272   : > { %v2617_v31 = vsub.f32 1.5, %v2616_v2  ;;  %v2316_v55 = vmul.f32 0.5, %v2315_v51  ;;  %v2498_v50 = vpop.xlane.xlu2 %2497 }
 0x273   : > { %v3613_v7 = vpop.eup %3612  ;;  %v4550_v39 = vmax.f32 %v2498_v50, 1e-24  ;;  %v2062_v33 = vand.u32 2147483647, %v4547_v57  ;;  %v2475_v5 = vmul.f32 %v4545_v62, %v4545_v62 }
 0x274   : > { %v2618_v49 = vmul.f32 %v3609_v44, %v2617_v31  ;;  %v2317_v6 = vsub.f32 1.5, %v2316_v55  ;;  %v2624_v12 = vmul.f32 %v3613_v7, %v4530_v24  ;;  %vm2630_vm0 = vweird.f32 %v3613_v7 }
 0x275   : > { %v3615_v16 = vpop.eup %3614  ;;  %3616 = vrsqrt.f32 %v4550_v39  ;;  %v4558_v61 = vadd.f32 1e-10, %v2062_v33  ;;  %2527 = vadd.xlane.f32.xlu2 %v2475_v5  ;;  %vm2631_vm3 = vmor %vm2629_vm1, %vm2630_vm0  ;;  %vm2639_vm7 = vweird.f32 %v4550_v39 }
 0x276   : > { %v2622_v11 = vsel %vm2621_vm13, %v3609_v44, %v2618_v49  ;;  %v2318_v15 = vmul.f32 %v3611_v34, %v2317_v6  ;;  %v2625_v23 = vmul.f32 %v3613_v7, %v2624_v12  ;;  %v2324_v22 = vmul.f32 %v3615_v16, %v4538_v26 }
 0x277   : > { %v2906_v36 = vmul.f32 %v2622_v11, %v4308_v43  ;;  %3618 = vrsqrt.f32 %v4558_v61  ;;  %v1831_v14 = vpop.f32.mrf.mxu0  ;;  %vm2330_vm2 = vweird.f32 %v3615_v16  ;;  %vm2339_vm10 = vweird.f32 %v4558_v61 }
 0x278   : > { %v2322_v52 = vsel %vm2321_vm15, %v3611_v34, %v2318_v15  ;;  %v2626_v27 = vmul.f32 0.5, %v2625_v23  ;;  %v2325_v13 = vmul.f32 %v3615_v16, %v2324_v22  ;;  %v2500_v42 = vpop.xlane.xlu0 %2499  ;;  %v1920_v41 = vpop.f32.mrf.mxu1  ;;  %vm2331_vm5 = vmor %vm2329_vm4, %vm2330_vm2 }
 0x279   : > { %2938 = vst [vmem:[%s4501_s10 + $0x18] sm:$0xff] %v2906_v36  ;;  %v4565_v53 = vmul.f32 %v2322_v52, %v4507_v4  ;;  %v4567_v44 = vmax.f32 %v2500_v42, 1e-24  ;;  %v4569_v32 = vadd.f32 %v1920_v41, %v1831_v14 }
 0x27a   : > { %v2627_v60 = vsub.f32 1.5, %v2626_v27  ;;  %v2326_v43 = vmul.f32 0.5, %v2325_v13 }
 0x27b   : > { %v3617_v56 = vpop.eup %3616  ;;  %3620 = vrsqrt.f32 %v4567_v44  ;;  %v2063_v29 = vand.u32 2147483647, %v4569_v32  ;;  %v2476_v19 = vmul.f32 %v4565_v53, %v4565_v53  ;;  %vm2649_vm13 = vweird.f32 %v4567_v44 }
 0x27c   : > { %v2628_v34 = vmul.f32 %v3613_v7, %v2627_v60  ;;  %v2327_v4 = vsub.f32 1.5, %v2326_v43  ;;  %v2634_v40 = vmul.f32 %v3617_v56, %v4550_v39  ;;  %vm2640_vm6 = vweird.f32 %v3617_v56 }
 0x27d   : > { %v3619_v3 = vpop.eup %3618  ;;  %v4578_v10 = vadd.f32 1e-10, %v2063_v29  ;;  %2529 = vadd.xlane.f32.xlu0 %v2476_v19  ;;  %vm2641_vm9 = vmor %vm2639_vm7, %vm2640_vm6 }
 0x27e   : > { %v2632_v24 = vsel %vm2631_vm3, %v3613_v7, %v2628_v34  ;;  %v2328_v59 = vmul.f32 %v3615_v16, %v2327_v4  ;;  %v2635_v48 = vmul.f32 %v3617_v56, %v2634_v40  ;;  %v2334_v17 = vmul.f32 %v3619_v3, %v4558_v61 }
 0x27f   : > { %v2907_v58 = vmul.f32 %v2632_v24, %v4333_v8  ;;  %3622 = vrsqrt.f32 %v4578_v10  ;;  %v1833_v2 = vpop.f32.mrf.mxu0  ;;  %vm2340_vm8 = vweird.f32 %v3619_v3  ;;  %vm2349_vm0 = vweird.f32 %v4578_v10 }
 0x280   : > { %v2332_v51 = vsel %vm2331_vm5, %v3615_v16, %v2328_v59  ;;  %v2636_v21 = vmul.f32 0.5, %v2635_v48  ;;  %v2335_v31 = vmul.f32 %v3619_v3, %v2334_v17  ;;  %v2502_v55 = vpop.xlane.xlu1 %2501  ;;  %v1922_v26 = vpop.f32.mrf.mxu1  ;;  %vm2341_vm11 = vmor %vm2339_vm10, %vm2340_vm8 }
 0x281   : > { %v3621_v50 = vpop.eup %3620  ;;  %2939 = vst [vmem:[%s4501_s10 + $0x20] sm:$0xff] %v2907_v58  ;;  %v4585_v33 = vmul.f32 %v2332_v51, %v4527_v25  ;;  %v4587_v7 = vmax.f32 %v2502_v55, 1e-24  ;;  %v4589_v5 = vadd.f32 %v1922_v26, %v1833_v2 }
 0x282   : > { %v2637_v49 = vsub.f32 1.5, %v2636_v21  ;;  %v2336_v8 = vmul.f32 0.5, %v2335_v31  ;;  %v2644_v6 = vmul.f32 %v3621_v50, %v4567_v44  ;;  %vm2650_vm12 = vweird.f32 %v3621_v50 }
 0x283   : > { %3624 = vrsqrt.f32 %v4587_v7  ;;  %v2064_v12 = vand.u32 2147483647, %v4589_v5  ;;  %v2477_v16 = vmul.f32 %v4585_v33, %v4585_v33  ;;  %vm2651_vm14 = vmor %vm2649_vm13, %vm2650_vm12  ;;  %vm2659_vm3 = vweird.f32 %v4587_v7 }
 0x284   : > { %v2638_v25 = vmul.f32 %v3617_v56, %v2637_v49  ;;  %v2337_v11 = vsub.f32 1.5, %v2336_v8  ;;  %v2645_v15 = vmul.f32 %v3621_v50, %v2644_v6 }
 0x285   : > { %v3623_v23 = vpop.eup %3622  ;;  %v4598_v22 = vadd.f32 1e-10, %v2064_v12  ;;  %2531 = vadd.xlane.f32.xlu1 %v2477_v16 }
 0x286   : > { %v2642_v39 = vsel %vm2641_vm9, %v3617_v56, %v2638_v25  ;;  %v2338_v36 = vmul.f32 %v3619_v3, %v2337_v11  ;;  %v2646_v14 = vmul.f32 0.5, %v2645_v15  ;;  %v2344_v52 = vmul.f32 %v3623_v23, %v4578_v10 }
 0x287   : > { %v2908_v27 = vmul.f32 %v2642_v39, %v4346_v63  ;;  %3626 = vrsqrt.f32 %v4598_v22  ;;  %v1836_v13 = vpop.f32.mrf.mxu0  ;;  %vm2350_vm15 = vweird.f32 %v3623_v23  ;;  %vm2359_vm6 = vweird.f32 %v4598_v22 }
 0x288   : > { %v2342_v42 = vsel %vm2341_vm11, %v3619_v3, %v2338_v36  ;;  %v2647_v41 = vsub.f32 1.5, %v2646_v14  ;;  %v2345_v60 = vmul.f32 %v3623_v23, %v2344_v52  ;;  %v2504_v61 = vpop.xlane.xlu2 %2503  ;;  %v1925_v43 = vpop.f32.mrf.mxu1  ;;  %vm2351_vm1 = vmor %vm2349_vm0, %vm2350_vm15 }
 0x289   : > { %v3625_v29 = vpop.eup %3624  ;;  %2940 = vst [vmem:[%s4501_s10 + $0x28] sm:$0xff] %v2908_v27  ;;  %v4605_v56 = vmul.f32 %v2342_v42, %v4547_v57  ;;  %v4607_v19 = vmax.f32 %v2504_v61, 1e-24  ;;  %v4609_v34 = vadd.f32 %v1925_v43, %v1836_v13 }
 0x28a   : > { %v2648_v63 = vmul.f32 %v3621_v50, %v2647_v41  ;;  %v2346_v4 = vmul.f32 0.5, %v2345_v60  ;;  %v2654_v40 = vmul.f32 %v3625_v29, %v4587_v7  ;;  %vm2660_vm2 = vweird.f32 %v3625_v29 }
 0x28b   : > { %3628 = vrsqrt.f32 %v4607_v19  ;;  %v2065_v3 = vand.u32 2147483647, %v4609_v34  ;;  %v2478_v57 = vmul.f32 %v4605_v56, %v4605_v56  ;;  %vm2661_vm4 = vmor %vm2659_vm3, %vm2660_vm2  ;;  %vm2669_vm9 = vweird.f32 %v4607_v19 }
 0x28c   : > { %v2652_v24 = vsel %vm2651_vm14, %v3621_v50, %v2648_v63  ;;  %v2347_v59 = vsub.f32 1.5, %v2346_v4  ;;  %v2655_v48 = vmul.f32 %v3625_v29, %v2654_v40 }
 0x28d   : > { %v3627_v17 = vpop.eup %3626  ;;  %v2909_v58 = vmul.f32 %v2652_v24, %v4361_v38  ;;  %v4618_v44 = vadd.f32 1e-10, %v2065_v3  ;;  %2533 = vadd.xlane.f32.xlu2 %v2478_v57 }
 0x28e   : > { %v2348_v2 = vmul.f32 %v3623_v23, %v2347_v59  ;;  %v2656_v51 = vmul.f32 0.5, %v2655_v48  ;;  %v2354_v21 = vmul.f32 %v3627_v17, %v4598_v22  ;;  %vm2360_vm5 = vweird.f32 %v3627_v17 }
 0x28f   : > { %2941 = vst [vmem:[%s4501_s10 + $0x30] sm:$0xff] %v2909_v58  ;;  %3630 = vrsqrt.f32 %v4618_v44  ;;  %v1838_v31 = vpop.f32.mrf.mxu0  ;;  %vm2361_vm7 = vmor %vm2359_vm6, %vm2360_vm5  ;;  %vm2369_vm12 = vweird.f32 %v4618_v44 }
 0x290   : > { %v2352_v55 = vsel %vm2351_vm1, %v3623_v23, %v2348_v2  ;;  %v2657_v26 = vsub.f32 1.5, %v2656_v51  ;;  %v2355_v50 = vmul.f32 %v3627_v17, %v2354_v21  ;;  %v2506_v49 = vpop.xlane.xlu0 %2505  ;;  %v1927_v38 = vpop.f32.mrf.mxu1 }
 0x291   : > { %v3629_v8 = vpop.eup %3628  ;;  %v4625_v6 = vmul.f32 %v2352_v55, %v4569_v32  ;;  %v4627_v12 = vmax.f32 %v2506_v49, 1e-24  ;;  %v4629_v10 = vadd.f32 %v1927_v38, %v1838_v31 }
 0x292   : > { %v2658_v16 = vmul.f32 %v3625_v29, %v2657_v26  ;;  %v2356_v25 = vmul.f32 0.5, %v2355_v50  ;;  %v2664_v11 = vmul.f32 %v3629_v8, %v4607_v19  ;;  %vm2670_vm8 = vweird.f32 %v3629_v8 }
 0x293   : > { %3632 = vrsqrt.f32 %v4627_v12  ;;  %v2066_v15 = vand.u32 2147483647, %v4629_v10  ;;  %v2479_v32 = vmul.f32 %v4625_v6, %v4625_v6  ;;  %vm2671_vm10 = vmor %vm2669_vm9, %vm2670_vm8  ;;  %vm2679_vm15 = vweird.f32 %v4627_v12 }
 0x294   : > { %v2662_v23 = vsel %vm2661_vm4, %v3625_v29, %v2658_v16  ;;  %v2357_v39 = vsub.f32 1.5, %v2356_v25  ;;  %v2665_v36 = vmul.f32 %v3629_v8, %v2664_v11 }
 0x295   : > { %v3631_v14 = vpop.eup %3630  ;;  %v2910_v52 = vmul.f32 %v2662_v23, %v4380_v1  ;;  %v4638_v7 = vadd.f32 1e-10, %v2066_v15  ;;  %2535 = vadd.xlane.f32.xlu0 %v2479_v32 }
 0x296   : > { %v2358_v27 = vmul.f32 %v3627_v17, %v2357_v39  ;;  %v2666_v13 = vmul.f32 0.5, %v2665_v36  ;;  %v2364_v42 = vmul.f32 %v3631_v14, %v4618_v44  ;;  %vm2370_vm11 = vweird.f32 %v3631_v14 }
 0x297   : > { %2942 = vst [vmem:[%s4501_s10 + $0x38] sm:$0xff] %v2910_v52  ;;  %3634 = vrsqrt.f32 %v4638_v7  ;;  %v1841_v41 = vpop.f32.mrf.mxu0  ;;  %vm2371_vm13 = vmor %vm2369_vm12, %vm2370_vm11  ;;  %vm2379_vm2 = vweird.f32 %v4638_v7 }
 0x298   : > { %v2362_v60 = vsel %vm2361_vm7, %v3627_v17, %v2358_v27  ;;  %v2667_v61 = vsub.f32 1.5, %v2666_v13  ;;  %v2365_v43 = vmul.f32 %v3631_v14, %v2364_v42  ;;  %v2508_v29 = vpop.xlane.xlu1 %2507  ;;  %v1930_v1 = vpop.f32.mrf.mxu1 }
 0x299   : > { %v3633_v63 = vpop.eup %3632  ;;  %v4645_v4 = vmul.f32 %v2362_v60, %v4589_v5  ;;  %v4647_v40 = vmax.f32 %v2508_v29, 1e-24  ;;  %v4649_v22 = vadd.f32 %v1930_v1, %v1841_v41 }
 0x29a   : > { %v2668_v3 = vmul.f32 %v3629_v8, %v2667_v61  ;;  %v2366_v57 = vmul.f32 0.5, %v2365_v43  ;;  %v2674_v24 = vmul.f32 %v3633_v63, %v4627_v12  ;;  %vm2680_vm14 = vweird.f32 %v3633_v63 }
 0x29b   : > { %3636 = vrsqrt.f32 %v4647_v40  ;;  %v2067_v59 = vand.u32 2147483647, %v4649_v22  ;;  %v2480_v5 = vmul.f32 %v4645_v4, %v4645_v4  ;;  %vm2681_vm0 = vmor %vm2679_vm15, %vm2680_vm14  ;;  %vm2689_vm5 = vweird.f32 %v4647_v40 }
 0x29c   : > { %v2672_v48 = vsel %vm2671_vm10, %v3629_v8, %v2668_v3  ;;  %v2367_v17 = vsub.f32 1.5, %v2366_v57  ;;  %v2675_v58 = vmul.f32 %v3633_v63, %v2674_v24 }
 0x29d   : > { %v3635_v2 = vpop.eup %3634  ;;  %v2911_v51 = vmul.f32 %v2672_v48, %v4395_v37  ;;  %v4658_v19 = vadd.f32 1e-10, %v2067_v59  ;;  %2537 = vadd.xlane.f32.xlu1 %v2480_v5 }
 0x29e   : > { %v2368_v21 = vmul.f32 %v3631_v14, %v2367_v17  ;;  %v2676_v31 = vmul.f32 0.5, %v2675_v58  ;;  %v2374_v55 = vmul.f32 %v3635_v2, %v4638_v7  ;;  %vm2380_vm1 = vweird.f32 %v3635_v2 }
 0x29f   : > { %2943 = vst [vmem:[%s4501_s10 + $0x40] sm:$0xff] %v2911_v51  ;;  %3638 = vrsqrt.f32 %v4658_v19  ;;  %v1843_v26 = vpop.f32.mrf.mxu0  ;;  %vm2381_vm3 = vmor %vm2379_vm2, %vm2380_vm1  ;;  %vm2389_vm8 = vweird.f32 %v4658_v19 }
 0x2a0   : > { %v2372_v50 = vsel %vm2371_vm13, %v3631_v14, %v2368_v21  ;;  %v2677_v49 = vsub.f32 1.5, %v2676_v31  ;;  %v2375_v38 = vmul.f32 %v3635_v2, %v2374_v55  ;;  %v2510_v8 = vpop.xlane.xlu2 %2509  ;;  %v1932_v37 = vpop.f32.mrf.mxu1 }
 0x2a1   : > { %v3637_v16 = vpop.eup %3636  ;;  %v4665_v25 = vmul.f32 %v2372_v50, %v4609_v34  ;;  %v4667_v11 = vmax.f32 %v2510_v8, 1e-24  ;;  %v4669_v44 = vadd.f32 %v1932_v37, %v1843_v26 }
 0x2a2   : > { %v2678_v15 = vmul.f32 %v3633_v63, %v2677_v49  ;;  %v2376_v32 = vmul.f32 0.5, %v2375_v38  ;;  %v2684_v23 = vmul.f32 %v3637_v16, %v4647_v40  ;;  %vm2690_vm4 = vweird.f32 %v3637_v16 }
 0x2a3   : > { %3640 = vrsqrt.f32 %v4667_v11  ;;  %v2068_v39 = vand.u32 2147483647, %v4669_v44  ;;  %v2481_v34 = vmul.f32 %v4665_v25, %v4665_v25  ;;  %vm2691_vm6 = vmor %vm2689_vm5, %vm2690_vm4  ;;  %vm2699_vm11 = vweird.f32 %v4667_v11 }
 0x2a4   : > { %v2682_v36 = vsel %vm2681_vm0, %v3633_v63, %v2678_v15  ;;  %v2377_v14 = vsub.f32 1.5, %v2376_v32  ;;  %v2685_v52 = vmul.f32 %v3637_v16, %v2684_v23 }
 0x2a5   : > { %v3639_v27 = vpop.eup %3638  ;;  %v2912_v13 = vmul.f32 %v2682_v36, %v4412_v45  ;;  %v4678_v12 = vadd.f32 1e-10, %v2068_v39  ;;  %2539 = vadd.xlane.f32.xlu2 %v2481_v34 }
 0x2a6   : > { %v2378_v42 = vmul.f32 %v3635_v2, %v2377_v14  ;;  %v2686_v41 = vmul.f32 0.5, %v2685_v52  ;;  %v2384_v60 = vmul.f32 %v3639_v27, %v4658_v19  ;;  %vm2390_vm7 = vweird.f32 %v3639_v27 }
 0x2a7   : > { %2944 = vst [vmem:[%s4501_s10 + $0x48] sm:$0xff] %v2912_v13  ;;  %3642 = vrsqrt.f32 %v4678_v12  ;;  %v1846_v61 = vpop.f32.mrf.mxu0  ;;  %vm2391_vm9 = vmor %vm2389_vm8, %vm2390_vm7  ;;  %vm2399_vm14 = vweird.f32 %v4678_v12 }
 0x2a8   : > { %v2382_v43 = vsel %vm2381_vm3, %v3635_v2, %v2378_v42  ;;  %v2687_v29 = vsub.f32 1.5, %v2686_v41  ;;  %v2385_v1 = vmul.f32 %v3639_v27, %v2384_v60  ;;  %v2512_v63 = vpop.xlane.xlu0 %2511  ;;  %v1935_v45 = vpop.f32.mrf.mxu1 }
 0x2a9   : > { %v3641_v3 = vpop.eup %3640  ;;  %v4685_v57 = vmul.f32 %v2382_v43, %v4629_v10  ;;  %v4687_v24 = vmax.f32 %v2512_v63, 1e-24  ;;  %v4689_v7 = vadd.f32 %v1935_v45, %v1846_v61 }
 0x2aa   : > { %v2688_v59 = vmul.f32 %v3637_v16, %v2687_v29  ;;  %v2386_v5 = vmul.f32 0.5, %v2385_v1  ;;  %v2694_v48 = vmul.f32 %v3641_v3, %v4667_v11  ;;  %vm2700_vm10 = vweird.f32 %v3641_v3 }
 0x2ab   : > { %3644 = vrsqrt.f32 %v4687_v24  ;;  %v2069_v17 = vand.u32 2147483647, %v4689_v7  ;;  %v2482_v10 = vmul.f32 %v4685_v57, %v4685_v57  ;;  %vm2701_vm12 = vmor %vm2699_vm11, %vm2700_vm10  ;;  %vm2709_vm1 = vweird.f32 %v4687_v24 }
 0x2ac   : > { %v2692_v58 = vsel %vm2691_vm6, %v3637_v16, %v2688_v59  ;;  %v2387_v2 = vsub.f32 1.5, %v2386_v5  ;;  %v2695_v51 = vmul.f32 %v3641_v3, %v2694_v48 }
 0x2ad   : > { %v3643_v21 = vpop.eup %3642  ;;  %v2913_v31 = vmul.f32 %v2692_v58, %v4426_v18  ;;  %v4698_v40 = vadd.f32 1e-10, %v2069_v17  ;;  %2541 = vadd.xlane.f32.xlu0 %v2482_v10 }
 0x2ae   : > { %v2388_v55 = vmul.f32 %v3639_v27, %v2387_v2  ;;  %v2696_v26 = vmul.f32 0.5, %v2695_v51  ;;  %v2394_v50 = vmul.f32 %v3643_v21, %v4678_v12  ;;  %vm2400_vm13 = vweird.f32 %v3643_v21 }
 0x2af   : > { %2945 = vst [vmem:[%s4501_s10 + $0x50] sm:$0xff] %v2913_v31  ;;  %3646 = vrsqrt.f32 %v4698_v40  ;;  %v1848_v49 = vpop.f32.mrf.mxu0  ;;  %vm2401_vm15 = vmor %vm2399_vm14, %vm2400_vm13  ;;  %vm2409_vm4 = vweird.f32 %v4698_v40 }
 0x2b0   : > { %v2392_v38 = vsel %vm2391_vm9, %v3639_v27, %v2388_v55  ;;  %v2697_v8 = vsub.f32 1.5, %v2696_v26  ;;  %v2395_v37 = vmul.f32 %v3643_v21, %v2394_v50  ;;  %v2514_v16 = vpop.xlane.xlu1 %2513  ;;  %v1937_v18 = vpop.f32.mrf.mxu1 }
 0x2b1   : > { %v3645_v15 = vpop.eup %3644  ;;  %v4705_v32 = vmul.f32 %v2392_v38, %v4649_v22  ;;  %v4707_v23 = vmax.f32 %v2514_v16, 1e-24  ;;  %v4709_v19 = vadd.f32 %v1937_v18, %v1848_v49 }
 0x2b2   : > { %v2698_v39 = vmul.f32 %v3641_v3, %v2697_v8  ;;  %v2396_v34 = vmul.f32 0.5, %v2395_v37  ;;  %v2704_v36 = vmul.f32 %v3645_v15, %v4687_v24  ;;  %vm2710_vm0 = vweird.f32 %v3645_v15 }
 0x2b3   : > { %3648 = vrsqrt.f32 %v4707_v23  ;;  %v2070_v14 = vand.u32 2147483647, %v4709_v19  ;;  %v2483_v22 = vmul.f32 %v4705_v32, %v4705_v32  ;;  %vm2711_vm2 = vmor %vm2709_vm1, %vm2710_vm0  ;;  %vm2719_vm7 = vweird.f32 %v4707_v23 }
 0x2b4   : > { %v2702_v52 = vsel %vm2701_vm12, %v3641_v3, %v2698_v39  ;;  %v2397_v27 = vsub.f32 1.5, %v2396_v34  ;;  %v2705_v13 = vmul.f32 %v3645_v15, %v2704_v36 }
 0x2b5   : > { %v3647_v42 = vpop.eup %3646  ;;  %v2914_v41 = vmul.f32 %v2702_v52, %v4435_v35  ;;  %v2102_v11 = vadd.f32 1e-10, %v2070_v14  ;;  %2543 = vadd.xlane.f32.xlu1 %v2483_v22 }
 0x2b6   : > { %v2398_v60 = vmul.f32 %v3643_v21, %v2397_v27  ;;  %v2706_v61 = vmul.f32 0.5, %v2705_v13  ;;  %v2404_v43 = vmul.f32 %v3647_v42, %v4698_v40  ;;  %vm2410_vm3 = vweird.f32 %v3647_v42 }
 0x2b7   : > { %2946 = vst [vmem:[%s4501_s10 + $0x58] sm:$0xff] %v2914_v41  ;;  %3650 = vrsqrt.f32 %v2102_v11  ;;  %vm2411_vm5 = vmor %vm2409_vm4, %vm2410_vm3  ;;  %vm2419_vm10 = vweird.f32 %v2102_v11 }
 0x2b8   : > { %v2402_v29 = vsel %vm2401_vm15, %v3643_v21, %v2398_v60  ;;  %v2707_v1 = vsub.f32 1.5, %v2706_v61  ;;  %v2405_v63 = vmul.f32 %v3647_v42, %v2404_v43  ;;  %v2516_v45 = vpop.xlane.xlu2 %2515 }
 0x2b9   : > { %v3649_v3 = vpop.eup %3648  ;;  %v4722_v59 = vmul.f32 %v2402_v29, %v4669_v44  ;;  %v2565_v35 = vmax.f32 %v2516_v45, 1e-24 }
 0x2ba   : > { %v2708_v5 = vmul.f32 %v3645_v15, %v2707_v1  ;;  %v2406_v12 = vmul.f32 0.5, %v2405_v63  ;;  %v2714_v48 = vmul.f32 %v3649_v3, %v4707_v23  ;;  %vm2720_vm6 = vweird.f32 %v3649_v3 }
 0x2bb   : > { %3652 = vrsqrt.f32 %v2565_v35  ;;  %v2484_v17 = vmul.f32 %v4722_v59, %v4722_v59  ;;  %vm2721_vm8 = vmor %vm2719_vm7, %vm2720_vm6  ;;  %vm2729_vm13 = vweird.f32 %v2565_v35 }
 0x2bc   : > { %v2712_v10 = vsel %vm2711_vm2, %v3645_v15, %v2708_v5  ;;  %v2407_v58 = vsub.f32 1.5, %v2406_v12  ;;  %v2715_v2 = vmul.f32 %v3649_v3, %v2714_v48 }
 0x2bd   : > { %v3651_v51 = vpop.eup %3650  ;;  %v2915_v44 = vmul.f32 %v2712_v10, %v4440_v9  ;;  %2545 = vadd.xlane.f32.xlu2 %v2484_v17 }
 0x2be   : > { %v2408_v21 = vmul.f32 %v3647_v42, %v2407_v58  ;;  %v2716_v24 = vmul.f32 0.5, %v2715_v2  ;;  %v2414_v31 = vmul.f32 %v3651_v51, %v2102_v11  ;;  %vm2420_vm9 = vweird.f32 %v3651_v51 }
 0x2bf   : > { %2947 = vst [vmem:[%s4501_s10 + $0x60] sm:$0xff] %v2915_v44  ;;  %vm2421_vm11 = vmor %vm2419_vm10, %vm2420_vm9 }
 0x2c0   : > { %v2412_v55 = vsel %vm2411_vm5, %v3647_v42, %v2408_v21  ;;  %v2717_v26 = vsub.f32 1.5, %v2716_v24  ;;  %v2415_v50 = vmul.f32 %v3651_v51, %v2414_v31  ;;  %v2518_v49 = vpop.xlane.xlu0 %2517 }
 0x2c1   : > { %v3653_v38 = vpop.eup %3652  ;;  %v4732_v8 = vmul.f32 %v2412_v55, %v4689_v7  ;;  %v2566_v37 = vmax.f32 %v2518_v49, 1e-24 }
 0x2c2   : > { %v2718_v16 = vmul.f32 %v3649_v3, %v2717_v26  ;;  %v2416_v9 = vmul.f32 0.5, %v2415_v50  ;;  %v2724_v40 = vmul.f32 %v3653_v38, %v2565_v35  ;;  %vm2730_vm12 = vweird.f32 %v3653_v38 }
 0x2c3   : > { %3654 = vrsqrt.f32 %v2566_v37  ;;  %v2485_v18 = vmul.f32 %v4732_v8, %v4732_v8  ;;  %vm2731_vm14 = vmor %vm2729_vm13, %vm2730_vm12  ;;  %vm2739_vm0 = vweird.f32 %v2566_v37 }
 0x2c4   : > { %v2722_v15 = vsel %vm2721_vm8, %v3649_v3, %v2718_v16  ;;  %v2417_v39 = vsub.f32 1.5, %v2416_v9  ;;  %v2725_v34 = vmul.f32 %v3653_v38, %v2724_v40 }
 0x2c5   : > { %v2916_v36 = vmul.f32 %v2722_v15, %v4445_v30  ;;  %2547 = vadd.xlane.f32.xlu0 %v2485_v18 }
 0x2c6   : > { %v2418_v7 = vmul.f32 %v3651_v51, %v2417_v39  ;;  %v2726_v14 = vmul.f32 0.5, %v2725_v34 }
 0x2c7   : > { %2948 = vst [vmem:[%s4501_s10 + $0x68] sm:$0xff] %v2916_v36 }
 0x2c8   : > { %v2422_v23 = vsel %vm2421_vm11, %v3651_v51, %v2418_v7  ;;  %v2727_v22 = vsub.f32 1.5, %v2726_v14  ;;  %v2520_v52 = vpop.xlane.xlu1 %2519 }
 0x2c9   : > { %v3655_v27 = vpop.eup %3654  ;;  %v4740_v13 = vmul.f32 %v2422_v23, %v4709_v19  ;;  %v2567_v42 = vmax.f32 %v2520_v52, 1e-24 }
 0x2ca   : > { %v2728_v41 = vmul.f32 %v3653_v38, %v2727_v22  ;;  %v2734_v60 = vmul.f32 %v3655_v27, %v2566_v37  ;;  %vm2740_vm15 = vweird.f32 %v3655_v27 }
 0x2cb   : > { %3656 = vrsqrt.f32 %v2567_v42  ;;  %v2486_v30 = vmul.f32 %v4740_v13, %v4740_v13  ;;  %vm2741_vm1 = vmor %vm2739_vm0, %vm2740_vm15  ;;  %vm2749_vm3 = vweird.f32 %v2567_v42 }
 0x2cc   : > { %v2732_v11 = vsel %vm2731_vm14, %v3653_v38, %v2728_v41  ;;  %v2735_v61 = vmul.f32 %v3655_v27, %v2734_v60 }
 0x2cd   : > { %v2917_v43 = vmul.f32 %v2732_v11, %v4449_v0  ;;  %2549 = vadd.xlane.f32.xlu1 %v2486_v30 }
 0x2ce   : > { %v2736_v29 = vmul.f32 0.5, %v2735_v61 }
 0x2cf   : > { %2949 = vst [vmem:[%s4501_s10 + $0x70] sm:$0xff] %v2917_v43 }
 0x2d0   : > { %v2737_v1 = vsub.f32 1.5, %v2736_v29  ;;  %v2522_v19 = vpop.xlane.xlu2 %2521 }
 0x2d1   : > { %v3657_v63 = vpop.eup %3656  ;;  %v2568_v45 = vmax.f32 %v2522_v19, 1e-24 }
 0x2d2   : > { %v2738_v3 = vmul.f32 %v3655_v27, %v2737_v1  ;;  %v2744_v35 = vmul.f32 %v3657_v63, %v2567_v42  ;;  %vm2750_vm2 = vweird.f32 %v3657_v63 }
 0x2d3   : > { %3658 = vrsqrt.f32 %v2568_v45  ;;  %vm2751_vm4 = vmor %vm2749_vm3, %vm2750_vm2  ;;  %vm2759_vm6 = vweird.f32 %v2568_v45 }
 0x2d4   : > { %v2742_v5 = vsel %vm2741_vm1, %v3655_v27, %v2738_v3  ;;  %v2745_v12 = vmul.f32 %v3657_v63, %v2744_v35 }
 0x2d5   : > { %v2918_v48 = vmul.f32 %v2742_v5, %v4456_v46 }
 0x2d6   : > { %v2746_v17 = vmul.f32 0.5, %v2745_v12 }
 0x2d7   : > { %2950 = vst [vmem:[%s4501_s10 + $0x78] sm:$0xff] %v2918_v48 }
 0x2d8   : > { %v2747_v0 = vsub.f32 1.5, %v2746_v17  ;;  %v2524_v10 = vpop.xlane.xlu0 %2523 }
 0x2d9   : > { %v3659_v58 = vpop.eup %3658  ;;  %v2569_v2 = vmax.f32 %v2524_v10, 1e-24 }
 0x2da   : > { %v2748_v51 = vmul.f32 %v3657_v63, %v2747_v0  ;;  %v2754_v44 = vmul.f32 %v3659_v58, %v2568_v45  ;;  %vm2760_vm5 = vweird.f32 %v3659_v58 }
 0x2db   : > { %3660 = vrsqrt.f32 %v2569_v2  ;;  %vm2761_vm7 = vmor %vm2759_vm6, %vm2760_vm5  ;;  %vm2769_vm9 = vweird.f32 %v2569_v2 }
 0x2dc   : > { %v2752_v21 = vsel %vm2751_vm4, %v3657_v63, %v2748_v51  ;;  %v2755_v24 = vmul.f32 %v3659_v58, %v2754_v44 }
 0x2dd   : > { %v2919_v31 = vmul.f32 %v2752_v21, %v4466_v20 }
 0x2de   : > { %v2756_v55 = vmul.f32 0.5, %v2755_v24 }
 0x2df   : > { %2951 = vst [vmem:[%s4501_s10 + $0x80] sm:$0xff] %v2919_v31 }
 0x2e0   : > { %v2757_v46 = vsub.f32 1.5, %v2756_v55  ;;  %v2526_v26 = vpop.xlane.xlu1 %2525 }
 0x2e1   : > { %v3661_v50 = vpop.eup %3660  ;;  %v2570_v49 = vmax.f32 %v2526_v26, 1e-24 }
 0x2e2   : > { %v2758_v38 = vmul.f32 %v3659_v58, %v2757_v46  ;;  %v2764_v37 = vmul.f32 %v3661_v50, %v2569_v2  ;;  %vm2770_vm8 = vweird.f32 %v3661_v50 }
 0x2e3   : > { %3662 = vrsqrt.f32 %v2570_v49  ;;  %vm2771_vm10 = vmor %vm2769_vm9, %vm2770_vm8  ;;  %vm2779_vm12 = vweird.f32 %v2570_v49 }
 0x2e4   : > { %v2762_v16 = vsel %vm2761_vm7, %v3659_v58, %v2758_v38  ;;  %v2765_v9 = vmul.f32 %v3661_v50, %v2764_v37 }
 0x2e5   : > { %v2920_v40 = vmul.f32 %v2762_v16, %v4482_v28 }
 0x2e6   : > { %v2766_v18 = vmul.f32 0.5, %v2765_v9 }
 0x2e7   : > { %2952 = vst [vmem:[%s4501_s10 + $0x88] sm:$0xff] %v2920_v40 }
 0x2e8   : > { %v2767_v20 = vsub.f32 1.5, %v2766_v18  ;;  %v2528_v15 = vpop.xlane.xlu2 %2527 }
 0x2e9   : > { %v3663_v39 = vpop.eup %3662  ;;  %v2571_v34 = vmax.f32 %v2528_v15, 1e-24 }
 0x2ea   : > { %v2768_v36 = vmul.f32 %v3661_v50, %v2767_v20  ;;  %v2774_v7 = vmul.f32 %v3663_v39, %v2570_v49  ;;  %vm2780_vm11 = vweird.f32 %v3663_v39 }
 0x2eb   : > { %3664 = vrsqrt.f32 %v2571_v34  ;;  %vm2781_vm13 = vmor %vm2779_vm12, %vm2780_vm11  ;;  %vm2789_vm15 = vweird.f32 %v2571_v34 }
 0x2ec   : > { %v2772_v14 = vsel %vm2771_vm10, %v3661_v50, %v2768_v36  ;;  %v2775_v23 = vmul.f32 %v3663_v39, %v2774_v7 }
 0x2ed   : > { %v2921_v22 = vmul.f32 %v2772_v14, %v4505_v47 }
 0x2ee   : > { %v2776_v52 = vmul.f32 0.5, %v2775_v23 }
 0x2ef   : > { %2953 = vst [vmem:[%s4501_s10 + $0x90] sm:$0xff] %v2921_v22 }
 0x2f0   : > { %v2777_v28 = vsub.f32 1.5, %v2776_v52  ;;  %v2530_v27 = vpop.xlane.xlu0 %2529 }
 0x2f1   : > { %v3665_v42 = vpop.eup %3664  ;;  %v2572_v41 = vmax.f32 %v2530_v27, 1e-24 }
 0x2f2   : > { %v2778_v60 = vmul.f32 %v3663_v39, %v2777_v28  ;;  %v2784_v30 = vmul.f32 %v3665_v42, %v2571_v34  ;;  %vm2790_vm14 = vweird.f32 %v3665_v42 }
 0x2f3   : > { %3666 = vrsqrt.f32 %v2572_v41  ;;  %vm2791_vm0 = vmor %vm2789_vm15, %vm2790_vm14  ;;  %vm2799_vm2 = vweird.f32 %v2572_v41 }
 0x2f4   : > { %v2782_v11 = vsel %vm2781_vm13, %v3663_v39, %v2778_v60  ;;  %v2785_v61 = vmul.f32 %v3665_v42, %v2784_v30 }
 0x2f5   : > { %v2922_v43 = vmul.f32 %v2782_v11, %v4525_v54 }
 0x2f6   : > { %v2786_v29 = vmul.f32 0.5, %v2785_v61 }
 0x2f7   : > { %2954 = vst [vmem:[%s4501_s10 + $0x98] sm:$0xff] %v2922_v43 }
 0x2f8   : > { %v2787_v47 = vsub.f32 1.5, %v2786_v29  ;;  %v2532_v1 = vpop.xlane.xlu1 %2531 }
 0x2f9   : > { %v3667_v19 = vpop.eup %3666  ;;  %v2573_v63 = vmax.f32 %v2532_v1, 1e-24 }
 0x2fa   : > { %v2788_v45 = vmul.f32 %v3665_v42, %v2787_v47  ;;  %v2794_v3 = vmul.f32 %v3667_v19, %v2572_v41  ;;  %vm2800_vm1 = vweird.f32 %v3667_v19 }
 0x2fb   : > { %3668 = vrsqrt.f32 %v2573_v63  ;;  %vm2801_vm3 = vmor %vm2799_vm2, %vm2800_vm1  ;;  %vm2809_vm5 = vweird.f32 %v2573_v63 }
 0x2fc   : > { %v2792_v35 = vsel %vm2791_vm0, %v3665_v42, %v2788_v45  ;;  %v2795_v5 = vmul.f32 %v3667_v19, %v2794_v3 }
 0x2fd   : > { %v2923_v12 = vmul.f32 %v2792_v35, %v4545_v62 }
 0x2fe   : > { %v2796_v48 = vmul.f32 0.5, %v2795_v5 }
 0x2ff   : > { %2955 = vst [vmem:[%s4501_s10 + $0xa0] sm:$0xff] %v2923_v12 }
 0x300   : > { %v2797_v54 = vsub.f32 1.5, %v2796_v48  ;;  %v2534_v17 = vpop.xlane.xlu2 %2533 }
 0x301   : > { %v3669_v0 = vpop.eup %3668  ;;  %v2574_v10 = vmax.f32 %v2534_v17, 1e-24 }
 0x302   : > { %v2798_v58 = vmul.f32 %v3667_v19, %v2797_v54  ;;  %v2804_v2 = vmul.f32 %v3669_v0, %v2573_v63  ;;  %vm2810_vm4 = vweird.f32 %v3669_v0 }
 0x303   : > { %3670 = vrsqrt.f32 %v2574_v10  ;;  %vm2811_vm6 = vmor %vm2809_vm5, %vm2810_vm4  ;;  %vm2819_vm8 = vweird.f32 %v2574_v10 }
 0x304   : > { %v2802_v51 = vsel %vm2801_vm3, %v3667_v19, %v2798_v58  ;;  %v2805_v44 = vmul.f32 %v3669_v0, %v2804_v2 }
 0x305   : > { %v2924_v21 = vmul.f32 %v2802_v51, %v4565_v53 }
 0x306   : > { %v2806_v24 = vmul.f32 0.5, %v2805_v44 }
 0x307   : > { %2956 = vst [vmem:[%s4501_s10 + $0xa8] sm:$0xff] %v2924_v21 }
 0x308   : > { %v2807_v62 = vsub.f32 1.5, %v2806_v24  ;;  %v2536_v31 = vpop.xlane.xlu0 %2535 }
 0x309   : > { %v3671_v55 = vpop.eup %3670  ;;  %v2575_v46 = vmax.f32 %v2536_v31, 1e-24 }
 0x30a   : > { %v2808_v26 = vmul.f32 %v3669_v0, %v2807_v62  ;;  %v2814_v50 = vmul.f32 %v3671_v55, %v2574_v10  ;;  %vm2820_vm7 = vweird.f32 %v3671_v55 }
 0x30b   : > { %3672 = vrsqrt.f32 %v2575_v46  ;;  %vm2821_vm9 = vmor %vm2819_vm8, %vm2820_vm7  ;;  %vm2829_vm11 = vweird.f32 %v2575_v46 }
 0x30c   : > { %v2812_v49 = vsel %vm2811_vm6, %v3669_v0, %v2808_v26  ;;  %v2815_v38 = vmul.f32 %v3671_v55, %v2814_v50 }
 0x30d   : > { %v2925_v37 = vmul.f32 %v2812_v49, %v4585_v33 }
 0x30e   : > { %v2816_v16 = vmul.f32 0.5, %v2815_v38 }
 0x30f   : > { %2957 = vst [vmem:[%s4501_s10 + $0xb0] sm:$0xff] %v2925_v37 }
 0x310   : > { %v2817_v53 = vsub.f32 1.5, %v2816_v16  ;;  %v2538_v9 = vpop.xlane.xlu1 %2537 }
 0x311   : > { %v3673_v40 = vpop.eup %3672  ;;  %v2576_v18 = vmax.f32 %v2538_v9, 1e-24 }
 0x312   : > { %v2818_v20 = vmul.f32 %v3671_v55, %v2817_v53  ;;  %v2824_v15 = vmul.f32 %v3673_v40, %v2575_v46  ;;  %vm2830_vm10 = vweird.f32 %v3673_v40 }
 0x313   : > { %3674 = vrsqrt.f32 %v2576_v18  ;;  %vm2831_vm12 = vmor %vm2829_vm11, %vm2830_vm10  ;;  %vm2839_vm14 = vweird.f32 %v2576_v18 }
 0x314   : > { %v2822_v39 = vsel %vm2821_vm9, %v3671_v55, %v2818_v20  ;;  %v2825_v34 = vmul.f32 %v3673_v40, %v2824_v15 }
 0x315   : > { %v2926_v36 = vmul.f32 %v2822_v39, %v4605_v56 }
 0x316   : > { %v2826_v7 = vmul.f32 0.5, %v2825_v34 }
 0x317   : > { %2958 = vst [vmem:[%s4501_s10 + $0xb8] sm:$0xff] %v2926_v36 }
 0x318   : > { %v2827_v33 = vsub.f32 1.5, %v2826_v7  ;;  %v2540_v14 = vpop.xlane.xlu2 %2539 }
 0x319   : > { %v3675_v23 = vpop.eup %3674  ;;  %v2577_v22 = vmax.f32 %v2540_v14, 1e-24 }
 0x31a   : > { %v2828_v52 = vmul.f32 %v3673_v40, %v2827_v33  ;;  %v2834_v28 = vmul.f32 %v3675_v23, %v2576_v18  ;;  %vm2840_vm13 = vweird.f32 %v3675_v23 }
 0x31b   : > { %3676 = vrsqrt.f32 %v2577_v22  ;;  %vm2841_vm15 = vmor %vm2839_vm14, %vm2840_vm13  ;;  %vm2849_vm1 = vweird.f32 %v2577_v22 }
 0x31c   : > { %v2832_v27 = vsel %vm2831_vm12, %v3673_v40, %v2828_v52  ;;  %v2835_v42 = vmul.f32 %v3675_v23, %v2834_v28 }
 0x31d   : > { %v2927_v41 = vmul.f32 %v2832_v27, %v4625_v6 }
 0x31e   : > { %v2836_v60 = vmul.f32 0.5, %v2835_v42 }
 0x31f   : > { %2959 = vst [vmem:[%s4501_s10 + $0xc0] sm:$0xff] %v2927_v41 }
 0x320   : > { %v2837_v56 = vsub.f32 1.5, %v2836_v60  ;;  %v2542_v30 = vpop.xlane.xlu0 %2541 }
 0x321   : > { %v3677_v11 = vpop.eup %3676  ;;  %v2578_v61 = vmax.f32 %v2542_v30, 1e-24 }
 0x322   : > { %v2838_v43 = vmul.f32 %v3675_v23, %v2837_v56  ;;  %v2844_v29 = vmul.f32 %v3677_v11, %v2577_v22  ;;  %vm2850_vm0 = vweird.f32 %v3677_v11 }
 0x323   : > { %3678 = vrsqrt.f32 %v2578_v61  ;;  %vm2851_vm2 = vmor %vm2849_vm1, %vm2850_vm0  ;;  %vm2859_vm4 = vweird.f32 %v2578_v61 }
 0x324   : > { %v2842_v47 = vsel %vm2841_vm15, %v3675_v23, %v2838_v43  ;;  %v2845_v1 = vmul.f32 %v3677_v11, %v2844_v29 }
 0x325   : > { %v2928_v19 = vmul.f32 %v2842_v47, %v4645_v4 }
 0x326   : > { %v2846_v63 = vmul.f32 0.5, %v2845_v1 }
 0x327   : > { %2960 = vst [vmem:[%s4501_s10 + $0xc8] sm:$0xff] %v2928_v19 }
 0x328   : > { %v2847_v6 = vsub.f32 1.5, %v2846_v63  ;;  %v2544_v45 = vpop.xlane.xlu1 %2543 }
 0x329   : > { %v3679_v3 = vpop.eup %3678  ;;  %v2579_v35 = vmax.f32 %v2544_v45, 1e-24 }
 0x32a   : > { %v2848_v5 = vmul.f32 %v3677_v11, %v2847_v6  ;;  %v2854_v12 = vmul.f32 %v3679_v3, %v2578_v61  ;;  %vm2860_vm3 = vweird.f32 %v3679_v3 }
 0x32b   : > { %3680 = vrsqrt.f32 %v2579_v35  ;;  %vm2861_vm5 = vmor %vm2859_vm4, %vm2860_vm3  ;;  %vm2869_vm7 = vweird.f32 %v2579_v35 }
 0x32c   : > { %v2852_v48 = vsel %vm2851_vm2, %v3677_v11, %v2848_v5  ;;  %v2855_v54 = vmul.f32 %v3679_v3, %v2854_v12 }
 0x32d   : > { %v2929_v17 = vmul.f32 %v2852_v48, %v4665_v25 }
 0x32e   : > { %v2856_v0 = vmul.f32 0.5, %v2855_v54 }
 0x32f   : > { %2961 = vst [vmem:[%s4501_s10 + $0xd0] sm:$0xff] %v2929_v17 }
 0x330   : > { %v2857_v4 = vsub.f32 1.5, %v2856_v0  ;;  %v2546_v10 = vpop.xlane.xlu2 %2545 }
 0x331   : > { %v3681_v58 = vpop.eup %3680  ;;  %v2580_v2 = vmax.f32 %v2546_v10, 1e-24 }
 0x332   : > { %v2858_v51 = vmul.f32 %v3679_v3, %v2857_v4  ;;  %v2864_v44 = vmul.f32 %v3681_v58, %v2579_v35  ;;  %vm2870_vm6 = vweird.f32 %v3681_v58 }
 0x333   : > { %3682 = vrsqrt.f32 %v2580_v2  ;;  %vm2871_vm8 = vmor %vm2869_vm7, %vm2870_vm6  ;;  %vm2879_vm10 = vweird.f32 %v2580_v2 }
 0x334   : > { %v2862_v21 = vsel %vm2861_vm5, %v3679_v3, %v2858_v51  ;;  %v2865_v24 = vmul.f32 %v3681_v58, %v2864_v44 }
 0x335   : > { %v2930_v62 = vmul.f32 %v2862_v21, %v4685_v57 }
 0x336   : > { %v2866_v31 = vmul.f32 0.5, %v2865_v24 }
 0x337   : > { %2962 = vst [vmem:[%s4501_s10 + $0xd8] sm:$0xff] %v2930_v62 }
 0x338   : > { %v2867_v25 = vsub.f32 1.5, %v2866_v31  ;;  %v2548_v55 = vpop.xlane.xlu0 %2547 }
 0x339   : > { %v3683_v46 = vpop.eup %3682  ;;  %v2581_v26 = vmax.f32 %v2548_v55, 1e-24 }
 0x33a   : > { %v2868_v50 = vmul.f32 %v3681_v58, %v2867_v25  ;;  %v2874_v49 = vmul.f32 %v3683_v46, %v2580_v2  ;;  %vm2880_vm9 = vweird.f32 %v3683_v46 }
 0x33b   : > { %3684 = vrsqrt.f32 %v2581_v26  ;;  %vm2881_vm11 = vmor %vm2879_vm10, %vm2880_vm9  ;;  %vm2889_vm13 = vweird.f32 %v2581_v26 }
 0x33c   : > { %v2872_v38 = vsel %vm2871_vm8, %v3681_v58, %v2868_v50  ;;  %v2875_v37 = vmul.f32 %v3683_v46, %v2874_v49 }
 0x33d   : > { %v2931_v16 = vmul.f32 %v2872_v38, %v4705_v32 }
 0x33e   : > { %v2876_v53 = vmul.f32 0.5, %v2875_v37 }
 0x33f   : > { %2963 = vst [vmem:[%s4501_s10 + $0xe0] sm:$0xff] %v2931_v16 }
 0x340   : > { %v2877_v57 = vsub.f32 1.5, %v2876_v53  ;;  %v2550_v9 = vpop.xlane.xlu1 %2549 }
 0x341   : > { %v3685_v40 = vpop.eup %3684  ;;  %v2582_v18 = vmax.f32 %v2550_v9, 1e-24 }
 0x342   : > { %v2878_v20 = vmul.f32 %v3683_v46, %v2877_v57  ;;  %v2884_v15 = vmul.f32 %v3685_v40, %v2581_v26  ;;  %vm2890_vm12 = vweird.f32 %v3685_v40 }
 0x343   : > { %3686 = vrsqrt.f32 %v2582_v18  ;;  %vm2891_vm14 = vmor %vm2889_vm13, %vm2890_vm12  ;;  %vm2899_vm0 = vweird.f32 %v2582_v18 }
 0x344   : > { %v2882_v39 = vsel %vm2881_vm11, %v3683_v46, %v2878_v20  ;;  %v2885_v34 = vmul.f32 %v3685_v40, %v2884_v15 }
 0x345   : > { %v2932_v36 = vmul.f32 %v2882_v39, %v4722_v59 }
 0x346   : > { %v2886_v32 = vmul.f32 0.5, %v2885_v34 }
 0x347   : > { %2964 = vst [vmem:[%s4501_s10 + $0xe8] sm:$0xff] %v2932_v36 }
 0x348   : > { %v2887_v7 = vsub.f32 1.5, %v2886_v32 }
 0x349   : > { %v3687_v33 = vpop.eup %3686 }
 0x34a   : > { %v2888_v14 = vmul.f32 %v3685_v40, %v2887_v7  ;;  %v2894_v23 = vmul.f32 %v3687_v33, %v2582_v18  ;;  %vm2900_vm15 = vweird.f32 %v3687_v33 }
 0x34b   : > { %vm2901_vm1 = vmor %vm2899_vm0, %vm2900_vm15 }
 0x34c   : > { %v2892_v22 = vsel %vm2891_vm14, %v3685_v40, %v2888_v14  ;;  %v2895_v52 = vmul.f32 %v3687_v33, %v2894_v23 }
 0x34d   : > { %v2933_v28 = vmul.f32 %v2892_v22, %v4732_v8 }
 0x34e   : > { %v2896_v27 = vmul.f32 0.5, %v2895_v52 }
 0x34f   : > { %2965 = vst [vmem:[%s4501_s10 + $0xf0] sm:$0xff] %v2933_v28 }
 0x350   : > { %v2897_v59 = vsub.f32 1.5, %v2896_v27 }
 0x352   : > { %v2898_v42 = vmul.f32 %v3687_v33, %v2897_v59 }
 0x354   : > { %v2902_v41 = vsel %vm2901_vm1, %v3687_v33, %v2898_v42 }
 0x355   : > { %v2934_v8 = vmul.f32 %v2902_v41, %v4740_v13 }
 0x357   : > { %2966 = vst [vmem:[%s4501_s10 + $0xf8] sm:$0xff] %v2934_v8 }
 0x358   : > { %3715 = shalt.err (!%p3712_p5)
}
 0x359   : > { %s3768_s24 = smov 128   ;;  %s3769_s10 = smov 8  }
 0x35a   : > { %3503 = dma.vmem_to_hbm [thread:$0]  (%p3840_p4), %s2981_s15, 4096, %s2983_s16, %s2968_s21, %s3768_s24, %s3768_s24, %s3769_s10  }
 0x35b PF: > { %p3509_p6 = scmp.ge.s32.totalorder %s3766_s23, 2  ;;  %s2997_s11 = sand.u32 1, %s3746_s18  }
 0x35c   : > { %s2998_s12 = scalar_lea.sflag [#allocation5], %s2997_s11 }
 0x35d   : > { %p3506_p7 = pnand %p3509_p6, %p3847_p8 }
 0x35f   : > { %p3507_p9 = pneg %p3506_p7 }
 0x361   : > { %3741 = dma.done.wait (%p3507_p9), %s2998_s12, 4096  }
 0x362   : > { %3743 = vsyncadd (%p3507_p9), %s2998_s12, 4294963200  ;;  %s18_s23 = sadd.s32 1, %s3766_s23   ;;  %s4827_s18 = smov %s3750_s19 }
 0x363   : > { %p15_p10 = scmp.ge.s32.totalorder %s18_s23, 4   ;;  %s4828_s19 = smov %s3754_s20 }
 0x364   : > { %s4829_s20 = smov %s3853_s6  ;;  %s4830_s21 = smov %s3762_s22 }
 0x365   : > { %s4831_s22 = smov %s4833_s26  ;;  %17 = sbr.rel (!%p15_p10) target bundleno = 4 (0x4), region = 95 }
 0x36a   :  { %3004 = vsyncpa [#allocation5], 1 }
 0x36b   :  { %3006 = vsyncpa [#allocation5 + $0x1], 1 }

</bundles_post_ra>
